<compile_context>
chip_gen: v6e
topology: v6e:2x2x1
jax: 0.10.0
libtpu: 0.0.40
codegen_flags: <defaults>
</compile_context>

<pallas_src>
import jax
import jax.numpy as jnp
from jax import lax
from jax.experimental import pallas as pl
from jax.experimental.pallas import tpu as pltpu

# ---- problem sizes ----
S, B, H = 8, 2, 32          # seq, batch, hidden_size
NH = 4                      # num_heads
HD = H // NH                # head_dim
I = 64                      # intermediate_size
EPS = 1e-12                 # layer_norm_eps
N = B * S                   # rows per stream (batch-major flattening)
WCOLS = 3 * H               # packed slab width (96)

# ---- static row offsets into the packed weight slab (per module) ----
OFF_QKV      = 0            # (H,  3H)  fused QKVLinear [q|k|v]
OFF_IMHA_Q   = 32           # (H,  H)   interact-MHA q in_proj (scale folded)
OFF_IMHA_KV  = 64           # (2H, 2H)  interact-MHA block-diag(k,v) in_proj
OFF_IMHA_OUT = 128          # (H,  H)   interact-MHA out_proj
OFF_TKV_KV   = 160          # (2H, 2H)  block-diag(interact_key[:H], interact_value[:H])
OFF_TKV_INT  = 224          # (H,  2H)  [interact_key[H:] | interact_value[H:]]
OFF_BMHA_Q   = 256          # (H,  H)   block-MHA q in_proj (scale folded)
OFF_BMHA_KV  = 288          # (2H, 2H)  block-MHA block-diag(k,v) in_proj
OFF_BMHA_OUT = 352          # (H,  H)   block-MHA out_proj
OFF_INTER    = 384          # (H,  I)   Intermediate dense
OFF_OUTD     = 416          # (I,  H)   Output dense
W_ROWS_PER_MOD = 480

# ---- static rows into the packed bias/LN slab (per module) ----
ROW_BQKV, ROW_BIMHA_Q, ROW_BIMHA_KV, ROW_BIMHA_OUT = 0, 1, 2, 3
ROW_BTKV, ROW_BBMHA_Q, ROW_BBMHA_KV, ROW_BBMHA_OUT = 4, 5, 6, 7
ROW_BI, ROW_BD = 8, 9
ROW_LN1G, ROW_LN1B, ROW_LN2G, ROW_LN2B = 10, 11, 12, 13
B_ROWS_PER_MOD = 16         # padded to a sublane multiple

MOD_Q, MOD_KB, MOD_H = 0, 1, 2


# =====================================================================
# Kernel
# =====================================================================
def cgilm_kernel(x_ref, w_ref, b_ref, out_ref):
    def wmat(m, off, rows, cols):
        base = m * W_ROWS_PER_MOD + off
        return w_ref[base:base + rows, :cols]

    def brow(m, row, cols):
        base = m * B_ROWS_PER_MOD + row
        return b_ref[base:base + 1, :cols]

    def linear(x, m, woff, din, dout, br):
        return (jnp.dot(x, wmat(m, woff, din, dout),
                        preferred_element_type=jnp.float32)
                + brow(m, br, dout))

    def layernorm(x, m, grow, brw):
        mu = jnp.mean(x, axis=-1, keepdims=True)
        xc = x - mu
        var = jnp.mean(xc * xc, axis=-1, keepdims=True)
        return xc * lax.rsqrt(var + EPS) * brow(m, grow, H) + brow(m, brw, H)

    def attention(qp, kp, vp):
        # qp already carries the 1/sqrt(HD) scale (folded into the q in_proj).
        heads = []
        for h in range(NH):
            c0 = h * HD
            qh = qp[:, c0:c0 + HD].reshape(B, S, HD)
            kh = kp[:, c0:c0 + HD].reshape(B, S, HD)
            vh = vp[:, c0:c0 + HD].reshape(B, S, HD)
            sc = lax.dot_general(qh, kh, (((2,), (2,)), ((0,), (0,))),
                                 preferred_element_type=jnp.float32)   # (B,S,S)
            mx = jnp.max(sc, axis=-1, keepdims=True)
            e = jnp.exp(sc - mx)
            p = e * pl.reciprocal(jnp.sum(e, axis=-1, keepdims=True), approx=True)
            ch = lax.dot_general(p, vh, (((2,), (1,)), ((0,), (0,))),
                                 preferred_element_type=jnp.float32)   # (B,S,HD)
            heads.append(ch.reshape(N, HD))
        return jnp.concatenate(heads, axis=-1)                          # (N,H)

    def mha(m, q, kv, off_q, row_bq, off_kv, row_bkv, off_out, row_bout):
        # q:(N,H) query stream, kv:(N,2H) contiguous [key|value] stream.
        qp = linear(q, m, off_q, H, H, row_bq)
        kvp = linear(kv, m, off_kv, 2 * H, 2 * H, row_bkv)
        ctx = attention(qp, kvp[:, :H], kvp[:, H:])
        return linear(ctx, m, off_out, H, H, row_bout)

    def qkv_linear(m, x):
        return linear(x, m, OFF_QKV, H, 3 * H, ROW_BQKV)                # (N,3H)=[q|k|v]

    def interact_attn(m, q, kv_prev):
        return mha(m, q, kv_prev, OFF_IMHA_Q, ROW_BIMHA_Q,
                   OFF_IMHA_KV, ROW_BIMHA_KV, OFF_IMHA_OUT, ROW_BIMHA_OUT)

    def tangled_block(m, qkv, interact):
        q = qkv[:, :H]
        kvin = qkv[:, H:]                                               # [k|v] contiguous
        kv = (jnp.dot(kvin, wmat(m, OFF_TKV_KV, 2 * H, 2 * H),
                      preferred_element_type=jnp.float32)
              + jnp.dot(interact, wmat(m, OFF_TKV_INT, H, 2 * H),
                        preferred_element_type=jnp.float32)
              + brow(m, ROW_BTKV, 2 * H))                               # (N,2H)=[kk|vv]
        attn_out = mha(m, q, kv, OFF_BMHA_Q, ROW_BBMHA_Q,
                       OFF_BMHA_KV, ROW_BBMHA_KV, OFF_BMHA_OUT, ROW_BBMHA_OUT)
        norm = layernorm(attn_out + q + kv[:, :H] + kv[:, H:], m, ROW_LN1G, ROW_LN1B)
        mid = jnp.maximum(linear(norm, m, OFF_INTER, H, I, ROW_BI), 0.0)
        out = linear(mid, m, OFF_OUTD, I, H, ROW_BD)
        return layernorm(out + norm, m, ROW_LN2G, ROW_LN2B)

    xq = x_ref[0:N, :]
    xkb = x_ref[N:2 * N, :]
    xh = x_ref[2 * N:3 * N, :]

    # All three QKVLinears are mutually independent -> hoisted for ILP.
    # block_q's result is reused for its second pass (identical by construction).
    qkv_q = qkv_linear(MOD_Q, xq)
    qkv_kb = qkv_linear(MOD_KB, xkb)
    qkv_h = qkv_linear(MOD_H, xh)

    # block_kb (interact k/v come from block_q's QKVLinear [k|v] slice)
    i_kb = interact_attn(MOD_KB, qkv_kb[:, :H], qkv_q[:, H:])
    hidden_kb = tangled_block(MOD_KB, qkv_kb, i_kb)

    # block_h
    i_h = interact_attn(MOD_H, qkv_h[:, :H], qkv_kb[:, H:])
    hidden_h = tangled_block(MOD_H, qkv_h, i_h)

    # block_q, second pass
    i_q = interact_attn(MOD_Q, qkv_q[:, :H], qkv_h[:, H:])
    hidden_q = tangled_block(MOD_Q, qkv_q, i_q)

    out_ref[0:N, :] = hidden_q
    out_ref[N:2 * N, :] = hidden_kb
    out_ref[2 * N:3 * N, :] = hidden_h


# =====================================================================
# Wrapper
# =====================================================================
def _to_rows(x):    # (S,B,H) -> (B*S,H) batch-major
    return jnp.transpose(x, (1, 0, 2)).reshape(B * S, H)


def _from_rows(x):  # (B*S,H) -> (S,B,H)
    return jnp.transpose(x.reshape(B, S, H), (1, 0, 2))


@jax.jit
def cycle_guided_forward(hq, hkb, hh, packed):
    w_slab, b_slab = packed
    x_stack = jnp.concatenate([_to_rows(hq), _to_rows(hkb), _to_rows(hh)], axis=0)
    vmem = pl.BlockSpec(memory_space=pltpu.MemorySpace.VMEM)
    out = pl.pallas_call(
        cgilm_kernel,
        out_shape=jax.ShapeDtypeStruct((3 * N, H), jnp.float32),
        in_specs=[vmem, vmem, vmem],
        out_specs=vmem,
    )(x_stack, w_slab, b_slab)
    return (_from_rows(out[0:N]),
            _from_rows(out[N:2 * N]),
            _from_rows(out[2 * N:3 * N]))


# =====================================================================
# Parameters: raw (PyTorch-layout, (in,out)) + packed slabs
# =====================================================================
def make_raw_module_params(key):
    ks = iter(jax.random.split(key, 40))

    def w(shape, scale=0.05):
        return (scale * jax.random.normal(next(ks), shape)).astype(jnp.float32)

    p = {}
    # QKVLinear
    p['lq_w'], p['lq_b'] = w((H, H)), w((H,), 0.01)
    p['lk_w'], p['lk_b'] = w((H, H)), w((H,), 0.01)
    p['lv_w'], p['lv_b'] = w((H, H)), w((H,), 0.01)
    # interact MultiAttention (in_proj split + out_proj)
    p['imha_wq'], p['imha_bq'] = w((H, H)), w((H,), 0.01)
    p['imha_wk'], p['imha_bk'] = w((H, H)), w((H,), 0.01)
    p['imha_wv'], p['imha_bv'] = w((H, H)), w((H,), 0.01)
    p['imha_wo'], p['imha_bo'] = w((H, H)), w((H,), 0.01)
    # TangledBlock
    p['tik_w'], p['tik_b'] = w((2 * H, H)), w((H,), 0.01)
    p['tiv_w'], p['tiv_b'] = w((2 * H, H)), w((H,), 0.01)
    p['bmha_wq'], p['bmha_bq'] = w((H, H)), w((H,), 0.01)
    p['bmha_wk'], p['bmha_bk'] = w((H, H)), w((H,), 0.01)
    p['bmha_wv'], p['bmha_bv'] = w((H, H)), w((H,), 0.01)
    p['bmha_wo'], p['bmha_bo'] = w((H, H)), w((H,), 0.01)
    p['ln1_g'] = (1.0 + 0.1 * jax.random.normal(next(ks), (H,))).astype(jnp.float32)
    p['ln1_b'] = w((H,), 0.01)
    p['wi'], p['bi'] = w((H, I)), w((I,), 0.01)
    p['wd'], p['bd'] = w((I, H)), w((H,), 0.01)
    p['ln2_g'] = (1.0 + 0.1 * jax.random.normal(next(ks), (H,))).astype(jnp.float32)
    p['ln2_b'] = w((H,), 0.01)
    return p


def pack_params(raw_modules):
    """Fuse + pack weights into one (1440,96) slab and biases/LN into (48,96)."""
    scale = 1.0 / (HD ** 0.5)
    Z = jnp.zeros((H, H), jnp.float32)

    def padw(w_):
        return jnp.pad(w_, ((0, 0), (0, WCOLS - w_.shape[1])))

    def padb(b_):
        b_ = jnp.reshape(b_, (1, -1))
        return jnp.pad(b_, ((0, 0), (0, WCOLS - b_.shape[1])))

    w_rows, b_rows = [], []
    for p in raw_modules:
        w_qkv = jnp.concatenate([p['lq_w'], p['lk_w'], p['lv_w']], axis=1)       # (H,3H)
        w_imha_q = p['imha_wq'] * scale                                           # (H,H)
        w_imha_kv = jnp.block([[p['imha_wk'], Z], [Z, p['imha_wv']]])             # (2H,2H)
        w_tkv_kv = jnp.block([[p['tik_w'][:H], Z], [Z, p['tiv_w'][:H]]])          # (2H,2H)
        w_tkv_int = jnp.concatenate([p['tik_w'][H:], p['tiv_w'][H:]], axis=1)     # (H,2H)
        w_bmha_q = p['bmha_wq'] * scale                                           # (H,H)
        w_bmha_kv = jnp.block([[p['bmha_wk'], Z], [Z, p['bmha_wv']]])             # (2H,2H)
        for w_ in (w_qkv, w_imha_q, w_imha_kv, p['imha_wo'], w_tkv_kv, w_tkv_int,
                   w_bmha_q, w_bmha_kv, p['bmha_wo'], p['wi'], p['wd']):
            w_rows.append(padw(w_))

        rows = [jnp.concatenate([p['lq_b'], p['lk_b'], p['lv_b']]),
                p['imha_bq'] * scale,
                jnp.concatenate([p['imha_bk'], p['imha_bv']]),
                p['imha_bo'],
                jnp.concatenate([p['tik_b'], p['tiv_b']]),
                p['bmha_bq'] * scale,
                jnp.concatenate([p['bmha_bk'], p['bmha_bv']]),
                p['bmha_bo'],
                p['bi'], p['bd'],
                p['ln1_g'], p['ln1_b'], p['ln2_g'], p['ln2_b']]
        mod_b = jnp.concatenate([padb(r) for r in rows], axis=0)                  # (14,96)
        b_rows.append(jnp.pad(mod_b, ((0, B_ROWS_PER_MOD - 14), (0, 0))))         # (16,96)

    return jnp.concatenate(w_rows, axis=0), jnp.concatenate(b_rows, axis=0)


# =====================================================================
# Pure-JAX reference (mirrors the PyTorch forward, eval mode, raw params)
# =====================================================================
def _ln_ref(x, g, b):
    mu = jnp.mean(x, axis=-1, keepdims=True)
    xc = x - mu
    var = jnp.mean(xc * xc, axis=-1, keepdims=True)
    return xc * lax.rsqrt(var + EPS) * g + b


def _mha_ref(q, k, v, wq, bq, wk, bk, wv, bv, wo, bo):
    # (S,B,H) seq-first, nn.MultiheadAttention semantics (eval, no mask).
    qp = (q.reshape(S * B, H) @ wq + bq) * (1.0 / (HD ** 0.5))
    kp = k.reshape(S * B, H) @ wk + bk
    vp = v.reshape(S * B, H) @ wv + bv
    qb = qp.reshape(S, B * NH, HD).transpose(1, 0, 2)
    kb = kp.reshape(S, B * NH, HD).transpose(1, 0, 2)
    vb = vp.reshape(S, B * NH, HD).transpose(1, 0, 2)
    sc = jnp.einsum('nqd,nkd->nqk', qb, kb)
    pr = jax.nn.softmax(sc, axis=-1)
    ctx = jnp.einsum('nqk,nkd->nqd', pr, vb)
    ctx2 = ctx.transpose(1, 0, 2).reshape(S * B, H)
    return (ctx2 @ wo + bo).reshape(S, B, H)


def _guided_ref(p, x, ik=None, iv=None):
    q = x @ p['lq_w'] + p['lq_b']
    k = x @ p['lk_w'] + p['lk_b']
    v = x @ p['lv_w'] + p['lv_b']
    if ik is None:
        return None, k, v
    interact = _mha_ref(q, ik, iv, p['imha_wq'], p['imha_bq'], p['imha_wk'],
                        p['imha_bk'], p['imha_wv'], p['imha_bv'],
                        p['imha_wo'], p['imha_bo'])
    kc = jnp.concatenate([k, interact], axis=2)
    vc = jnp.concatenate([v, interact], axis=2)
    kk = kc @ p['tik_w'] + p['tik_b']
    vv = vc @ p['tiv_w'] + p['tiv_b']
    attn = _mha_ref(q, kk, vv, p['bmha_wq'], p['bmha_bq'], p['bmha_wk'],
                    p['bmha_bk'], p['bmha_wv'], p['bmha_bv'],
                    p['bmha_wo'], p['bmha_bo'])
    norm = _ln_ref(attn + q + kk + vv, p['ln1_g'], p['ln1_b'])
    mid = jnp.maximum(norm @ p['wi'] + p['bi'], 0.0)
    out = _ln_ref(mid @ p['wd'] + p['bd'] + norm, p['ln2_g'], p['ln2_b'])
    return out, k, v


def reference_forward(hq, hkb, hh, raw):
    _, qi_k, qi_v = _guided_ref(raw[0], hq)
    hidden_kb, kbi_k, kbi_v = _guided_ref(raw[1], hkb, qi_k, qi_v)
    hidden_h, hi_k, hi_v = _guided_ref(raw[2], hh, kbi_k, kbi_v)
    hidden_q, _, _ = _guided_ref(raw[0], hq, hi_k, hi_v)
    return hidden_q, hidden_kb, hidden_h


# =====================================================================
if __name__ == "__main__":
    root = jax.random.PRNGKey(0)
    k1, k2, k3, kp1, kp2, kp3 = jax.random.split(root, 6)

    hidden_state_q = jax.random.normal(k1, (S, B, H), jnp.float32)
    hidden_state_kb = jax.random.normal(k2, (S, B, H), jnp.float32)
    hidden_state_h = jax.random.normal(k3, (S, B, H), jnp.float32)

    raw = [make_raw_module_params(k) for k in (kp1, kp2, kp3)]   # block_q, block_kb, block_h
    packed = pack_params(raw)

    out_q, out_kb, out_h = cycle_guided_forward(hidden_state_q, hidden_state_kb,
                                                hidden_state_h, packed)
    jax.block_until_ready((out_q, out_kb, out_h))

    ref_q, ref_kb, ref_h = reference_forward(hidden_state_q, hidden_state_kb,
                                             hidden_state_h, raw)
    for o, r, name in ((out_q, ref_q, "q"), (out_kb, ref_kb, "kb"), (out_h, ref_h, "h")):
        assert o.shape == (S, B, H)
        assert jnp.allclose(o, r, rtol=1e-2, atol=1e-2), f"mismatch vs reference ({name})"

    print("KERNEL_OK")
</pallas_src>

<mosaic_0001>
module attributes {stable_mosaic.version = 11 : i64} {
  func.func @cgilm_kernel(%arg0: memref<48x32xf32, #tpu.memory_space<vmem>>, %arg1: memref<1440x96xf32, #tpu.memory_space<vmem>>, %arg2: memref<48x96xf32, #tpu.memory_space<vmem>>, %arg3: memref<48x32xf32, #tpu.memory_space<vmem>>) attributes {dimension_semantics = [], scalar_prefetch = 0 : i64, scratch_operands = 0 : i64, tpu.core_type = #tpu.core_type<tc>} {
    %c0 = arith.constant 0 : index
    %c0_0 = arith.constant 0 : index
    %0 = vector.load %arg0[%c0, %c0_0] : memref<48x32xf32, #tpu.memory_space<vmem>>, vector<16x32xf32>
    %c16 = arith.constant 16 : index
    %c0_1 = arith.constant 0 : index
    %1 = vector.load %arg0[%c16, %c0_1] : memref<48x32xf32, #tpu.memory_space<vmem>>, vector<16x32xf32>
    %c32 = arith.constant 32 : index
    %c0_2 = arith.constant 0 : index
    %2 = vector.load %arg0[%c32, %c0_2] : memref<48x32xf32, #tpu.memory_space<vmem>>, vector<16x32xf32>
    %c0_3 = arith.constant 0 : index
    %c0_4 = arith.constant 0 : index
    %3 = vector.load %arg1[%c0_3, %c0_4] : memref<1440x96xf32, #tpu.memory_space<vmem>>, vector<32x96xf32>
    %cst = arith.constant dense<0.000000e+00> : vector<16x96xf32>
    %4 = tpu.matmul %0, %3, %cst {dimension_numbers = #tpu.dot_dimension_numbers<[1], [0], [0], [1], [0, 0, 1, 1], [], []>} : vector<16x32xf32>, vector<32x96xf32>, vector<16x96xf32> -> vector<16x96xf32>
    %c0_5 = arith.constant 0 : index
    %c0_6 = arith.constant 0 : index
    %5 = vector.load %arg2[%c0_5, %c0_6] : memref<48x96xf32, #tpu.memory_space<vmem>>, vector<1x96xf32>
    %6 = vector.broadcast %5 : vector<1x96xf32> to vector<16x96xf32>
    %7 = arith.addf %4, %6 : vector<16x96xf32>
    %c480 = arith.constant 480 : index
    %c0_7 = arith.constant 0 : index
    %8 = vector.load %arg1[%c480, %c0_7] : memref<1440x96xf32, #tpu.memory_space<vmem>>, vector<32x96xf32>
    %cst_8 = arith.constant dense<0.000000e+00> : vector<16x96xf32>
    %9 = tpu.matmul %1, %8, %cst_8 {dimension_numbers = #tpu.dot_dimension_numbers<[1], [0], [0], [1], [0, 0, 1, 1], [], []>} : vector<16x32xf32>, vector<32x96xf32>, vector<16x96xf32> -> vector<16x96xf32>
    %c16_9 = arith.constant 16 : index
    %c0_10 = arith.constant 0 : index
    %10 = vector.load %arg2[%c16_9, %c0_10] : memref<48x96xf32, #tpu.memory_space<vmem>>, vector<1x96xf32>
    %11 = vector.broadcast %10 : vector<1x96xf32> to vector<16x96xf32>
    %12 = arith.addf %9, %11 : vector<16x96xf32>
    %c960 = arith.constant 960 : index
    %c0_11 = arith.constant 0 : index
    %13 = vector.load %arg1[%c960, %c0_11] : memref<1440x96xf32, #tpu.memory_space<vmem>>, vector<32x96xf32>
    %cst_12 = arith.constant dense<0.000000e+00> : vector<16x96xf32>
    %14 = tpu.matmul %2, %13, %cst_12 {dimension_numbers = #tpu.dot_dimension_numbers<[1], [0], [0], [1], [0, 0, 1, 1], [], []>} : vector<16x32xf32>, vector<32x96xf32>, vector<16x96xf32> -> vector<16x96xf32>
    %c32_13 = arith.constant 32 : index
    %c0_14 = arith.constant 0 : index
    %15 = vector.load %arg2[%c32_13, %c0_14] : memref<48x96xf32, #tpu.memory_space<vmem>>, vector<1x96xf32>
    %16 = vector.broadcast %15 : vector<1x96xf32> to vector<16x96xf32>
    %17 = arith.addf %14, %16 : vector<16x96xf32>
    %18 = vector.extract_strided_slice %12 {offsets = [0, 0], sizes = [16, 32], strides = [1, 1]} : vector<16x96xf32> to vector<16x32xf32>
    %19 = vector.extract_strided_slice %7 {offsets = [0, 32], sizes = [16, 64], strides = [1, 1]} : vector<16x96xf32> to vector<16x64xf32>
    %c512 = arith.constant 512 : index
    %c0_15 = arith.constant 0 : index
    %20 = vector.load %arg1[%c512, %c0_15] : memref<1440x96xf32, #tpu.memory_space<vmem>>, vector<32x32xf32>
    %cst_16 = arith.constant dense<0.000000e+00> : vector<16x32xf32>
    %21 = tpu.matmul %18, %20, %cst_16 {dimension_numbers = #tpu.dot_dimension_numbers<[1], [0], [0], [1], [0, 0, 1, 1], [], []>} : vector<16x32xf32>, vector<32x32xf32>, vector<16x32xf32> -> vector<16x32xf32>
    %c17 = arith.constant 17 : index
    %c0_17 = arith.constant 0 : index
    %22 = vector.load %arg2[%c17, %c0_17] : memref<48x96xf32, #tpu.memory_space<vmem>>, vector<1x32xf32>
    %23 = vector.broadcast %22 : vector<1x32xf32> to vector<16x32xf32>
    %24 = arith.addf %21, %23 : vector<16x32xf32>
    %c544 = arith.constant 544 : index
    %c0_18 = arith.constant 0 : index
    %25 = vector.load %arg1[%c544, %c0_18] : memref<1440x96xf32, #tpu.memory_space<vmem>>, vector<64x64xf32>
    %cst_19 = arith.constant dense<0.000000e+00> : vector<16x64xf32>
    %26 = tpu.matmul %19, %25, %cst_19 {dimension_numbers = #tpu.dot_dimension_numbers<[1], [0], [0], [1], [0, 0, 1, 1], [], []>} : vector<16x64xf32>, vector<64x64xf32>, vector<16x64xf32> -> vector<16x64xf32>
    %c18 = arith.constant 18 : index
    %c0_20 = arith.constant 0 : index
    %27 = vector.load %arg2[%c18, %c0_20] : memref<48x96xf32, #tpu.memory_space<vmem>>, vector<1x64xf32>
    %28 = vector.broadcast %27 : vector<1x64xf32> to vector<16x64xf32>
    %29 = arith.addf %26, %28 : vector<16x64xf32>
    %30 = vector.extract_strided_slice %29 {offsets = [0, 0], sizes = [16, 32], strides = [1, 1]} : vector<16x64xf32> to vector<16x32xf32>
    %31 = vector.extract_strided_slice %29 {offsets = [0, 32], sizes = [16, 32], strides = [1, 1]} : vector<16x64xf32> to vector<16x32xf32>
    %32 = vector.extract_strided_slice %24 {offsets = [0, 0], sizes = [16, 8], strides = [1, 1]} : vector<16x32xf32> to vector<16x8xf32>
    %33 = vector.shape_cast %32 : vector<16x8xf32> to vector<2x8x8xf32>
    %34 = vector.extract_strided_slice %30 {offsets = [0, 0], sizes = [16, 8], strides = [1, 1]} : vector<16x32xf32> to vector<16x8xf32>
    %35 = vector.shape_cast %34 : vector<16x8xf32> to vector<2x8x8xf32>
    %36 = vector.extract_strided_slice %31 {offsets = [0, 0], sizes = [16, 8], strides = [1, 1]} : vector<16x32xf32> to vector<16x8xf32>
    %37 = vector.shape_cast %36 : vector<16x8xf32> to vector<2x8x8xf32>
    %cst_21 = arith.constant dense<0.000000e+00> : vector<2x8x8xf32>
    %38 = tpu.matmul %33, %35, %cst_21 {dimension_numbers = #tpu.dot_dimension_numbers<[2], [2], [1], [1], [0, 0, 0, 1, 1, 1], [0], [0]>} : vector<2x8x8xf32>, vector<2x8x8xf32>, vector<2x8x8xf32> -> vector<2x8x8xf32>
    %cst_22 = arith.constant dense<0xFF800000> : vector<2x8xf32>
    %39 = vector.multi_reduction <maximumf>, %38, %cst_22 [2] : vector<2x8x8xf32> to vector<2x8xf32>
    %40 = vector.shape_cast %39 : vector<2x8xf32> to vector<2x8x1xf32>
    %41 = vector.broadcast %40 : vector<2x8x1xf32> to vector<2x8x8xf32>
    %42 = arith.subf %38, %41 : vector<2x8x8xf32>
    %43 = math.exp %42 : vector<2x8x8xf32>
    %cst_23 = arith.constant dense<0.000000e+00> : vector<2x8xf32>
    %44 = vector.multi_reduction <add>, %43, %cst_23 [2] : vector<2x8x8xf32> to vector<2x8xf32>
    %45 = vector.shape_cast %44 : vector<2x8xf32> to vector<2x8x1xf32>
    %46 = tpu.reciprocal %45 {approx = true} : vector<2x8x1xf32> -> vector<2x8x1xf32>
    %47 = vector.broadcast %46 : vector<2x8x1xf32> to vector<2x8x8xf32>
    %48 = arith.mulf %43, %47 : vector<2x8x8xf32>
    %cst_24 = arith.constant dense<0.000000e+00> : vector<2x8x8xf32>
    %49 = tpu.matmul %48, %37, %cst_24 {dimension_numbers = #tpu.dot_dimension_numbers<[2], [1], [1], [2], [0, 0, 0, 1, 1, 2], [0], [0]>} : vector<2x8x8xf32>, vector<2x8x8xf32>, vector<2x8x8xf32> -> vector<2x8x8xf32>
    %50 = vector.shape_cast %49 : vector<2x8x8xf32> to vector<16x8xf32>
    %51 = vector.extract_strided_slice %24 {offsets = [0, 8], sizes = [16, 8], strides = [1, 1]} : vector<16x32xf32> to vector<16x8xf32>
    %52 = vector.shape_cast %51 : vector<16x8xf32> to vector<2x8x8xf32>
    %53 = vector.extract_strided_slice %30 {offsets = [0, 8], sizes = [16, 8], strides = [1, 1]} : vector<16x32xf32> to vector<16x8xf32>
    %54 = vector.shape_cast %53 : vector<16x8xf32> to vector<2x8x8xf32>
    %55 = vector.extract_strided_slice %31 {offsets = [0, 8], sizes = [16, 8], strides = [1, 1]} : vector<16x32xf32> to vector<16x8xf32>
    %56 = vector.shape_cast %55 : vector<16x8xf32> to vector<2x8x8xf32>
    %cst_25 = arith.constant dense<0.000000e+00> : vector<2x8x8xf32>
    %57 = tpu.matmul %52, %54, %cst_25 {dimension_numbers = #tpu.dot_dimension_numbers<[2], [2], [1], [1], [0, 0, 0, 1, 1, 1], [0], [0]>} : vector<2x8x8xf32>, vector<2x8x8xf32>, vector<2x8x8xf32> -> vector<2x8x8xf32>
    %cst_26 = arith.constant dense<0xFF800000> : vector<2x8xf32>
    %58 = vector.multi_reduction <maximumf>, %57, %cst_26 [2] : vector<2x8x8xf32> to vector<2x8xf32>
    %59 = vector.shape_cast %58 : vector<2x8xf32> to vector<2x8x1xf32>
    %60 = vector.broadcast %59 : vector<2x8x1xf32> to vector<2x8x8xf32>
    %61 = arith.subf %57, %60 : vector<2x8x8xf32>
    %62 = math.exp %61 : vector<2x8x8xf32>
    %cst_27 = arith.constant dense<0.000000e+00> : vector<2x8xf32>
    %63 = vector.multi_reduction <add>, %62, %cst_27 [2] : vector<2x8x8xf32> to vector<2x8xf32>
    %64 = vector.shape_cast %63 : vector<2x8xf32> to vector<2x8x1xf32>
    %65 = tpu.reciprocal %64 {approx = true} : vector<2x8x1xf32> -> vector<2x8x1xf32>
    %66 = vector.broadcast %65 : vector<2x8x1xf32> to vector<2x8x8xf32>
    %67 = arith.mulf %62, %66 : vector<2x8x8xf32>
    %cst_28 = arith.constant dense<0.000000e+00> : vector<2x8x8xf32>
    %68 = tpu.matmul %67, %56, %cst_28 {dimension_numbers = #tpu.dot_dimension_numbers<[2], [1], [1], [2], [0, 0, 0, 1, 1, 2], [0], [0]>} : vector<2x8x8xf32>, vector<2x8x8xf32>, vector<2x8x8xf32> -> vector<2x8x8xf32>
    %69 = vector.shape_cast %68 : vector<2x8x8xf32> to vector<16x8xf32>
    %70 = vector.extract_strided_slice %24 {offsets = [0, 16], sizes = [16, 8], strides = [1, 1]} : vector<16x32xf32> to vector<16x8xf32>
    %71 = vector.shape_cast %70 : vector<16x8xf32> to vector<2x8x8xf32>
    %72 = vector.extract_strided_slice %30 {offsets = [0, 16], sizes = [16, 8], strides = [1, 1]} : vector<16x32xf32> to vector<16x8xf32>
    %73 = vector.shape_cast %72 : vector<16x8xf32> to vector<2x8x8xf32>
    %74 = vector.extract_strided_slice %31 {offsets = [0, 16], sizes = [16, 8], strides = [1, 1]} : vector<16x32xf32> to vector<16x8xf32>
    %75 = vector.shape_cast %74 : vector<16x8xf32> to vector<2x8x8xf32>
    %cst_29 = arith.constant dense<0.000000e+00> : vector<2x8x8xf32>
    %76 = tpu.matmul %71, %73, %cst_29 {dimension_numbers = #tpu.dot_dimension_numbers<[2], [2], [1], [1], [0, 0, 0, 1, 1, 1], [0], [0]>} : vector<2x8x8xf32>, vector<2x8x8xf32>, vector<2x8x8xf32> -> vector<2x8x8xf32>
    %cst_30 = arith.constant dense<0xFF800000> : vector<2x8xf32>
    %77 = vector.multi_reduction <maximumf>, %76, %cst_30 [2] : vector<2x8x8xf32> to vector<2x8xf32>
    %78 = vector.shape_cast %77 : vector<2x8xf32> to vector<2x8x1xf32>
    %79 = vector.broadcast %78 : vector<2x8x1xf32> to vector<2x8x8xf32>
    %80 = arith.subf %76, %79 : vector<2x8x8xf32>
    %81 = math.exp %80 : vector<2x8x8xf32>
    %cst_31 = arith.constant dense<0.000000e+00> : vector<2x8xf32>
    %82 = vector.multi_reduction <add>, %81, %cst_31 [2] : vector<2x8x8xf32> to vector<2x8xf32>
    %83 = vector.shape_cast %82 : vector<2x8xf32> to vector<2x8x1xf32>
    %84 = tpu.reciprocal %83 {approx = true} : vector<2x8x1xf32> -> vector<2x8x1xf32>
    %85 = vector.broadcast %84 : vector<2x8x1xf32> to vector<2x8x8xf32>
    %86 = arith.mulf %81, %85 : vector<2x8x8xf32>
    %cst_32 = arith.constant dense<0.000000e+00> : vector<2x8x8xf32>
    %87 = tpu.matmul %86, %75, %cst_32 {dimension_numbers = #tpu.dot_dimension_numbers<[2], [1], [1], [2], [0, 0, 0, 1, 1, 2], [0], [0]>} : vector<2x8x8xf32>, vector<2x8x8xf32>, vector<2x8x8xf32> -> vector<2x8x8xf32>
    %88 = vector.shape_cast %87 : vector<2x8x8xf32> to vector<16x8xf32>
    %89 = vector.extract_strided_slice %24 {offsets = [0, 24], sizes = [16, 8], strides = [1, 1]} : vector<16x32xf32> to vector<16x8xf32>
    %90 = vector.shape_cast %89 : vector<16x8xf32> to vector<2x8x8xf32>
    %91 = vector.extract_strided_slice %30 {offsets = [0, 24], sizes = [16, 8], strides = [1, 1]} : vector<16x32xf32> to vector<16x8xf32>
    %92 = vector.shape_cast %91 : vector<16x8xf32> to vector<2x8x8xf32>
    %93 = vector.extract_strided_slice %31 {offsets = [0, 24], sizes = [16, 8], strides = [1, 1]} : vector<16x32xf32> to vector<16x8xf32>
    %94 = vector.shape_cast %93 : vector<16x8xf32> to vector<2x8x8xf32>
    %cst_33 = arith.constant dense<0.000000e+00> : vector<2x8x8xf32>
    %95 = tpu.matmul %90, %92, %cst_33 {dimension_numbers = #tpu.dot_dimension_numbers<[2], [2], [1], [1], [0, 0, 0, 1, 1, 1], [0], [0]>} : vector<2x8x8xf32>, vector<2x8x8xf32>, vector<2x8x8xf32> -> vector<2x8x8xf32>
    %cst_34 = arith.constant dense<0xFF800000> : vector<2x8xf32>
    %96 = vector.multi_reduction <maximumf>, %95, %cst_34 [2] : vector<2x8x8xf32> to vector<2x8xf32>
    %97 = vector.shape_cast %96 : vector<2x8xf32> to vector<2x8x1xf32>
    %98 = vector.broadcast %97 : vector<2x8x1xf32> to vector<2x8x8xf32>
    %99 = arith.subf %95, %98 : vector<2x8x8xf32>
    %100 = math.exp %99 : vector<2x8x8xf32>
    %cst_35 = arith.constant dense<0.000000e+00> : vector<2x8xf32>
    %101 = vector.multi_reduction <add>, %100, %cst_35 [2] : vector<2x8x8xf32> to vector<2x8xf32>
    %102 = vector.shape_cast %101 : vector<2x8xf32> to vector<2x8x1xf32>
    %103 = tpu.reciprocal %102 {approx = true} : vector<2x8x1xf32> -> vector<2x8x1xf32>
    %104 = vector.broadcast %103 : vector<2x8x1xf32> to vector<2x8x8xf32>
    %105 = arith.mulf %100, %104 : vector<2x8x8xf32>
    %cst_36 = arith.constant dense<0.000000e+00> : vector<2x8x8xf32>
    %106 = tpu.matmul %105, %94, %cst_36 {dimension_numbers = #tpu.dot_dimension_numbers<[2], [1], [1], [2], [0, 0, 0, 1, 1, 2], [0], [0]>} : vector<2x8x8xf32>, vector<2x8x8xf32>, vector<2x8x8xf32> -> vector<2x8x8xf32>
    %107 = vector.shape_cast %106 : vector<2x8x8xf32> to vector<16x8xf32>
    %108 = tpu.concatenate %50, %69, %88, %107 in 1 : vector<16x8xf32>, vector<16x8xf32>, vector<16x8xf32>, vector<16x8xf32> -> vector<16x32xf32>
    %c608 = arith.constant 608 : index
    %c0_37 = arith.constant 0 : index
    %109 = vector.load %arg1[%c608, %c0_37] : memref<1440x96xf32, #tpu.memory_space<vmem>>, vector<32x32xf32>
    %cst_38 = arith.constant dense<0.000000e+00> : vector<16x32xf32>
    %110 = tpu.matmul %108, %109, %cst_38 {dimension_numbers = #tpu.dot_dimension_numbers<[1], [0], [0], [1], [0, 0, 1, 1], [], []>} : vector<16x32xf32>, vector<32x32xf32>, vector<16x32xf32> -> vector<16x32xf32>
    %c19 = arith.constant 19 : index
    %c0_39 = arith.constant 0 : index
    %111 = vector.load %arg2[%c19, %c0_39] : memref<48x96xf32, #tpu.memory_space<vmem>>, vector<1x32xf32>
    %112 = vector.broadcast %111 : vector<1x32xf32> to vector<16x32xf32>
    %113 = arith.addf %110, %112 : vector<16x32xf32>
    %114 = vector.extract_strided_slice %12 {offsets = [0, 0], sizes = [16, 32], strides = [1, 1]} : vector<16x96xf32> to vector<16x32xf32>
    %115 = vector.extract_strided_slice %12 {offsets = [0, 32], sizes = [16, 64], strides = [1, 1]} : vector<16x96xf32> to vector<16x64xf32>
    %c640 = arith.constant 640 : index
    %c0_40 = arith.constant 0 : index
    %116 = vector.load %arg1[%c640, %c0_40] : memref<1440x96xf32, #tpu.memory_space<vmem>>, vector<64x64xf32>
    %cst_41 = arith.constant dense<0.000000e+00> : vector<16x64xf32>
    %117 = tpu.matmul %115, %116, %cst_41 {dimension_numbers = #tpu.dot_dimension_numbers<[1], [0], [0], [1], [0, 0, 1, 1], [], []>} : vector<16x64xf32>, vector<64x64xf32>, vector<16x64xf32> -> vector<16x64xf32>
    %c704 = arith.constant 704 : index
    %c0_42 = arith.constant 0 : index
    %118 = vector.load %arg1[%c704, %c0_42] : memref<1440x96xf32, #tpu.memory_space<vmem>>, vector<32x64xf32>
    %cst_43 = arith.constant dense<0.000000e+00> : vector<16x64xf32>
    %119 = tpu.matmul %113, %118, %cst_43 {dimension_numbers = #tpu.dot_dimension_numbers<[1], [0], [0], [1], [0, 0, 1, 1], [], []>} : vector<16x32xf32>, vector<32x64xf32>, vector<16x64xf32> -> vector<16x64xf32>
    %120 = arith.addf %117, %119 : vector<16x64xf32>
    %c20 = arith.constant 20 : index
    %c0_44 = arith.constant 0 : index
    %121 = vector.load %arg2[%c20, %c0_44] : memref<48x96xf32, #tpu.memory_space<vmem>>, vector<1x64xf32>
    %122 = vector.broadcast %121 : vector<1x64xf32> to vector<16x64xf32>
    %123 = arith.addf %120, %122 : vector<16x64xf32>
    %c736 = arith.constant 736 : index
    %c0_45 = arith.constant 0 : index
    %124 = vector.load %arg1[%c736, %c0_45] : memref<1440x96xf32, #tpu.memory_space<vmem>>, vector<32x32xf32>
    %cst_46 = arith.constant dense<0.000000e+00> : vector<16x32xf32>
    %125 = tpu.matmul %114, %124, %cst_46 {dimension_numbers = #tpu.dot_dimension_numbers<[1], [0], [0], [1], [0, 0, 1, 1], [], []>} : vector<16x32xf32>, vector<32x32xf32>, vector<16x32xf32> -> vector<16x32xf32>
    %c21 = arith.constant 21 : index
    %c0_47 = arith.constant 0 : index
    %126 = vector.load %arg2[%c21, %c0_47] : memref<48x96xf32, #tpu.memory_space<vmem>>, vector<1x32xf32>
    %127 = vector.broadcast %126 : vector<1x32xf32> to vector<16x32xf32>
    %128 = arith.addf %125, %127 : vector<16x32xf32>
    %c768 = arith.constant 768 : index
    %c0_48 = arith.constant 0 : index
    %129 = vector.load %arg1[%c768, %c0_48] : memref<1440x96xf32, #tpu.memory_space<vmem>>, vector<64x64xf32>
    %cst_49 = arith.constant dense<0.000000e+00> : vector<16x64xf32>
    %130 = tpu.matmul %123, %129, %cst_49 {dimension_numbers = #tpu.dot_dimension_numbers<[1], [0], [0], [1], [0, 0, 1, 1], [], []>} : vector<16x64xf32>, vector<64x64xf32>, vector<16x64xf32> -> vector<16x64xf32>
    %c22 = arith.constant 22 : index
    %c0_50 = arith.constant 0 : index
    %131 = vector.load %arg2[%c22, %c0_50] : memref<48x96xf32, #tpu.memory_space<vmem>>, vector<1x64xf32>
    %132 = vector.broadcast %131 : vector<1x64xf32> to vector<16x64xf32>
    %133 = arith.addf %130, %132 : vector<16x64xf32>
    %134 = vector.extract_strided_slice %133 {offsets = [0, 0], sizes = [16, 32], strides = [1, 1]} : vector<16x64xf32> to vector<16x32xf32>
    %135 = vector.extract_strided_slice %133 {offsets = [0, 32], sizes = [16, 32], strides = [1, 1]} : vector<16x64xf32> to vector<16x32xf32>
    %136 = vector.extract_strided_slice %128 {offsets = [0, 0], sizes = [16, 8], strides = [1, 1]} : vector<16x32xf32> to vector<16x8xf32>
    %137 = vector.shape_cast %136 : vector<16x8xf32> to vector<2x8x8xf32>
    %138 = vector.extract_strided_slice %134 {offsets = [0, 0], sizes = [16, 8], strides = [1, 1]} : vector<16x32xf32> to vector<16x8xf32>
    %139 = vector.shape_cast %138 : vector<16x8xf32> to vector<2x8x8xf32>
    %140 = vector.extract_strided_slice %135 {offsets = [0, 0], sizes = [16, 8], strides = [1, 1]} : vector<16x32xf32> to vector<16x8xf32>
    %141 = vector.shape_cast %140 : vector<16x8xf32> to vector<2x8x8xf32>
    %cst_51 = arith.constant dense<0.000000e+00> : vector<2x8x8xf32>
    %142 = tpu.matmul %137, %139, %cst_51 {dimension_numbers = #tpu.dot_dimension_numbers<[2], [2], [1], [1], [0, 0, 0, 1, 1, 1], [0], [0]>} : vector<2x8x8xf32>, vector<2x8x8xf32>, vector<2x8x8xf32> -> vector<2x8x8xf32>
    %cst_52 = arith.constant dense<0xFF800000> : vector<2x8xf32>
    %143 = vector.multi_reduction <maximumf>, %142, %cst_52 [2] : vector<2x8x8xf32> to vector<2x8xf32>
    %144 = vector.shape_cast %143 : vector<2x8xf32> to vector<2x8x1xf32>
    %145 = vector.broadcast %144 : vector<2x8x1xf32> to vector<2x8x8xf32>
    %146 = arith.subf %142, %145 : vector<2x8x8xf32>
    %147 = math.exp %146 : vector<2x8x8xf32>
    %cst_53 = arith.constant dense<0.000000e+00> : vector<2x8xf32>
    %148 = vector.multi_reduction <add>, %147, %cst_53 [2] : vector<2x8x8xf32> to vector<2x8xf32>
    %149 = vector.shape_cast %148 : vector<2x8xf32> to vector<2x8x1xf32>
    %150 = tpu.reciprocal %149 {approx = true} : vector<2x8x1xf32> -> vector<2x8x1xf32>
    %151 = vector.broadcast %150 : vector<2x8x1xf32> to vector<2x8x8xf32>
    %152 = arith.mulf %147, %151 : vector<2x8x8xf32>
    %cst_54 = arith.constant dense<0.000000e+00> : vector<2x8x8xf32>
    %153 = tpu.matmul %152, %141, %cst_54 {dimension_numbers = #tpu.dot_dimension_numbers<[2], [1], [1], [2], [0, 0, 0, 1, 1, 2], [0], [0]>} : vector<2x8x8xf32>, vector<2x8x8xf32>, vector<2x8x8xf32> -> vector<2x8x8xf32>
    %154 = vector.shape_cast %153 : vector<2x8x8xf32> to vector<16x8xf32>
    %155 = vector.extract_strided_slice %128 {offsets = [0, 8], sizes = [16, 8], strides = [1, 1]} : vector<16x32xf32> to vector<16x8xf32>
    %156 = vector.shape_cast %155 : vector<16x8xf32> to vector<2x8x8xf32>
    %157 = vector.extract_strided_slice %134 {offsets = [0, 8], sizes = [16, 8], strides = [1, 1]} : vector<16x32xf32> to vector<16x8xf32>
    %158 = vector.shape_cast %157 : vector<16x8xf32> to vector<2x8x8xf32>
    %159 = vector.extract_strided_slice %135 {offsets = [0, 8], sizes = [16, 8], strides = [1, 1]} : vector<16x32xf32> to vector<16x8xf32>
    %160 = vector.shape_cast %159 : vector<16x8xf32> to vector<2x8x8xf32>
    %cst_55 = arith.constant dense<0.000000e+00> : vector<2x8x8xf32>
    %161 = tpu.matmul %156, %158, %cst_55 {dimension_numbers = #tpu.dot_dimension_numbers<[2], [2], [1], [1], [0, 0, 0, 1, 1, 1], [0], [0]>} : vector<2x8x8xf32>, vector<2x8x8xf32>, vector<2x8x8xf32> -> vector<2x8x8xf32>
    %cst_56 = arith.constant dense<0xFF800000> : vector<2x8xf32>
    %162 = vector.multi_reduction <maximumf>, %161, %cst_56 [2] : vector<2x8x8xf32> to vector<2x8xf32>
    %163 = vector.shape_cast %162 : vector<2x8xf32> to vector<2x8x1xf32>
    %164 = vector.broadcast %163 : vector<2x8x1xf32> to vector<2x8x8xf32>
    %165 = arith.subf %161, %164 : vector<2x8x8xf32>
    %166 = math.exp %165 : vector<2x8x8xf32>
    %cst_57 = arith.constant dense<0.000000e+00> : vector<2x8xf32>
    %167 = vector.multi_reduction <add>, %166, %cst_57 [2] : vector<2x8x8xf32> to vector<2x8xf32>
    %168 = vector.shape_cast %167 : vector<2x8xf32> to vector<2x8x1xf32>
    %169 = tpu.reciprocal %168 {approx = true} : vector<2x8x1xf32> -> vector<2x8x1xf32>
    %170 = vector.broadcast %169 : vector<2x8x1xf32> to vector<2x8x8xf32>
    %171 = arith.mulf %166, %170 : vector<2x8x8xf32>
    %cst_58 = arith.constant dense<0.000000e+00> : vector<2x8x8xf32>
    %172 = tpu.matmul %171, %160, %cst_58 {dimension_numbers = #tpu.dot_dimension_numbers<[2], [1], [1], [2], [0, 0, 0, 1, 1, 2], [0], [0]>} : vector<2x8x8xf32>, vector<2x8x8xf32>, vector<2x8x8xf32> -> vector<2x8x8xf32>
    %173 = vector.shape_cast %172 : vector<2x8x8xf32> to vector<16x8xf32>
    %174 = vector.extract_strided_slice %128 {offsets = [0, 16], sizes = [16, 8], strides = [1, 1]} : vector<16x32xf32> to vector<16x8xf32>
    %175 = vector.shape_cast %174 : vector<16x8xf32> to vector<2x8x8xf32>
    %176 = vector.extract_strided_slice %134 {offsets = [0, 16], sizes = [16, 8], strides = [1, 1]} : vector<16x32xf32> to vector<16x8xf32>
    %177 = vector.shape_cast %176 : vector<16x8xf32> to vector<2x8x8xf32>
    %178 = vector.extract_strided_slice %135 {offsets = [0, 16], sizes = [16, 8], strides = [1, 1]} : vector<16x32xf32> to vector<16x8xf32>
    %179 = vector.shape_cast %178 : vector<16x8xf32> to vector<2x8x8xf32>
    %cst_59 = arith.constant dense<0.000000e+00> : vector<2x8x8xf32>
    %180 = tpu.matmul %175, %177, %cst_59 {dimension_numbers = #tpu.dot_dimension_numbers<[2], [2], [1], [1], [0, 0, 0, 1, 1, 1], [0], [0]>} : vector<2x8x8xf32>, vector<2x8x8xf32>, vector<2x8x8xf32> -> vector<2x8x8xf32>
    %cst_60 = arith.constant dense<0xFF800000> : vector<2x8xf32>
    %181 = vector.multi_reduction <maximumf>, %180, %cst_60 [2] : vector<2x8x8xf32> to vector<2x8xf32>
    %182 = vector.shape_cast %181 : vector<2x8xf32> to vector<2x8x1xf32>
    %183 = vector.broadcast %182 : vector<2x8x1xf32> to vector<2x8x8xf32>
    %184 = arith.subf %180, %183 : vector<2x8x8xf32>
    %185 = math.exp %184 : vector<2x8x8xf32>
    %cst_61 = arith.constant dense<0.000000e+00> : vector<2x8xf32>
    %186 = vector.multi_reduction <add>, %185, %cst_61 [2] : vector<2x8x8xf32> to vector<2x8xf32>
    %187 = vector.shape_cast %186 : vector<2x8xf32> to vector<2x8x1xf32>
    %188 = tpu.reciprocal %187 {approx = true} : vector<2x8x1xf32> -> vector<2x8x1xf32>
    %189 = vector.broadcast %188 : vector<2x8x1xf32> to vector<2x8x8xf32>
    %190 = arith.mulf %185, %189 : vector<2x8x8xf32>
    %cst_62 = arith.constant dense<0.000000e+00> : vector<2x8x8xf32>
    %191 = tpu.matmul %190, %179, %cst_62 {dimension_numbers = #tpu.dot_dimension_numbers<[2], [1], [1], [2], [0, 0, 0, 1, 1, 2], [0], [0]>} : vector<2x8x8xf32>, vector<2x8x8xf32>, vector<2x8x8xf32> -> vector<2x8x8xf32>
    %192 = vector.shape_cast %191 : vector<2x8x8xf32> to vector<16x8xf32>
    %193 = vector.extract_strided_slice %128 {offsets = [0, 24], sizes = [16, 8], strides = [1, 1]} : vector<16x32xf32> to vector<16x8xf32>
    %194 = vector.shape_cast %193 : vector<16x8xf32> to vector<2x8x8xf32>
    %195 = vector.extract_strided_slice %134 {offsets = [0, 24], sizes = [16, 8], strides = [1, 1]} : vector<16x32xf32> to vector<16x8xf32>
    %196 = vector.shape_cast %195 : vector<16x8xf32> to vector<2x8x8xf32>
    %197 = vector.extract_strided_slice %135 {offsets = [0, 24], sizes = [16, 8], strides = [1, 1]} : vector<16x32xf32> to vector<16x8xf32>
    %198 = vector.shape_cast %197 : vector<16x8xf32> to vector<2x8x8xf32>
    %cst_63 = arith.constant dense<0.000000e+00> : vector<2x8x8xf32>
    %199 = tpu.matmul %194, %196, %cst_63 {dimension_numbers = #tpu.dot_dimension_numbers<[2], [2], [1], [1], [0, 0, 0, 1, 1, 1], [0], [0]>} : vector<2x8x8xf32>, vector<2x8x8xf32>, vector<2x8x8xf32> -> vector<2x8x8xf32>
    %cst_64 = arith.constant dense<0xFF800000> : vector<2x8xf32>
    %200 = vector.multi_reduction <maximumf>, %199, %cst_64 [2] : vector<2x8x8xf32> to vector<2x8xf32>
    %201 = vector.shape_cast %200 : vector<2x8xf32> to vector<2x8x1xf32>
    %202 = vector.broadcast %201 : vector<2x8x1xf32> to vector<2x8x8xf32>
    %203 = arith.subf %199, %202 : vector<2x8x8xf32>
    %204 = math.exp %203 : vector<2x8x8xf32>
    %cst_65 = arith.constant dense<0.000000e+00> : vector<2x8xf32>
    %205 = vector.multi_reduction <add>, %204, %cst_65 [2] : vector<2x8x8xf32> to vector<2x8xf32>
    %206 = vector.shape_cast %205 : vector<2x8xf32> to vector<2x8x1xf32>
    %207 = tpu.reciprocal %206 {approx = true} : vector<2x8x1xf32> -> vector<2x8x1xf32>
    %208 = vector.broadcast %207 : vector<2x8x1xf32> to vector<2x8x8xf32>
    %209 = arith.mulf %204, %208 : vector<2x8x8xf32>
    %cst_66 = arith.constant dense<0.000000e+00> : vector<2x8x8xf32>
    %210 = tpu.matmul %209, %198, %cst_66 {dimension_numbers = #tpu.dot_dimension_numbers<[2], [1], [1], [2], [0, 0, 0, 1, 1, 2], [0], [0]>} : vector<2x8x8xf32>, vector<2x8x8xf32>, vector<2x8x8xf32> -> vector<2x8x8xf32>
    %211 = vector.shape_cast %210 : vector<2x8x8xf32> to vector<16x8xf32>
    %212 = tpu.concatenate %154, %173, %192, %211 in 1 : vector<16x8xf32>, vector<16x8xf32>, vector<16x8xf32>, vector<16x8xf32> -> vector<16x32xf32>
    %c832 = arith.constant 832 : index
    %c0_67 = arith.constant 0 : index
    %213 = vector.load %arg1[%c832, %c0_67] : memref<1440x96xf32, #tpu.memory_space<vmem>>, vector<32x32xf32>
    %cst_68 = arith.constant dense<0.000000e+00> : vector<16x32xf32>
    %214 = tpu.matmul %212, %213, %cst_68 {dimension_numbers = #tpu.dot_dimension_numbers<[1], [0], [0], [1], [0, 0, 1, 1], [], []>} : vector<16x32xf32>, vector<32x32xf32>, vector<16x32xf32> -> vector<16x32xf32>
    %c23 = arith.constant 23 : index
    %c0_69 = arith.constant 0 : index
    %215 = vector.load %arg2[%c23, %c0_69] : memref<48x96xf32, #tpu.memory_space<vmem>>, vector<1x32xf32>
    %216 = vector.broadcast %215 : vector<1x32xf32> to vector<16x32xf32>
    %217 = arith.addf %214, %216 : vector<16x32xf32>
    %218 = arith.addf %217, %114 : vector<16x32xf32>
    %219 = vector.extract_strided_slice %123 {offsets = [0, 0], sizes = [16, 32], strides = [1, 1]} : vector<16x64xf32> to vector<16x32xf32>
    %220 = arith.addf %218, %219 : vector<16x32xf32>
    %221 = vector.extract_strided_slice %123 {offsets = [0, 32], sizes = [16, 32], strides = [1, 1]} : vector<16x64xf32> to vector<16x32xf32>
    %222 = arith.addf %220, %221 : vector<16x32xf32>
    %cst_70 = arith.constant dense<0.000000e+00> : vector<16xf32>
    %223 = vector.multi_reduction <add>, %222, %cst_70 [1] : vector<16x32xf32> to vector<16xf32>
    %224 = vector.shape_cast %223 : vector<16xf32> to vector<16x1xf32>
    %cst_71 = arith.constant 3.200000e+01 : f32
    %225 = vector.broadcast %cst_71 : f32 to vector<16x1xf32>
    %226 = arith.divf %224, %225 : vector<16x1xf32>
    %227 = vector.broadcast %226 : vector<16x1xf32> to vector<16x32xf32>
    %228 = arith.subf %222, %227 : vector<16x32xf32>
    %229 = arith.mulf %228, %228 : vector<16x32xf32>
    %cst_72 = arith.constant dense<0.000000e+00> : vector<16xf32>
    %230 = vector.multi_reduction <add>, %229, %cst_72 [1] : vector<16x32xf32> to vector<16xf32>
    %231 = vector.shape_cast %230 : vector<16xf32> to vector<16x1xf32>
    %cst_73 = arith.constant 3.200000e+01 : f32
    %232 = vector.broadcast %cst_73 : f32 to vector<16x1xf32>
    %233 = arith.divf %231, %232 : vector<16x1xf32>
    %cst_74 = arith.constant 9.99999996E-13 : f32
    %234 = vector.broadcast %cst_74 : f32 to vector<16x1xf32>
    %235 = arith.addf %233, %234 : vector<16x1xf32>
    %236 = math.rsqrt %235 : vector<16x1xf32>
    %237 = vector.broadcast %236 : vector<16x1xf32> to vector<16x32xf32>
    %238 = arith.mulf %228, %237 : vector<16x32xf32>
    %c26 = arith.constant 26 : index
    %c0_75 = arith.constant 0 : index
    %239 = vector.load %arg2[%c26, %c0_75] : memref<48x96xf32, #tpu.memory_space<vmem>>, vector<1x32xf32>
    %240 = vector.broadcast %239 : vector<1x32xf32> to vector<16x32xf32>
    %241 = arith.mulf %238, %240 : vector<16x32xf32>
    %c27 = arith.constant 27 : index
    %c0_76 = arith.constant 0 : index
    %242 = vector.load %arg2[%c27, %c0_76] : memref<48x96xf32, #tpu.memory_space<vmem>>, vector<1x32xf32>
    %243 = vector.broadcast %242 : vector<1x32xf32> to vector<16x32xf32>
    %244 = arith.addf %241, %243 : vector<16x32xf32>
    %c864 = arith.constant 864 : index
    %c0_77 = arith.constant 0 : index
    %245 = vector.load %arg1[%c864, %c0_77] : memref<1440x96xf32, #tpu.memory_space<vmem>>, vector<32x64xf32>
    %cst_78 = arith.constant dense<0.000000e+00> : vector<16x64xf32>
    %246 = tpu.matmul %244, %245, %cst_78 {dimension_numbers = #tpu.dot_dimension_numbers<[1], [0], [0], [1], [0, 0, 1, 1], [], []>} : vector<16x32xf32>, vector<32x64xf32>, vector<16x64xf32> -> vector<16x64xf32>
    %c24 = arith.constant 24 : index
    %c0_79 = arith.constant 0 : index
    %247 = vector.load %arg2[%c24, %c0_79] : memref<48x96xf32, #tpu.memory_space<vmem>>, vector<1x64xf32>
    %248 = vector.broadcast %247 : vector<1x64xf32> to vector<16x64xf32>
    %249 = arith.addf %246, %248 : vector<16x64xf32>
    %cst_80 = arith.constant 0.000000e+00 : f32
    %250 = vector.broadcast %cst_80 : f32 to vector<16x64xf32>
    %251 = arith.maximumf %249, %250 : vector<16x64xf32>
    %c896 = arith.constant 896 : index
    %c0_81 = arith.constant 0 : index
    %252 = vector.load %arg1[%c896, %c0_81] : memref<1440x96xf32, #tpu.memory_space<vmem>>, vector<64x32xf32>
    %cst_82 = arith.constant dense<0.000000e+00> : vector<16x32xf32>
    %253 = tpu.matmul %251, %252, %cst_82 {dimension_numbers = #tpu.dot_dimension_numbers<[1], [0], [0], [1], [0, 0, 1, 1], [], []>} : vector<16x64xf32>, vector<64x32xf32>, vector<16x32xf32> -> vector<16x32xf32>
    %c25 = arith.constant 25 : index
    %c0_83 = arith.constant 0 : index
    %254 = vector.load %arg2[%c25, %c0_83] : memref<48x96xf32, #tpu.memory_space<vmem>>, vector<1x32xf32>
    %255 = vector.broadcast %254 : vector<1x32xf32> to vector<16x32xf32>
    %256 = arith.addf %253, %255 : vector<16x32xf32>
    %257 = arith.addf %256, %244 : vector<16x32xf32>
    %cst_84 = arith.constant dense<0.000000e+00> : vector<16xf32>
    %258 = vector.multi_reduction <add>, %257, %cst_84 [1] : vector<16x32xf32> to vector<16xf32>
    %259 = vector.shape_cast %258 : vector<16xf32> to vector<16x1xf32>
    %cst_85 = arith.constant 3.200000e+01 : f32
    %260 = vector.broadcast %cst_85 : f32 to vector<16x1xf32>
    %261 = arith.divf %259, %260 : vector<16x1xf32>
    %262 = vector.broadcast %261 : vector<16x1xf32> to vector<16x32xf32>
    %263 = arith.subf %257, %262 : vector<16x32xf32>
    %264 = arith.mulf %263, %263 : vector<16x32xf32>
    %cst_86 = arith.constant dense<0.000000e+00> : vector<16xf32>
    %265 = vector.multi_reduction <add>, %264, %cst_86 [1] : vector<16x32xf32> to vector<16xf32>
    %266 = vector.shape_cast %265 : vector<16xf32> to vector<16x1xf32>
    %cst_87 = arith.constant 3.200000e+01 : f32
    %267 = vector.broadcast %cst_87 : f32 to vector<16x1xf32>
    %268 = arith.divf %266, %267 : vector<16x1xf32>
    %cst_88 = arith.constant 9.99999996E-13 : f32
    %269 = vector.broadcast %cst_88 : f32 to vector<16x1xf32>
    %270 = arith.addf %268, %269 : vector<16x1xf32>
    %271 = math.rsqrt %270 : vector<16x1xf32>
    %272 = vector.broadcast %271 : vector<16x1xf32> to vector<16x32xf32>
    %273 = arith.mulf %263, %272 : vector<16x32xf32>
    %c28 = arith.constant 28 : index
    %c0_89 = arith.constant 0 : index
    %274 = vector.load %arg2[%c28, %c0_89] : memref<48x96xf32, #tpu.memory_space<vmem>>, vector<1x32xf32>
    %275 = vector.broadcast %274 : vector<1x32xf32> to vector<16x32xf32>
    %276 = arith.mulf %273, %275 : vector<16x32xf32>
    %c29 = arith.constant 29 : index
    %c0_90 = arith.constant 0 : index
    %277 = vector.load %arg2[%c29, %c0_90] : memref<48x96xf32, #tpu.memory_space<vmem>>, vector<1x32xf32>
    %278 = vector.broadcast %277 : vector<1x32xf32> to vector<16x32xf32>
    %279 = arith.addf %276, %278 : vector<16x32xf32>
    %280 = vector.extract_strided_slice %17 {offsets = [0, 0], sizes = [16, 32], strides = [1, 1]} : vector<16x96xf32> to vector<16x32xf32>
    %281 = vector.extract_strided_slice %12 {offsets = [0, 32], sizes = [16, 64], strides = [1, 1]} : vector<16x96xf32> to vector<16x64xf32>
    %c992 = arith.constant 992 : index
    %c0_91 = arith.constant 0 : index
    %282 = vector.load %arg1[%c992, %c0_91] : memref<1440x96xf32, #tpu.memory_space<vmem>>, vector<32x32xf32>
    %cst_92 = arith.constant dense<0.000000e+00> : vector<16x32xf32>
    %283 = tpu.matmul %280, %282, %cst_92 {dimension_numbers = #tpu.dot_dimension_numbers<[1], [0], [0], [1], [0, 0, 1, 1], [], []>} : vector<16x32xf32>, vector<32x32xf32>, vector<16x32xf32> -> vector<16x32xf32>
    %c33 = arith.constant 33 : index
    %c0_93 = arith.constant 0 : index
    %284 = vector.load %arg2[%c33, %c0_93] : memref<48x96xf32, #tpu.memory_space<vmem>>, vector<1x32xf32>
    %285 = vector.broadcast %284 : vector<1x32xf32> to vector<16x32xf32>
    %286 = arith.addf %283, %285 : vector<16x32xf32>
    %c1024 = arith.constant 1024 : index
    %c0_94 = arith.constant 0 : index
    %287 = vector.load %arg1[%c1024, %c0_94] : memref<1440x96xf32, #tpu.memory_space<vmem>>, vector<64x64xf32>
    %cst_95 = arith.constant dense<0.000000e+00> : vector<16x64xf32>
    %288 = tpu.matmul %281, %287, %cst_95 {dimension_numbers = #tpu.dot_dimension_numbers<[1], [0], [0], [1], [0, 0, 1, 1], [], []>} : vector<16x64xf32>, vector<64x64xf32>, vector<16x64xf32> -> vector<16x64xf32>
    %c34 = arith.constant 34 : index
    %c0_96 = arith.constant 0 : index
    %289 = vector.load %arg2[%c34, %c0_96] : memref<48x96xf32, #tpu.memory_space<vmem>>, vector<1x64xf32>
    %290 = vector.broadcast %289 : vector<1x64xf32> to vector<16x64xf32>
    %291 = arith.addf %288, %290 : vector<16x64xf32>
    %292 = vector.extract_strided_slice %291 {offsets = [0, 0], sizes = [16, 32], strides = [1, 1]} : vector<16x64xf32> to vector<16x32xf32>
    %293 = vector.extract_strided_slice %291 {offsets = [0, 32], sizes = [16, 32], strides = [1, 1]} : vector<16x64xf32> to vector<16x32xf32>
    %294 = vector.extract_strided_slice %286 {offsets = [0, 0], sizes = [16, 8], strides = [1, 1]} : vector<16x32xf32> to vector<16x8xf32>
    %295 = vector.shape_cast %294 : vector<16x8xf32> to vector<2x8x8xf32>
    %296 = vector.extract_strided_slice %292 {offsets = [0, 0], sizes = [16, 8], strides = [1, 1]} : vector<16x32xf32> to vector<16x8xf32>
    %297 = vector.shape_cast %296 : vector<16x8xf32> to vector<2x8x8xf32>
    %298 = vector.extract_strided_slice %293 {offsets = [0, 0], sizes = [16, 8], strides = [1, 1]} : vector<16x32xf32> to vector<16x8xf32>
    %299 = vector.shape_cast %298 : vector<16x8xf32> to vector<2x8x8xf32>
    %cst_97 = arith.constant dense<0.000000e+00> : vector<2x8x8xf32>
    %300 = tpu.matmul %295, %297, %cst_97 {dimension_numbers = #tpu.dot_dimension_numbers<[2], [2], [1], [1], [0, 0, 0, 1, 1, 1], [0], [0]>} : vector<2x8x8xf32>, vector<2x8x8xf32>, vector<2x8x8xf32> -> vector<2x8x8xf32>
    %cst_98 = arith.constant dense<0xFF800000> : vector<2x8xf32>
    %301 = vector.multi_reduction <maximumf>, %300, %cst_98 [2] : vector<2x8x8xf32> to vector<2x8xf32>
    %302 = vector.shape_cast %301 : vector<2x8xf32> to vector<2x8x1xf32>
    %303 = vector.broadcast %302 : vector<2x8x1xf32> to vector<2x8x8xf32>
    %304 = arith.subf %300, %303 : vector<2x8x8xf32>
    %305 = math.exp %304 : vector<2x8x8xf32>
    %cst_99 = arith.constant dense<0.000000e+00> : vector<2x8xf32>
    %306 = vector.multi_reduction <add>, %305, %cst_99 [2] : vector<2x8x8xf32> to vector<2x8xf32>
    %307 = vector.shape_cast %306 : vector<2x8xf32> to vector<2x8x1xf32>
    %308 = tpu.reciprocal %307 {approx = true} : vector<2x8x1xf32> -> vector<2x8x1xf32>
    %309 = vector.broadcast %308 : vector<2x8x1xf32> to vector<2x8x8xf32>
    %310 = arith.mulf %305, %309 : vector<2x8x8xf32>
    %cst_100 = arith.constant dense<0.000000e+00> : vector<2x8x8xf32>
    %311 = tpu.matmul %310, %299, %cst_100 {dimension_numbers = #tpu.dot_dimension_numbers<[2], [1], [1], [2], [0, 0, 0, 1, 1, 2], [0], [0]>} : vector<2x8x8xf32>, vector<2x8x8xf32>, vector<2x8x8xf32> -> vector<2x8x8xf32>
    %312 = vector.shape_cast %311 : vector<2x8x8xf32> to vector<16x8xf32>
    %313 = vector.extract_strided_slice %286 {offsets = [0, 8], sizes = [16, 8], strides = [1, 1]} : vector<16x32xf32> to vector<16x8xf32>
    %314 = vector.shape_cast %313 : vector<16x8xf32> to vector<2x8x8xf32>
    %315 = vector.extract_strided_slice %292 {offsets = [0, 8], sizes = [16, 8], strides = [1, 1]} : vector<16x32xf32> to vector<16x8xf32>
    %316 = vector.shape_cast %315 : vector<16x8xf32> to vector<2x8x8xf32>
    %317 = vector.extract_strided_slice %293 {offsets = [0, 8], sizes = [16, 8], strides = [1, 1]} : vector<16x32xf32> to vector<16x8xf32>
    %318 = vector.shape_cast %317 : vector<16x8xf32> to vector<2x8x8xf32>
    %cst_101 = arith.constant dense<0.000000e+00> : vector<2x8x8xf32>
    %319 = tpu.matmul %314, %316, %cst_101 {dimension_numbers = #tpu.dot_dimension_numbers<[2], [2], [1], [1], [0, 0, 0, 1, 1, 1], [0], [0]>} : vector<2x8x8xf32>, vector<2x8x8xf32>, vector<2x8x8xf32> -> vector<2x8x8xf32>
    %cst_102 = arith.constant dense<0xFF800000> : vector<2x8xf32>
    %320 = vector.multi_reduction <maximumf>, %319, %cst_102 [2] : vector<2x8x8xf32> to vector<2x8xf32>
    %321 = vector.shape_cast %320 : vector<2x8xf32> to vector<2x8x1xf32>
    %322 = vector.broadcast %321 : vector<2x8x1xf32> to vector<2x8x8xf32>
    %323 = arith.subf %319, %322 : vector<2x8x8xf32>
    %324 = math.exp %323 : vector<2x8x8xf32>
    %cst_103 = arith.constant dense<0.000000e+00> : vector<2x8xf32>
    %325 = vector.multi_reduction <add>, %324, %cst_103 [2] : vector<2x8x8xf32> to vector<2x8xf32>
    %326 = vector.shape_cast %325 : vector<2x8xf32> to vector<2x8x1xf32>
    %327 = tpu.reciprocal %326 {approx = true} : vector<2x8x1xf32> -> vector<2x8x1xf32>
    %328 = vector.broadcast %327 : vector<2x8x1xf32> to vector<2x8x8xf32>
    %329 = arith.mulf %324, %328 : vector<2x8x8xf32>
    %cst_104 = arith.constant dense<0.000000e+00> : vector<2x8x8xf32>
    %330 = tpu.matmul %329, %318, %cst_104 {dimension_numbers = #tpu.dot_dimension_numbers<[2], [1], [1], [2], [0, 0, 0, 1, 1, 2], [0], [0]>} : vector<2x8x8xf32>, vector<2x8x8xf32>, vector<2x8x8xf32> -> vector<2x8x8xf32>
    %331 = vector.shape_cast %330 : vector<2x8x8xf32> to vector<16x8xf32>
    %332 = vector.extract_strided_slice %286 {offsets = [0, 16], sizes = [16, 8], strides = [1, 1]} : vector<16x32xf32> to vector<16x8xf32>
    %333 = vector.shape_cast %332 : vector<16x8xf32> to vector<2x8x8xf32>
    %334 = vector.extract_strided_slice %292 {offsets = [0, 16], sizes = [16, 8], strides = [1, 1]} : vector<16x32xf32> to vector<16x8xf32>
    %335 = vector.shape_cast %334 : vector<16x8xf32> to vector<2x8x8xf32>
    %336 = vector.extract_strided_slice %293 {offsets = [0, 16], sizes = [16, 8], strides = [1, 1]} : vector<16x32xf32> to vector<16x8xf32>
    %337 = vector.shape_cast %336 : vector<16x8xf32> to vector<2x8x8xf32>
    %cst_105 = arith.constant dense<0.000000e+00> : vector<2x8x8xf32>
    %338 = tpu.matmul %333, %335, %cst_105 {dimension_numbers = #tpu.dot_dimension_numbers<[2], [2], [1], [1], [0, 0, 0, 1, 1, 1], [0], [0]>} : vector<2x8x8xf32>, vector<2x8x8xf32>, vector<2x8x8xf32> -> vector<2x8x8xf32>
    %cst_106 = arith.constant dense<0xFF800000> : vector<2x8xf32>
    %339 = vector.multi_reduction <maximumf>, %338, %cst_106 [2] : vector<2x8x8xf32> to vector<2x8xf32>
    %340 = vector.shape_cast %339 : vector<2x8xf32> to vector<2x8x1xf32>
    %341 = vector.broadcast %340 : vector<2x8x1xf32> to vector<2x8x8xf32>
    %342 = arith.subf %338, %341 : vector<2x8x8xf32>
    %343 = math.exp %342 : vector<2x8x8xf32>
    %cst_107 = arith.constant dense<0.000000e+00> : vector<2x8xf32>
    %344 = vector.multi_reduction <add>, %343, %cst_107 [2] : vector<2x8x8xf32> to vector<2x8xf32>
    %345 = vector.shape_cast %344 : vector<2x8xf32> to vector<2x8x1xf32>
    %346 = tpu.reciprocal %345 {approx = true} : vector<2x8x1xf32> -> vector<2x8x1xf32>
    %347 = vector.broadcast %346 : vector<2x8x1xf32> to vector<2x8x8xf32>
    %348 = arith.mulf %343, %347 : vector<2x8x8xf32>
    %cst_108 = arith.constant dense<0.000000e+00> : vector<2x8x8xf32>
    %349 = tpu.matmul %348, %337, %cst_108 {dimension_numbers = #tpu.dot_dimension_numbers<[2], [1], [1], [2], [0, 0, 0, 1, 1, 2], [0], [0]>} : vector<2x8x8xf32>, vector<2x8x8xf32>, vector<2x8x8xf32> -> vector<2x8x8xf32>
    %350 = vector.shape_cast %349 : vector<2x8x8xf32> to vector<16x8xf32>
    %351 = vector.extract_strided_slice %286 {offsets = [0, 24], sizes = [16, 8], strides = [1, 1]} : vector<16x32xf32> to vector<16x8xf32>
    %352 = vector.shape_cast %351 : vector<16x8xf32> to vector<2x8x8xf32>
    %353 = vector.extract_strided_slice %292 {offsets = [0, 24], sizes = [16, 8], strides = [1, 1]} : vector<16x32xf32> to vector<16x8xf32>
    %354 = vector.shape_cast %353 : vector<16x8xf32> to vector<2x8x8xf32>
    %355 = vector.extract_strided_slice %293 {offsets = [0, 24], sizes = [16, 8], strides = [1, 1]} : vector<16x32xf32> to vector<16x8xf32>
    %356 = vector.shape_cast %355 : vector<16x8xf32> to vector<2x8x8xf32>
    %cst_109 = arith.constant dense<0.000000e+00> : vector<2x8x8xf32>
    %357 = tpu.matmul %352, %354, %cst_109 {dimension_numbers = #tpu.dot_dimension_numbers<[2], [2], [1], [1], [0, 0, 0, 1, 1, 1], [0], [0]>} : vector<2x8x8xf32>, vector<2x8x8xf32>, vector<2x8x8xf32> -> vector<2x8x8xf32>
    %cst_110 = arith.constant dense<0xFF800000> : vector<2x8xf32>
    %358 = vector.multi_reduction <maximumf>, %357, %cst_110 [2] : vector<2x8x8xf32> to vector<2x8xf32>
    %359 = vector.shape_cast %358 : vector<2x8xf32> to vector<2x8x1xf32>
    %360 = vector.broadcast %359 : vector<2x8x1xf32> to vector<2x8x8xf32>
    %361 = arith.subf %357, %360 : vector<2x8x8xf32>
    %362 = math.exp %361 : vector<2x8x8xf32>
    %cst_111 = arith.constant dense<0.000000e+00> : vector<2x8xf32>
    %363 = vector.multi_reduction <add>, %362, %cst_111 [2] : vector<2x8x8xf32> to vector<2x8xf32>
    %364 = vector.shape_cast %363 : vector<2x8xf32> to vector<2x8x1xf32>
    %365 = tpu.reciprocal %364 {approx = true} : vector<2x8x1xf32> -> vector<2x8x1xf32>
    %366 = vector.broadcast %365 : vector<2x8x1xf32> to vector<2x8x8xf32>
    %367 = arith.mulf %362, %366 : vector<2x8x8xf32>
    %cst_112 = arith.constant dense<0.000000e+00> : vector<2x8x8xf32>
    %368 = tpu.matmul %367, %356, %cst_112 {dimension_numbers = #tpu.dot_dimension_numbers<[2], [1], [1], [2], [0, 0, 0, 1, 1, 2], [0], [0]>} : vector<2x8x8xf32>, vector<2x8x8xf32>, vector<2x8x8xf32> -> vector<2x8x8xf32>
    %369 = vector.shape_cast %368 : vector<2x8x8xf32> to vector<16x8xf32>
    %370 = tpu.concatenate %312, %331, %350, %369 in 1 : vector<16x8xf32>, vector<16x8xf32>, vector<16x8xf32>, vector<16x8xf32> -> vector<16x32xf32>
    %c1088 = arith.constant 1088 : index
    %c0_113 = arith.constant 0 : index
    %371 = vector.load %arg1[%c1088, %c0_113] : memref<1440x96xf32, #tpu.memory_space<vmem>>, vector<32x32xf32>
    %cst_114 = arith.constant dense<0.000000e+00> : vector<16x32xf32>
    %372 = tpu.matmul %370, %371, %cst_114 {dimension_numbers = #tpu.dot_dimension_numbers<[1], [0], [0], [1], [0, 0, 1, 1], [], []>} : vector<16x32xf32>, vector<32x32xf32>, vector<16x32xf32> -> vector<16x32xf32>
    %c35 = arith.constant 35 : index
    %c0_115 = arith.constant 0 : index
    %373 = vector.load %arg2[%c35, %c0_115] : memref<48x96xf32, #tpu.memory_space<vmem>>, vector<1x32xf32>
    %374 = vector.broadcast %373 : vector<1x32xf32> to vector<16x32xf32>
    %375 = arith.addf %372, %374 : vector<16x32xf32>
    %376 = vector.extract_strided_slice %17 {offsets = [0, 0], sizes = [16, 32], strides = [1, 1]} : vector<16x96xf32> to vector<16x32xf32>
    %377 = vector.extract_strided_slice %17 {offsets = [0, 32], sizes = [16, 64], strides = [1, 1]} : vector<16x96xf32> to vector<16x64xf32>
    %c1120 = arith.constant 1120 : index
    %c0_116 = arith.constant 0 : index
    %378 = vector.load %arg1[%c1120, %c0_116] : memref<1440x96xf32, #tpu.memory_space<vmem>>, vector<64x64xf32>
    %cst_117 = arith.constant dense<0.000000e+00> : vector<16x64xf32>
    %379 = tpu.matmul %377, %378, %cst_117 {dimension_numbers = #tpu.dot_dimension_numbers<[1], [0], [0], [1], [0, 0, 1, 1], [], []>} : vector<16x64xf32>, vector<64x64xf32>, vector<16x64xf32> -> vector<16x64xf32>
    %c1184 = arith.constant 1184 : index
    %c0_118 = arith.constant 0 : index
    %380 = vector.load %arg1[%c1184, %c0_118] : memref<1440x96xf32, #tpu.memory_space<vmem>>, vector<32x64xf32>
    %cst_119 = arith.constant dense<0.000000e+00> : vector<16x64xf32>
    %381 = tpu.matmul %375, %380, %cst_119 {dimension_numbers = #tpu.dot_dimension_numbers<[1], [0], [0], [1], [0, 0, 1, 1], [], []>} : vector<16x32xf32>, vector<32x64xf32>, vector<16x64xf32> -> vector<16x64xf32>
    %382 = arith.addf %379, %381 : vector<16x64xf32>
    %c36 = arith.constant 36 : index
    %c0_120 = arith.constant 0 : index
    %383 = vector.load %arg2[%c36, %c0_120] : memref<48x96xf32, #tpu.memory_space<vmem>>, vector<1x64xf32>
    %384 = vector.broadcast %383 : vector<1x64xf32> to vector<16x64xf32>
    %385 = arith.addf %382, %384 : vector<16x64xf32>
    %c1216 = arith.constant 1216 : index
    %c0_121 = arith.constant 0 : index
    %386 = vector.load %arg1[%c1216, %c0_121] : memref<1440x96xf32, #tpu.memory_space<vmem>>, vector<32x32xf32>
    %cst_122 = arith.constant dense<0.000000e+00> : vector<16x32xf32>
    %387 = tpu.matmul %376, %386, %cst_122 {dimension_numbers = #tpu.dot_dimension_numbers<[1], [0], [0], [1], [0, 0, 1, 1], [], []>} : vector<16x32xf32>, vector<32x32xf32>, vector<16x32xf32> -> vector<16x32xf32>
    %c37 = arith.constant 37 : index
    %c0_123 = arith.constant 0 : index
    %388 = vector.load %arg2[%c37, %c0_123] : memref<48x96xf32, #tpu.memory_space<vmem>>, vector<1x32xf32>
    %389 = vector.broadcast %388 : vector<1x32xf32> to vector<16x32xf32>
    %390 = arith.addf %387, %389 : vector<16x32xf32>
    %c1248 = arith.constant 1248 : index
    %c0_124 = arith.constant 0 : index
    %391 = vector.load %arg1[%c1248, %c0_124] : memref<1440x96xf32, #tpu.memory_space<vmem>>, vector<64x64xf32>
    %cst_125 = arith.constant dense<0.000000e+00> : vector<16x64xf32>
    %392 = tpu.matmul %385, %391, %cst_125 {dimension_numbers = #tpu.dot_dimension_numbers<[1], [0], [0], [1], [0, 0, 1, 1], [], []>} : vector<16x64xf32>, vector<64x64xf32>, vector<16x64xf32> -> vector<16x64xf32>
    %c38 = arith.constant 38 : index
    %c0_126 = arith.constant 0 : index
    %393 = vector.load %arg2[%c38, %c0_126] : memref<48x96xf32, #tpu.memory_space<vmem>>, vector<1x64xf32>
    %394 = vector.broadcast %393 : vector<1x64xf32> to vector<16x64xf32>
    %395 = arith.addf %392, %394 : vector<16x64xf32>
    %396 = vector.extract_strided_slice %395 {offsets = [0, 0], sizes = [16, 32], strides = [1, 1]} : vector<16x64xf32> to vector<16x32xf32>
    %397 = vector.extract_strided_slice %395 {offsets = [0, 32], sizes = [16, 32], strides = [1, 1]} : vector<16x64xf32> to vector<16x32xf32>
    %398 = vector.extract_strided_slice %390 {offsets = [0, 0], sizes = [16, 8], strides = [1, 1]} : vector<16x32xf32> to vector<16x8xf32>
    %399 = vector.shape_cast %398 : vector<16x8xf32> to vector<2x8x8xf32>
    %400 = vector.extract_strided_slice %396 {offsets = [0, 0], sizes = [16, 8], strides = [1, 1]} : vector<16x32xf32> to vector<16x8xf32>
    %401 = vector.shape_cast %400 : vector<16x8xf32> to vector<2x8x8xf32>
    %402 = vector.extract_strided_slice %397 {offsets = [0, 0], sizes = [16, 8], strides = [1, 1]} : vector<16x32xf32> to vector<16x8xf32>
    %403 = vector.shape_cast %402 : vector<16x8xf32> to vector<2x8x8xf32>
    %cst_127 = arith.constant dense<0.000000e+00> : vector<2x8x8xf32>
    %404 = tpu.matmul %399, %401, %cst_127 {dimension_numbers = #tpu.dot_dimension_numbers<[2], [2], [1], [1], [0, 0, 0, 1, 1, 1], [0], [0]>} : vector<2x8x8xf32>, vector<2x8x8xf32>, vector<2x8x8xf32> -> vector<2x8x8xf32>
    %cst_128 = arith.constant dense<0xFF800000> : vector<2x8xf32>
    %405 = vector.multi_reduction <maximumf>, %404, %cst_128 [2] : vector<2x8x8xf32> to vector<2x8xf32>
    %406 = vector.shape_cast %405 : vector<2x8xf32> to vector<2x8x1xf32>
    %407 = vector.broadcast %406 : vector<2x8x1xf32> to vector<2x8x8xf32>
    %408 = arith.subf %404, %407 : vector<2x8x8xf32>
    %409 = math.exp %408 : vector<2x8x8xf32>
    %cst_129 = arith.constant dense<0.000000e+00> : vector<2x8xf32>
    %410 = vector.multi_reduction <add>, %409, %cst_129 [2] : vector<2x8x8xf32> to vector<2x8xf32>
    %411 = vector.shape_cast %410 : vector<2x8xf32> to vector<2x8x1xf32>
    %412 = tpu.reciprocal %411 {approx = true} : vector<2x8x1xf32> -> vector<2x8x1xf32>
    %413 = vector.broadcast %412 : vector<2x8x1xf32> to vector<2x8x8xf32>
    %414 = arith.mulf %409, %413 : vector<2x8x8xf32>
    %cst_130 = arith.constant dense<0.000000e+00> : vector<2x8x8xf32>
    %415 = tpu.matmul %414, %403, %cst_130 {dimension_numbers = #tpu.dot_dimension_numbers<[2], [1], [1], [2], [0, 0, 0, 1, 1, 2], [0], [0]>} : vector<2x8x8xf32>, vector<2x8x8xf32>, vector<2x8x8xf32> -> vector<2x8x8xf32>
    %416 = vector.shape_cast %415 : vector<2x8x8xf32> to vector<16x8xf32>
    %417 = vector.extract_strided_slice %390 {offsets = [0, 8], sizes = [16, 8], strides = [1, 1]} : vector<16x32xf32> to vector<16x8xf32>
    %418 = vector.shape_cast %417 : vector<16x8xf32> to vector<2x8x8xf32>
    %419 = vector.extract_strided_slice %396 {offsets = [0, 8], sizes = [16, 8], strides = [1, 1]} : vector<16x32xf32> to vector<16x8xf32>
    %420 = vector.shape_cast %419 : vector<16x8xf32> to vector<2x8x8xf32>
    %421 = vector.extract_strided_slice %397 {offsets = [0, 8], sizes = [16, 8], strides = [1, 1]} : vector<16x32xf32> to vector<16x8xf32>
    %422 = vector.shape_cast %421 : vector<16x8xf32> to vector<2x8x8xf32>
    %cst_131 = arith.constant dense<0.000000e+00> : vector<2x8x8xf32>
    %423 = tpu.matmul %418, %420, %cst_131 {dimension_numbers = #tpu.dot_dimension_numbers<[2], [2], [1], [1], [0, 0, 0, 1, 1, 1], [0], [0]>} : vector<2x8x8xf32>, vector<2x8x8xf32>, vector<2x8x8xf32> -> vector<2x8x8xf32>
    %cst_132 = arith.constant dense<0xFF800000> : vector<2x8xf32>
    %424 = vector.multi_reduction <maximumf>, %423, %cst_132 [2] : vector<2x8x8xf32> to vector<2x8xf32>
    %425 = vector.shape_cast %424 : vector<2x8xf32> to vector<2x8x1xf32>
    %426 = vector.broadcast %425 : vector<2x8x1xf32> to vector<2x8x8xf32>
    %427 = arith.subf %423, %426 : vector<2x8x8xf32>
    %428 = math.exp %427 : vector<2x8x8xf32>
    %cst_133 = arith.constant dense<0.000000e+00> : vector<2x8xf32>
    %429 = vector.multi_reduction <add>, %428, %cst_133 [2] : vector<2x8x8xf32> to vector<2x8xf32>
    %430 = vector.shape_cast %429 : vector<2x8xf32> to vector<2x8x1xf32>
    %431 = tpu.reciprocal %430 {approx = true} : vector<2x8x1xf32> -> vector<2x8x1xf32>
    %432 = vector.broadcast %431 : vector<2x8x1xf32> to vector<2x8x8xf32>
    %433 = arith.mulf %428, %432 : vector<2x8x8xf32>
    %cst_134 = arith.constant dense<0.000000e+00> : vector<2x8x8xf32>
    %434 = tpu.matmul %433, %422, %cst_134 {dimension_numbers = #tpu.dot_dimension_numbers<[2], [1], [1], [2], [0, 0, 0, 1, 1, 2], [0], [0]>} : vector<2x8x8xf32>, vector<2x8x8xf32>, vector<2x8x8xf32> -> vector<2x8x8xf32>
    %435 = vector.shape_cast %434 : vector<2x8x8xf32> to vector<16x8xf32>
    %436 = vector.extract_strided_slice %390 {offsets = [0, 16], sizes = [16, 8], strides = [1, 1]} : vector<16x32xf32> to vector<16x8xf32>
    %437 = vector.shape_cast %436 : vector<16x8xf32> to vector<2x8x8xf32>
    %438 = vector.extract_strided_slice %396 {offsets = [0, 16], sizes = [16, 8], strides = [1, 1]} : vector<16x32xf32> to vector<16x8xf32>
    %439 = vector.shape_cast %438 : vector<16x8xf32> to vector<2x8x8xf32>
    %440 = vector.extract_strided_slice %397 {offsets = [0, 16], sizes = [16, 8], strides = [1, 1]} : vector<16x32xf32> to vector<16x8xf32>
    %441 = vector.shape_cast %440 : vector<16x8xf32> to vector<2x8x8xf32>
    %cst_135 = arith.constant dense<0.000000e+00> : vector<2x8x8xf32>
    %442 = tpu.matmul %437, %439, %cst_135 {dimension_numbers = #tpu.dot_dimension_numbers<[2], [2], [1], [1], [0, 0, 0, 1, 1, 1], [0], [0]>} : vector<2x8x8xf32>, vector<2x8x8xf32>, vector<2x8x8xf32> -> vector<2x8x8xf32>
    %cst_136 = arith.constant dense<0xFF800000> : vector<2x8xf32>
    %443 = vector.multi_reduction <maximumf>, %442, %cst_136 [2] : vector<2x8x8xf32> to vector<2x8xf32>
    %444 = vector.shape_cast %443 : vector<2x8xf32> to vector<2x8x1xf32>
    %445 = vector.broadcast %444 : vector<2x8x1xf32> to vector<2x8x8xf32>
    %446 = arith.subf %442, %445 : vector<2x8x8xf32>
    %447 = math.exp %446 : vector<2x8x8xf32>
    %cst_137 = arith.constant dense<0.000000e+00> : vector<2x8xf32>
    %448 = vector.multi_reduction <add>, %447, %cst_137 [2] : vector<2x8x8xf32> to vector<2x8xf32>
    %449 = vector.shape_cast %448 : vector<2x8xf32> to vector<2x8x1xf32>
    %450 = tpu.reciprocal %449 {approx = true} : vector<2x8x1xf32> -> vector<2x8x1xf32>
    %451 = vector.broadcast %450 : vector<2x8x1xf32> to vector<2x8x8xf32>
    %452 = arith.mulf %447, %451 : vector<2x8x8xf32>
    %cst_138 = arith.constant dense<0.000000e+00> : vector<2x8x8xf32>
    %453 = tpu.matmul %452, %441, %cst_138 {dimension_numbers = #tpu.dot_dimension_numbers<[2], [1], [1], [2], [0, 0, 0, 1, 1, 2], [0], [0]>} : vector<2x8x8xf32>, vector<2x8x8xf32>, vector<2x8x8xf32> -> vector<2x8x8xf32>
    %454 = vector.shape_cast %453 : vector<2x8x8xf32> to vector<16x8xf32>
    %455 = vector.extract_strided_slice %390 {offsets = [0, 24], sizes = [16, 8], strides = [1, 1]} : vector<16x32xf32> to vector<16x8xf32>
    %456 = vector.shape_cast %455 : vector<16x8xf32> to vector<2x8x8xf32>
    %457 = vector.extract_strided_slice %396 {offsets = [0, 24], sizes = [16, 8], strides = [1, 1]} : vector<16x32xf32> to vector<16x8xf32>
    %458 = vector.shape_cast %457 : vector<16x8xf32> to vector<2x8x8xf32>
    %459 = vector.extract_strided_slice %397 {offsets = [0, 24], sizes = [16, 8], strides = [1, 1]} : vector<16x32xf32> to vector<16x8xf32>
    %460 = vector.shape_cast %459 : vector<16x8xf32> to vector<2x8x8xf32>
    %cst_139 = arith.constant dense<0.000000e+00> : vector<2x8x8xf32>
    %461 = tpu.matmul %456, %458, %cst_139 {dimension_numbers = #tpu.dot_dimension_numbers<[2], [2], [1], [1], [0, 0, 0, 1, 1, 1], [0], [0]>} : vector<2x8x8xf32>, vector<2x8x8xf32>, vector<2x8x8xf32> -> vector<2x8x8xf32>
    %cst_140 = arith.constant dense<0xFF800000> : vector<2x8xf32>
    %462 = vector.multi_reduction <maximumf>, %461, %cst_140 [2] : vector<2x8x8xf32> to vector<2x8xf32>
    %463 = vector.shape_cast %462 : vector<2x8xf32> to vector<2x8x1xf32>
    %464 = vector.broadcast %463 : vector<2x8x1xf32> to vector<2x8x8xf32>
    %465 = arith.subf %461, %464 : vector<2x8x8xf32>
    %466 = math.exp %465 : vector<2x8x8xf32>
    %cst_141 = arith.constant dense<0.000000e+00> : vector<2x8xf32>
    %467 = vector.multi_reduction <add>, %466, %cst_141 [2] : vector<2x8x8xf32> to vector<2x8xf32>
    %468 = vector.shape_cast %467 : vector<2x8xf32> to vector<2x8x1xf32>
    %469 = tpu.reciprocal %468 {approx = true} : vector<2x8x1xf32> -> vector<2x8x1xf32>
    %470 = vector.broadcast %469 : vector<2x8x1xf32> to vector<2x8x8xf32>
    %471 = arith.mulf %466, %470 : vector<2x8x8xf32>
    %cst_142 = arith.constant dense<0.000000e+00> : vector<2x8x8xf32>
    %472 = tpu.matmul %471, %460, %cst_142 {dimension_numbers = #tpu.dot_dimension_numbers<[2], [1], [1], [2], [0, 0, 0, 1, 1, 2], [0], [0]>} : vector<2x8x8xf32>, vector<2x8x8xf32>, vector<2x8x8xf32> -> vector<2x8x8xf32>
    %473 = vector.shape_cast %472 : vector<2x8x8xf32> to vector<16x8xf32>
    %474 = tpu.concatenate %416, %435, %454, %473 in 1 : vector<16x8xf32>, vector<16x8xf32>, vector<16x8xf32>, vector<16x8xf32> -> vector<16x32xf32>
    %c1312 = arith.constant 1312 : index
    %c0_143 = arith.constant 0 : index
    %475 = vector.load %arg1[%c1312, %c0_143] : memref<1440x96xf32, #tpu.memory_space<vmem>>, vector<32x32xf32>
    %cst_144 = arith.constant dense<0.000000e+00> : vector<16x32xf32>
    %476 = tpu.matmul %474, %475, %cst_144 {dimension_numbers = #tpu.dot_dimension_numbers<[1], [0], [0], [1], [0, 0, 1, 1], [], []>} : vector<16x32xf32>, vector<32x32xf32>, vector<16x32xf32> -> vector<16x32xf32>
    %c39 = arith.constant 39 : index
    %c0_145 = arith.constant 0 : index
    %477 = vector.load %arg2[%c39, %c0_145] : memref<48x96xf32, #tpu.memory_space<vmem>>, vector<1x32xf32>
    %478 = vector.broadcast %477 : vector<1x32xf32> to vector<16x32xf32>
    %479 = arith.addf %476, %478 : vector<16x32xf32>
    %480 = arith.addf %479, %376 : vector<16x32xf32>
    %481 = vector.extract_strided_slice %385 {offsets = [0, 0], sizes = [16, 32], strides = [1, 1]} : vector<16x64xf32> to vector<16x32xf32>
    %482 = arith.addf %480, %481 : vector<16x32xf32>
    %483 = vector.extract_strided_slice %385 {offsets = [0, 32], sizes = [16, 32], strides = [1, 1]} : vector<16x64xf32> to vector<16x32xf32>
    %484 = arith.addf %482, %483 : vector<16x32xf32>
    %cst_146 = arith.constant dense<0.000000e+00> : vector<16xf32>
    %485 = vector.multi_reduction <add>, %484, %cst_146 [1] : vector<16x32xf32> to vector<16xf32>
    %486 = vector.shape_cast %485 : vector<16xf32> to vector<16x1xf32>
    %cst_147 = arith.constant 3.200000e+01 : f32
    %487 = vector.broadcast %cst_147 : f32 to vector<16x1xf32>
    %488 = arith.divf %486, %487 : vector<16x1xf32>
    %489 = vector.broadcast %488 : vector<16x1xf32> to vector<16x32xf32>
    %490 = arith.subf %484, %489 : vector<16x32xf32>
    %491 = arith.mulf %490, %490 : vector<16x32xf32>
    %cst_148 = arith.constant dense<0.000000e+00> : vector<16xf32>
    %492 = vector.multi_reduction <add>, %491, %cst_148 [1] : vector<16x32xf32> to vector<16xf32>
    %493 = vector.shape_cast %492 : vector<16xf32> to vector<16x1xf32>
    %cst_149 = arith.constant 3.200000e+01 : f32
    %494 = vector.broadcast %cst_149 : f32 to vector<16x1xf32>
    %495 = arith.divf %493, %494 : vector<16x1xf32>
    %cst_150 = arith.constant 9.99999996E-13 : f32
    %496 = vector.broadcast %cst_150 : f32 to vector<16x1xf32>
    %497 = arith.addf %495, %496 : vector<16x1xf32>
    %498 = math.rsqrt %497 : vector<16x1xf32>
    %499 = vector.broadcast %498 : vector<16x1xf32> to vector<16x32xf32>
    %500 = arith.mulf %490, %499 : vector<16x32xf32>
    %c42 = arith.constant 42 : index
    %c0_151 = arith.constant 0 : index
    %501 = vector.load %arg2[%c42, %c0_151] : memref<48x96xf32, #tpu.memory_space<vmem>>, vector<1x32xf32>
    %502 = vector.broadcast %501 : vector<1x32xf32> to vector<16x32xf32>
    %503 = arith.mulf %500, %502 : vector<16x32xf32>
    %c43 = arith.constant 43 : index
    %c0_152 = arith.constant 0 : index
    %504 = vector.load %arg2[%c43, %c0_152] : memref<48x96xf32, #tpu.memory_space<vmem>>, vector<1x32xf32>
    %505 = vector.broadcast %504 : vector<1x32xf32> to vector<16x32xf32>
    %506 = arith.addf %503, %505 : vector<16x32xf32>
    %c1344 = arith.constant 1344 : index
    %c0_153 = arith.constant 0 : index
    %507 = vector.load %arg1[%c1344, %c0_153] : memref<1440x96xf32, #tpu.memory_space<vmem>>, vector<32x64xf32>
    %cst_154 = arith.constant dense<0.000000e+00> : vector<16x64xf32>
    %508 = tpu.matmul %506, %507, %cst_154 {dimension_numbers = #tpu.dot_dimension_numbers<[1], [0], [0], [1], [0, 0, 1, 1], [], []>} : vector<16x32xf32>, vector<32x64xf32>, vector<16x64xf32> -> vector<16x64xf32>
    %c40 = arith.constant 40 : index
    %c0_155 = arith.constant 0 : index
    %509 = vector.load %arg2[%c40, %c0_155] : memref<48x96xf32, #tpu.memory_space<vmem>>, vector<1x64xf32>
    %510 = vector.broadcast %509 : vector<1x64xf32> to vector<16x64xf32>
    %511 = arith.addf %508, %510 : vector<16x64xf32>
    %cst_156 = arith.constant 0.000000e+00 : f32
    %512 = vector.broadcast %cst_156 : f32 to vector<16x64xf32>
    %513 = arith.maximumf %511, %512 : vector<16x64xf32>
    %c1376 = arith.constant 1376 : index
    %c0_157 = arith.constant 0 : index
    %514 = vector.load %arg1[%c1376, %c0_157] : memref<1440x96xf32, #tpu.memory_space<vmem>>, vector<64x32xf32>
    %cst_158 = arith.constant dense<0.000000e+00> : vector<16x32xf32>
    %515 = tpu.matmul %513, %514, %cst_158 {dimension_numbers = #tpu.dot_dimension_numbers<[1], [0], [0], [1], [0, 0, 1, 1], [], []>} : vector<16x64xf32>, vector<64x32xf32>, vector<16x32xf32> -> vector<16x32xf32>
    %c41 = arith.constant 41 : index
    %c0_159 = arith.constant 0 : index
    %516 = vector.load %arg2[%c41, %c0_159] : memref<48x96xf32, #tpu.memory_space<vmem>>, vector<1x32xf32>
    %517 = vector.broadcast %516 : vector<1x32xf32> to vector<16x32xf32>
    %518 = arith.addf %515, %517 : vector<16x32xf32>
    %519 = arith.addf %518, %506 : vector<16x32xf32>
    %cst_160 = arith.constant dense<0.000000e+00> : vector<16xf32>
    %520 = vector.multi_reduction <add>, %519, %cst_160 [1] : vector<16x32xf32> to vector<16xf32>
    %521 = vector.shape_cast %520 : vector<16xf32> to vector<16x1xf32>
    %cst_161 = arith.constant 3.200000e+01 : f32
    %522 = vector.broadcast %cst_161 : f32 to vector<16x1xf32>
    %523 = arith.divf %521, %522 : vector<16x1xf32>
    %524 = vector.broadcast %523 : vector<16x1xf32> to vector<16x32xf32>
    %525 = arith.subf %519, %524 : vector<16x32xf32>
    %526 = arith.mulf %525, %525 : vector<16x32xf32>
    %cst_162 = arith.constant dense<0.000000e+00> : vector<16xf32>
    %527 = vector.multi_reduction <add>, %526, %cst_162 [1] : vector<16x32xf32> to vector<16xf32>
    %528 = vector.shape_cast %527 : vector<16xf32> to vector<16x1xf32>
    %cst_163 = arith.constant 3.200000e+01 : f32
    %529 = vector.broadcast %cst_163 : f32 to vector<16x1xf32>
    %530 = arith.divf %528, %529 : vector<16x1xf32>
    %cst_164 = arith.constant 9.99999996E-13 : f32
    %531 = vector.broadcast %cst_164 : f32 to vector<16x1xf32>
    %532 = arith.addf %530, %531 : vector<16x1xf32>
    %533 = math.rsqrt %532 : vector<16x1xf32>
    %534 = vector.broadcast %533 : vector<16x1xf32> to vector<16x32xf32>
    %535 = arith.mulf %525, %534 : vector<16x32xf32>
    %c44 = arith.constant 44 : index
    %c0_165 = arith.constant 0 : index
    %536 = vector.load %arg2[%c44, %c0_165] : memref<48x96xf32, #tpu.memory_space<vmem>>, vector<1x32xf32>
    %537 = vector.broadcast %536 : vector<1x32xf32> to vector<16x32xf32>
    %538 = arith.mulf %535, %537 : vector<16x32xf32>
    %c45 = arith.constant 45 : index
    %c0_166 = arith.constant 0 : index
    %539 = vector.load %arg2[%c45, %c0_166] : memref<48x96xf32, #tpu.memory_space<vmem>>, vector<1x32xf32>
    %540 = vector.broadcast %539 : vector<1x32xf32> to vector<16x32xf32>
    %541 = arith.addf %538, %540 : vector<16x32xf32>
    %542 = vector.extract_strided_slice %7 {offsets = [0, 0], sizes = [16, 32], strides = [1, 1]} : vector<16x96xf32> to vector<16x32xf32>
    %543 = vector.extract_strided_slice %17 {offsets = [0, 32], sizes = [16, 64], strides = [1, 1]} : vector<16x96xf32> to vector<16x64xf32>
    %c32_167 = arith.constant 32 : index
    %c0_168 = arith.constant 0 : index
    %544 = vector.load %arg1[%c32_167, %c0_168] : memref<1440x96xf32, #tpu.memory_space<vmem>>, vector<32x32xf32>
    %cst_169 = arith.constant dense<0.000000e+00> : vector<16x32xf32>
    %545 = tpu.matmul %542, %544, %cst_169 {dimension_numbers = #tpu.dot_dimension_numbers<[1], [0], [0], [1], [0, 0, 1, 1], [], []>} : vector<16x32xf32>, vector<32x32xf32>, vector<16x32xf32> -> vector<16x32xf32>
    %c1 = arith.constant 1 : index
    %c0_170 = arith.constant 0 : index
    %546 = vector.load %arg2[%c1, %c0_170] : memref<48x96xf32, #tpu.memory_space<vmem>>, vector<1x32xf32>
    %547 = vector.broadcast %546 : vector<1x32xf32> to vector<16x32xf32>
    %548 = arith.addf %545, %547 : vector<16x32xf32>
    %c64 = arith.constant 64 : index
    %c0_171 = arith.constant 0 : index
    %549 = vector.load %arg1[%c64, %c0_171] : memref<1440x96xf32, #tpu.memory_space<vmem>>, vector<64x64xf32>
    %cst_172 = arith.constant dense<0.000000e+00> : vector<16x64xf32>
    %550 = tpu.matmul %543, %549, %cst_172 {dimension_numbers = #tpu.dot_dimension_numbers<[1], [0], [0], [1], [0, 0, 1, 1], [], []>} : vector<16x64xf32>, vector<64x64xf32>, vector<16x64xf32> -> vector<16x64xf32>
    %c2 = arith.constant 2 : index
    %c0_173 = arith.constant 0 : index
    %551 = vector.load %arg2[%c2, %c0_173] : memref<48x96xf32, #tpu.memory_space<vmem>>, vector<1x64xf32>
    %552 = vector.broadcast %551 : vector<1x64xf32> to vector<16x64xf32>
    %553 = arith.addf %550, %552 : vector<16x64xf32>
    %554 = vector.extract_strided_slice %553 {offsets = [0, 0], sizes = [16, 32], strides = [1, 1]} : vector<16x64xf32> to vector<16x32xf32>
    %555 = vector.extract_strided_slice %553 {offsets = [0, 32], sizes = [16, 32], strides = [1, 1]} : vector<16x64xf32> to vector<16x32xf32>
    %556 = vector.extract_strided_slice %548 {offsets = [0, 0], sizes = [16, 8], strides = [1, 1]} : vector<16x32xf32> to vector<16x8xf32>
    %557 = vector.shape_cast %556 : vector<16x8xf32> to vector<2x8x8xf32>
    %558 = vector.extract_strided_slice %554 {offsets = [0, 0], sizes = [16, 8], strides = [1, 1]} : vector<16x32xf32> to vector<16x8xf32>
    %559 = vector.shape_cast %558 : vector<16x8xf32> to vector<2x8x8xf32>
    %560 = vector.extract_strided_slice %555 {offsets = [0, 0], sizes = [16, 8], strides = [1, 1]} : vector<16x32xf32> to vector<16x8xf32>
    %561 = vector.shape_cast %560 : vector<16x8xf32> to vector<2x8x8xf32>
    %cst_174 = arith.constant dense<0.000000e+00> : vector<2x8x8xf32>
    %562 = tpu.matmul %557, %559, %cst_174 {dimension_numbers = #tpu.dot_dimension_numbers<[2], [2], [1], [1], [0, 0, 0, 1, 1, 1], [0], [0]>} : vector<2x8x8xf32>, vector<2x8x8xf32>, vector<2x8x8xf32> -> vector<2x8x8xf32>
    %cst_175 = arith.constant dense<0xFF800000> : vector<2x8xf32>
    %563 = vector.multi_reduction <maximumf>, %562, %cst_175 [2] : vector<2x8x8xf32> to vector<2x8xf32>
    %564 = vector.shape_cast %563 : vector<2x8xf32> to vector<2x8x1xf32>
    %565 = vector.broadcast %564 : vector<2x8x1xf32> to vector<2x8x8xf32>
    %566 = arith.subf %562, %565 : vector<2x8x8xf32>
    %567 = math.exp %566 : vector<2x8x8xf32>
    %cst_176 = arith.constant dense<0.000000e+00> : vector<2x8xf32>
    %568 = vector.multi_reduction <add>, %567, %cst_176 [2] : vector<2x8x8xf32> to vector<2x8xf32>
    %569 = vector.shape_cast %568 : vector<2x8xf32> to vector<2x8x1xf32>
    %570 = tpu.reciprocal %569 {approx = true} : vector<2x8x1xf32> -> vector<2x8x1xf32>
    %571 = vector.broadcast %570 : vector<2x8x1xf32> to vector<2x8x8xf32>
    %572 = arith.mulf %567, %571 : vector<2x8x8xf32>
    %cst_177 = arith.constant dense<0.000000e+00> : vector<2x8x8xf32>
    %573 = tpu.matmul %572, %561, %cst_177 {dimension_numbers = #tpu.dot_dimension_numbers<[2], [1], [1], [2], [0, 0, 0, 1, 1, 2], [0], [0]>} : vector<2x8x8xf32>, vector<2x8x8xf32>, vector<2x8x8xf32> -> vector<2x8x8xf32>
    %574 = vector.shape_cast %573 : vector<2x8x8xf32> to vector<16x8xf32>
    %575 = vector.extract_strided_slice %548 {offsets = [0, 8], sizes = [16, 8], strides = [1, 1]} : vector<16x32xf32> to vector<16x8xf32>
    %576 = vector.shape_cast %575 : vector<16x8xf32> to vector<2x8x8xf32>
    %577 = vector.extract_strided_slice %554 {offsets = [0, 8], sizes = [16, 8], strides = [1, 1]} : vector<16x32xf32> to vector<16x8xf32>
    %578 = vector.shape_cast %577 : vector<16x8xf32> to vector<2x8x8xf32>
    %579 = vector.extract_strided_slice %555 {offsets = [0, 8], sizes = [16, 8], strides = [1, 1]} : vector<16x32xf32> to vector<16x8xf32>
    %580 = vector.shape_cast %579 : vector<16x8xf32> to vector<2x8x8xf32>
    %cst_178 = arith.constant dense<0.000000e+00> : vector<2x8x8xf32>
    %581 = tpu.matmul %576, %578, %cst_178 {dimension_numbers = #tpu.dot_dimension_numbers<[2], [2], [1], [1], [0, 0, 0, 1, 1, 1], [0], [0]>} : vector<2x8x8xf32>, vector<2x8x8xf32>, vector<2x8x8xf32> -> vector<2x8x8xf32>
    %cst_179 = arith.constant dense<0xFF800000> : vector<2x8xf32>
    %582 = vector.multi_reduction <maximumf>, %581, %cst_179 [2] : vector<2x8x8xf32> to vector<2x8xf32>
    %583 = vector.shape_cast %582 : vector<2x8xf32> to vector<2x8x1xf32>
    %584 = vector.broadcast %583 : vector<2x8x1xf32> to vector<2x8x8xf32>
    %585 = arith.subf %581, %584 : vector<2x8x8xf32>
    %586 = math.exp %585 : vector<2x8x8xf32>
    %cst_180 = arith.constant dense<0.000000e+00> : vector<2x8xf32>
    %587 = vector.multi_reduction <add>, %586, %cst_180 [2] : vector<2x8x8xf32> to vector<2x8xf32>
    %588 = vector.shape_cast %587 : vector<2x8xf32> to vector<2x8x1xf32>
    %589 = tpu.reciprocal %588 {approx = true} : vector<2x8x1xf32> -> vector<2x8x1xf32>
    %590 = vector.broadcast %589 : vector<2x8x1xf32> to vector<2x8x8xf32>
    %591 = arith.mulf %586, %590 : vector<2x8x8xf32>
    %cst_181 = arith.constant dense<0.000000e+00> : vector<2x8x8xf32>
    %592 = tpu.matmul %591, %580, %cst_181 {dimension_numbers = #tpu.dot_dimension_numbers<[2], [1], [1], [2], [0, 0, 0, 1, 1, 2], [0], [0]>} : vector<2x8x8xf32>, vector<2x8x8xf32>, vector<2x8x8xf32> -> vector<2x8x8xf32>
    %593 = vector.shape_cast %592 : vector<2x8x8xf32> to vector<16x8xf32>
    %594 = vector.extract_strided_slice %548 {offsets = [0, 16], sizes = [16, 8], strides = [1, 1]} : vector<16x32xf32> to vector<16x8xf32>
    %595 = vector.shape_cast %594 : vector<16x8xf32> to vector<2x8x8xf32>
    %596 = vector.extract_strided_slice %554 {offsets = [0, 16], sizes = [16, 8], strides = [1, 1]} : vector<16x32xf32> to vector<16x8xf32>
    %597 = vector.shape_cast %596 : vector<16x8xf32> to vector<2x8x8xf32>
    %598 = vector.extract_strided_slice %555 {offsets = [0, 16], sizes = [16, 8], strides = [1, 1]} : vector<16x32xf32> to vector<16x8xf32>
    %599 = vector.shape_cast %598 : vector<16x8xf32> to vector<2x8x8xf32>
    %cst_182 = arith.constant dense<0.000000e+00> : vector<2x8x8xf32>
    %600 = tpu.matmul %595, %597, %cst_182 {dimension_numbers = #tpu.dot_dimension_numbers<[2], [2], [1], [1], [0, 0, 0, 1, 1, 1], [0], [0]>} : vector<2x8x8xf32>, vector<2x8x8xf32>, vector<2x8x8xf32> -> vector<2x8x8xf32>
    %cst_183 = arith.constant dense<0xFF800000> : vector<2x8xf32>
    %601 = vector.multi_reduction <maximumf>, %600, %cst_183 [2] : vector<2x8x8xf32> to vector<2x8xf32>
    %602 = vector.shape_cast %601 : vector<2x8xf32> to vector<2x8x1xf32>
    %603 = vector.broadcast %602 : vector<2x8x1xf32> to vector<2x8x8xf32>
    %604 = arith.subf %600, %603 : vector<2x8x8xf32>
    %605 = math.exp %604 : vector<2x8x8xf32>
    %cst_184 = arith.constant dense<0.000000e+00> : vector<2x8xf32>
    %606 = vector.multi_reduction <add>, %605, %cst_184 [2] : vector<2x8x8xf32> to vector<2x8xf32>
    %607 = vector.shape_cast %606 : vector<2x8xf32> to vector<2x8x1xf32>
    %608 = tpu.reciprocal %607 {approx = true} : vector<2x8x1xf32> -> vector<2x8x1xf32>
    %609 = vector.broadcast %608 : vector<2x8x1xf32> to vector<2x8x8xf32>
    %610 = arith.mulf %605, %609 : vector<2x8x8xf32>
    %cst_185 = arith.constant dense<0.000000e+00> : vector<2x8x8xf32>
    %611 = tpu.matmul %610, %599, %cst_185 {dimension_numbers = #tpu.dot_dimension_numbers<[2], [1], [1], [2], [0, 0, 0, 1, 1, 2], [0], [0]>} : vector<2x8x8xf32>, vector<2x8x8xf32>, vector<2x8x8xf32> -> vector<2x8x8xf32>
    %612 = vector.shape_cast %611 : vector<2x8x8xf32> to vector<16x8xf32>
    %613 = vector.extract_strided_slice %548 {offsets = [0, 24], sizes = [16, 8], strides = [1, 1]} : vector<16x32xf32> to vector<16x8xf32>
    %614 = vector.shape_cast %613 : vector<16x8xf32> to vector<2x8x8xf32>
    %615 = vector.extract_strided_slice %554 {offsets = [0, 24], sizes = [16, 8], strides = [1, 1]} : vector<16x32xf32> to vector<16x8xf32>
    %616 = vector.shape_cast %615 : vector<16x8xf32> to vector<2x8x8xf32>
    %617 = vector.extract_strided_slice %555 {offsets = [0, 24], sizes = [16, 8], strides = [1, 1]} : vector<16x32xf32> to vector<16x8xf32>
    %618 = vector.shape_cast %617 : vector<16x8xf32> to vector<2x8x8xf32>
    %cst_186 = arith.constant dense<0.000000e+00> : vector<2x8x8xf32>
    %619 = tpu.matmul %614, %616, %cst_186 {dimension_numbers = #tpu.dot_dimension_numbers<[2], [2], [1], [1], [0, 0, 0, 1, 1, 1], [0], [0]>} : vector<2x8x8xf32>, vector<2x8x8xf32>, vector<2x8x8xf32> -> vector<2x8x8xf32>
    %cst_187 = arith.constant dense<0xFF800000> : vector<2x8xf32>
    %620 = vector.multi_reduction <maximumf>, %619, %cst_187 [2] : vector<2x8x8xf32> to vector<2x8xf32>
    %621 = vector.shape_cast %620 : vector<2x8xf32> to vector<2x8x1xf32>
    %622 = vector.broadcast %621 : vector<2x8x1xf32> to vector<2x8x8xf32>
    %623 = arith.subf %619, %622 : vector<2x8x8xf32>
    %624 = math.exp %623 : vector<2x8x8xf32>
    %cst_188 = arith.constant dense<0.000000e+00> : vector<2x8xf32>
    %625 = vector.multi_reduction <add>, %624, %cst_188 [2] : vector<2x8x8xf32> to vector<2x8xf32>
    %626 = vector.shape_cast %625 : vector<2x8xf32> to vector<2x8x1xf32>
    %627 = tpu.reciprocal %626 {approx = true} : vector<2x8x1xf32> -> vector<2x8x1xf32>
    %628 = vector.broadcast %627 : vector<2x8x1xf32> to vector<2x8x8xf32>
    %629 = arith.mulf %624, %628 : vector<2x8x8xf32>
    %cst_189 = arith.constant dense<0.000000e+00> : vector<2x8x8xf32>
    %630 = tpu.matmul %629, %618, %cst_189 {dimension_numbers = #tpu.dot_dimension_numbers<[2], [1], [1], [2], [0, 0, 0, 1, 1, 2], [0], [0]>} : vector<2x8x8xf32>, vector<2x8x8xf32>, vector<2x8x8xf32> -> vector<2x8x8xf32>
    %631 = vector.shape_cast %630 : vector<2x8x8xf32> to vector<16x8xf32>
    %632 = tpu.concatenate %574, %593, %612, %631 in 1 : vector<16x8xf32>, vector<16x8xf32>, vector<16x8xf32>, vector<16x8xf32> -> vector<16x32xf32>
    %c128 = arith.constant 128 : index
    %c0_190 = arith.constant 0 : index
    %633 = vector.load %arg1[%c128, %c0_190] : memref<1440x96xf32, #tpu.memory_space<vmem>>, vector<32x32xf32>
    %cst_191 = arith.constant dense<0.000000e+00> : vector<16x32xf32>
    %634 = tpu.matmul %632, %633, %cst_191 {dimension_numbers = #tpu.dot_dimension_numbers<[1], [0], [0], [1], [0, 0, 1, 1], [], []>} : vector<16x32xf32>, vector<32x32xf32>, vector<16x32xf32> -> vector<16x32xf32>
    %c3 = arith.constant 3 : index
    %c0_192 = arith.constant 0 : index
    %635 = vector.load %arg2[%c3, %c0_192] : memref<48x96xf32, #tpu.memory_space<vmem>>, vector<1x32xf32>
    %636 = vector.broadcast %635 : vector<1x32xf32> to vector<16x32xf32>
    %637 = arith.addf %634, %636 : vector<16x32xf32>
    %638 = vector.extract_strided_slice %7 {offsets = [0, 0], sizes = [16, 32], strides = [1, 1]} : vector<16x96xf32> to vector<16x32xf32>
    %639 = vector.extract_strided_slice %7 {offsets = [0, 32], sizes = [16, 64], strides = [1, 1]} : vector<16x96xf32> to vector<16x64xf32>
    %c160 = arith.constant 160 : index
    %c0_193 = arith.constant 0 : index
    %640 = vector.load %arg1[%c160, %c0_193] : memref<1440x96xf32, #tpu.memory_space<vmem>>, vector<64x64xf32>
    %cst_194 = arith.constant dense<0.000000e+00> : vector<16x64xf32>
    %641 = tpu.matmul %639, %640, %cst_194 {dimension_numbers = #tpu.dot_dimension_numbers<[1], [0], [0], [1], [0, 0, 1, 1], [], []>} : vector<16x64xf32>, vector<64x64xf32>, vector<16x64xf32> -> vector<16x64xf32>
    %c224 = arith.constant 224 : index
    %c0_195 = arith.constant 0 : index
    %642 = vector.load %arg1[%c224, %c0_195] : memref<1440x96xf32, #tpu.memory_space<vmem>>, vector<32x64xf32>
    %cst_196 = arith.constant dense<0.000000e+00> : vector<16x64xf32>
    %643 = tpu.matmul %637, %642, %cst_196 {dimension_numbers = #tpu.dot_dimension_numbers<[1], [0], [0], [1], [0, 0, 1, 1], [], []>} : vector<16x32xf32>, vector<32x64xf32>, vector<16x64xf32> -> vector<16x64xf32>
    %644 = arith.addf %641, %643 : vector<16x64xf32>
    %c4 = arith.constant 4 : index
    %c0_197 = arith.constant 0 : index
    %645 = vector.load %arg2[%c4, %c0_197] : memref<48x96xf32, #tpu.memory_space<vmem>>, vector<1x64xf32>
    %646 = vector.broadcast %645 : vector<1x64xf32> to vector<16x64xf32>
    %647 = arith.addf %644, %646 : vector<16x64xf32>
    %c256 = arith.constant 256 : index
    %c0_198 = arith.constant 0 : index
    %648 = vector.load %arg1[%c256, %c0_198] : memref<1440x96xf32, #tpu.memory_space<vmem>>, vector<32x32xf32>
    %cst_199 = arith.constant dense<0.000000e+00> : vector<16x32xf32>
    %649 = tpu.matmul %638, %648, %cst_199 {dimension_numbers = #tpu.dot_dimension_numbers<[1], [0], [0], [1], [0, 0, 1, 1], [], []>} : vector<16x32xf32>, vector<32x32xf32>, vector<16x32xf32> -> vector<16x32xf32>
    %c5 = arith.constant 5 : index
    %c0_200 = arith.constant 0 : index
    %650 = vector.load %arg2[%c5, %c0_200] : memref<48x96xf32, #tpu.memory_space<vmem>>, vector<1x32xf32>
    %651 = vector.broadcast %650 : vector<1x32xf32> to vector<16x32xf32>
    %652 = arith.addf %649, %651 : vector<16x32xf32>
    %c288 = arith.constant 288 : index
    %c0_201 = arith.constant 0 : index
    %653 = vector.load %arg1[%c288, %c0_201] : memref<1440x96xf32, #tpu.memory_space<vmem>>, vector<64x64xf32>
    %cst_202 = arith.constant dense<0.000000e+00> : vector<16x64xf32>
    %654 = tpu.matmul %647, %653, %cst_202 {dimension_numbers = #tpu.dot_dimension_numbers<[1], [0], [0], [1], [0, 0, 1, 1], [], []>} : vector<16x64xf32>, vector<64x64xf32>, vector<16x64xf32> -> vector<16x64xf32>
    %c6 = arith.constant 6 : index
    %c0_203 = arith.constant 0 : index
    %655 = vector.load %arg2[%c6, %c0_203] : memref<48x96xf32, #tpu.memory_space<vmem>>, vector<1x64xf32>
    %656 = vector.broadcast %655 : vector<1x64xf32> to vector<16x64xf32>
    %657 = arith.addf %654, %656 : vector<16x64xf32>
    %658 = vector.extract_strided_slice %657 {offsets = [0, 0], sizes = [16, 32], strides = [1, 1]} : vector<16x64xf32> to vector<16x32xf32>
    %659 = vector.extract_strided_slice %657 {offsets = [0, 32], sizes = [16, 32], strides = [1, 1]} : vector<16x64xf32> to vector<16x32xf32>
    %660 = vector.extract_strided_slice %652 {offsets = [0, 0], sizes = [16, 8], strides = [1, 1]} : vector<16x32xf32> to vector<16x8xf32>
    %661 = vector.shape_cast %660 : vector<16x8xf32> to vector<2x8x8xf32>
    %662 = vector.extract_strided_slice %658 {offsets = [0, 0], sizes = [16, 8], strides = [1, 1]} : vector<16x32xf32> to vector<16x8xf32>
    %663 = vector.shape_cast %662 : vector<16x8xf32> to vector<2x8x8xf32>
    %664 = vector.extract_strided_slice %659 {offsets = [0, 0], sizes = [16, 8], strides = [1, 1]} : vector<16x32xf32> to vector<16x8xf32>
    %665 = vector.shape_cast %664 : vector<16x8xf32> to vector<2x8x8xf32>
    %cst_204 = arith.constant dense<0.000000e+00> : vector<2x8x8xf32>
    %666 = tpu.matmul %661, %663, %cst_204 {dimension_numbers = #tpu.dot_dimension_numbers<[2], [2], [1], [1], [0, 0, 0, 1, 1, 1], [0], [0]>} : vector<2x8x8xf32>, vector<2x8x8xf32>, vector<2x8x8xf32> -> vector<2x8x8xf32>
    %cst_205 = arith.constant dense<0xFF800000> : vector<2x8xf32>
    %667 = vector.multi_reduction <maximumf>, %666, %cst_205 [2] : vector<2x8x8xf32> to vector<2x8xf32>
    %668 = vector.shape_cast %667 : vector<2x8xf32> to vector<2x8x1xf32>
    %669 = vector.broadcast %668 : vector<2x8x1xf32> to vector<2x8x8xf32>
    %670 = arith.subf %666, %669 : vector<2x8x8xf32>
    %671 = math.exp %670 : vector<2x8x8xf32>
    %cst_206 = arith.constant dense<0.000000e+00> : vector<2x8xf32>
    %672 = vector.multi_reduction <add>, %671, %cst_206 [2] : vector<2x8x8xf32> to vector<2x8xf32>
    %673 = vector.shape_cast %672 : vector<2x8xf32> to vector<2x8x1xf32>
    %674 = tpu.reciprocal %673 {approx = true} : vector<2x8x1xf32> -> vector<2x8x1xf32>
    %675 = vector.broadcast %674 : vector<2x8x1xf32> to vector<2x8x8xf32>
    %676 = arith.mulf %671, %675 : vector<2x8x8xf32>
    %cst_207 = arith.constant dense<0.000000e+00> : vector<2x8x8xf32>
    %677 = tpu.matmul %676, %665, %cst_207 {dimension_numbers = #tpu.dot_dimension_numbers<[2], [1], [1], [2], [0, 0, 0, 1, 1, 2], [0], [0]>} : vector<2x8x8xf32>, vector<2x8x8xf32>, vector<2x8x8xf32> -> vector<2x8x8xf32>
    %678 = vector.shape_cast %677 : vector<2x8x8xf32> to vector<16x8xf32>
    %679 = vector.extract_strided_slice %652 {offsets = [0, 8], sizes = [16, 8], strides = [1, 1]} : vector<16x32xf32> to vector<16x8xf32>
    %680 = vector.shape_cast %679 : vector<16x8xf32> to vector<2x8x8xf32>
    %681 = vector.extract_strided_slice %658 {offsets = [0, 8], sizes = [16, 8], strides = [1, 1]} : vector<16x32xf32> to vector<16x8xf32>
    %682 = vector.shape_cast %681 : vector<16x8xf32> to vector<2x8x8xf32>
    %683 = vector.extract_strided_slice %659 {offsets = [0, 8], sizes = [16, 8], strides = [1, 1]} : vector<16x32xf32> to vector<16x8xf32>
    %684 = vector.shape_cast %683 : vector<16x8xf32> to vector<2x8x8xf32>
    %cst_208 = arith.constant dense<0.000000e+00> : vector<2x8x8xf32>
    %685 = tpu.matmul %680, %682, %cst_208 {dimension_numbers = #tpu.dot_dimension_numbers<[2], [2], [1], [1], [0, 0, 0, 1, 1, 1], [0], [0]>} : vector<2x8x8xf32>, vector<2x8x8xf32>, vector<2x8x8xf32> -> vector<2x8x8xf32>
    %cst_209 = arith.constant dense<0xFF800000> : vector<2x8xf32>
    %686 = vector.multi_reduction <maximumf>, %685, %cst_209 [2] : vector<2x8x8xf32> to vector<2x8xf32>
    %687 = vector.shape_cast %686 : vector<2x8xf32> to vector<2x8x1xf32>
    %688 = vector.broadcast %687 : vector<2x8x1xf32> to vector<2x8x8xf32>
    %689 = arith.subf %685, %688 : vector<2x8x8xf32>
    %690 = math.exp %689 : vector<2x8x8xf32>
    %cst_210 = arith.constant dense<0.000000e+00> : vector<2x8xf32>
    %691 = vector.multi_reduction <add>, %690, %cst_210 [2] : vector<2x8x8xf32> to vector<2x8xf32>
    %692 = vector.shape_cast %691 : vector<2x8xf32> to vector<2x8x1xf32>
    %693 = tpu.reciprocal %692 {approx = true} : vector<2x8x1xf32> -> vector<2x8x1xf32>
    %694 = vector.broadcast %693 : vector<2x8x1xf32> to vector<2x8x8xf32>
    %695 = arith.mulf %690, %694 : vector<2x8x8xf32>
    %cst_211 = arith.constant dense<0.000000e+00> : vector<2x8x8xf32>
    %696 = tpu.matmul %695, %684, %cst_211 {dimension_numbers = #tpu.dot_dimension_numbers<[2], [1], [1], [2], [0, 0, 0, 1, 1, 2], [0], [0]>} : vector<2x8x8xf32>, vector<2x8x8xf32>, vector<2x8x8xf32> -> vector<2x8x8xf32>
    %697 = vector.shape_cast %696 : vector<2x8x8xf32> to vector<16x8xf32>
    %698 = vector.extract_strided_slice %652 {offsets = [0, 16], sizes = [16, 8], strides = [1, 1]} : vector<16x32xf32> to vector<16x8xf32>
    %699 = vector.shape_cast %698 : vector<16x8xf32> to vector<2x8x8xf32>
    %700 = vector.extract_strided_slice %658 {offsets = [0, 16], sizes = [16, 8], strides = [1, 1]} : vector<16x32xf32> to vector<16x8xf32>
    %701 = vector.shape_cast %700 : vector<16x8xf32> to vector<2x8x8xf32>
    %702 = vector.extract_strided_slice %659 {offsets = [0, 16], sizes = [16, 8], strides = [1, 1]} : vector<16x32xf32> to vector<16x8xf32>
    %703 = vector.shape_cast %702 : vector<16x8xf32> to vector<2x8x8xf32>
    %cst_212 = arith.constant dense<0.000000e+00> : vector<2x8x8xf32>
    %704 = tpu.matmul %699, %701, %cst_212 {dimension_numbers = #tpu.dot_dimension_numbers<[2], [2], [1], [1], [0, 0, 0, 1, 1, 1], [0], [0]>} : vector<2x8x8xf32>, vector<2x8x8xf32>, vector<2x8x8xf32> -> vector<2x8x8xf32>
    %cst_213 = arith.constant dense<0xFF800000> : vector<2x8xf32>
    %705 = vector.multi_reduction <maximumf>, %704, %cst_213 [2] : vector<2x8x8xf32> to vector<2x8xf32>
    %706 = vector.shape_cast %705 : vector<2x8xf32> to vector<2x8x1xf32>
    %707 = vector.broadcast %706 : vector<2x8x1xf32> to vector<2x8x8xf32>
    %708 = arith.subf %704, %707 : vector<2x8x8xf32>
    %709 = math.exp %708 : vector<2x8x8xf32>
    %cst_214 = arith.constant dense<0.000000e+00> : vector<2x8xf32>
    %710 = vector.multi_reduction <add>, %709, %cst_214 [2] : vector<2x8x8xf32> to vector<2x8xf32>
    %711 = vector.shape_cast %710 : vector<2x8xf32> to vector<2x8x1xf32>
    %712 = tpu.reciprocal %711 {approx = true} : vector<2x8x1xf32> -> vector<2x8x1xf32>
    %713 = vector.broadcast %712 : vector<2x8x1xf32> to vector<2x8x8xf32>
    %714 = arith.mulf %709, %713 : vector<2x8x8xf32>
    %cst_215 = arith.constant dense<0.000000e+00> : vector<2x8x8xf32>
    %715 = tpu.matmul %714, %703, %cst_215 {dimension_numbers = #tpu.dot_dimension_numbers<[2], [1], [1], [2], [0, 0, 0, 1, 1, 2], [0], [0]>} : vector<2x8x8xf32>, vector<2x8x8xf32>, vector<2x8x8xf32> -> vector<2x8x8xf32>
    %716 = vector.shape_cast %715 : vector<2x8x8xf32> to vector<16x8xf32>
    %717 = vector.extract_strided_slice %652 {offsets = [0, 24], sizes = [16, 8], strides = [1, 1]} : vector<16x32xf32> to vector<16x8xf32>
    %718 = vector.shape_cast %717 : vector<16x8xf32> to vector<2x8x8xf32>
    %719 = vector.extract_strided_slice %658 {offsets = [0, 24], sizes = [16, 8], strides = [1, 1]} : vector<16x32xf32> to vector<16x8xf32>
    %720 = vector.shape_cast %719 : vector<16x8xf32> to vector<2x8x8xf32>
    %721 = vector.extract_strided_slice %659 {offsets = [0, 24], sizes = [16, 8], strides = [1, 1]} : vector<16x32xf32> to vector<16x8xf32>
    %722 = vector.shape_cast %721 : vector<16x8xf32> to vector<2x8x8xf32>
    %cst_216 = arith.constant dense<0.000000e+00> : vector<2x8x8xf32>
    %723 = tpu.matmul %718, %720, %cst_216 {dimension_numbers = #tpu.dot_dimension_numbers<[2], [2], [1], [1], [0, 0, 0, 1, 1, 1], [0], [0]>} : vector<2x8x8xf32>, vector<2x8x8xf32>, vector<2x8x8xf32> -> vector<2x8x8xf32>
    %cst_217 = arith.constant dense<0xFF800000> : vector<2x8xf32>
    %724 = vector.multi_reduction <maximumf>, %723, %cst_217 [2] : vector<2x8x8xf32> to vector<2x8xf32>
    %725 = vector.shape_cast %724 : vector<2x8xf32> to vector<2x8x1xf32>
    %726 = vector.broadcast %725 : vector<2x8x1xf32> to vector<2x8x8xf32>
    %727 = arith.subf %723, %726 : vector<2x8x8xf32>
    %728 = math.exp %727 : vector<2x8x8xf32>
    %cst_218 = arith.constant dense<0.000000e+00> : vector<2x8xf32>
    %729 = vector.multi_reduction <add>, %728, %cst_218 [2] : vector<2x8x8xf32> to vector<2x8xf32>
    %730 = vector.shape_cast %729 : vector<2x8xf32> to vector<2x8x1xf32>
    %731 = tpu.reciprocal %730 {approx = true} : vector<2x8x1xf32> -> vector<2x8x1xf32>
    %732 = vector.broadcast %731 : vector<2x8x1xf32> to vector<2x8x8xf32>
    %733 = arith.mulf %728, %732 : vector<2x8x8xf32>
    %cst_219 = arith.constant dense<0.000000e+00> : vector<2x8x8xf32>
    %734 = tpu.matmul %733, %722, %cst_219 {dimension_numbers = #tpu.dot_dimension_numbers<[2], [1], [1], [2], [0, 0, 0, 1, 1, 2], [0], [0]>} : vector<2x8x8xf32>, vector<2x8x8xf32>, vector<2x8x8xf32> -> vector<2x8x8xf32>
    %735 = vector.shape_cast %734 : vector<2x8x8xf32> to vector<16x8xf32>
    %736 = tpu.concatenate %678, %697, %716, %735 in 1 : vector<16x8xf32>, vector<16x8xf32>, vector<16x8xf32>, vector<16x8xf32> -> vector<16x32xf32>
    %c352 = arith.constant 352 : index
    %c0_220 = arith.constant 0 : index
    %737 = vector.load %arg1[%c352, %c0_220] : memref<1440x96xf32, #tpu.memory_space<vmem>>, vector<32x32xf32>
    %cst_221 = arith.constant dense<0.000000e+00> : vector<16x32xf32>
    %738 = tpu.matmul %736, %737, %cst_221 {dimension_numbers = #tpu.dot_dimension_numbers<[1], [0], [0], [1], [0, 0, 1, 1], [], []>} : vector<16x32xf32>, vector<32x32xf32>, vector<16x32xf32> -> vector<16x32xf32>
    %c7 = arith.constant 7 : index
    %c0_222 = arith.constant 0 : index
    %739 = vector.load %arg2[%c7, %c0_222] : memref<48x96xf32, #tpu.memory_space<vmem>>, vector<1x32xf32>
    %740 = vector.broadcast %739 : vector<1x32xf32> to vector<16x32xf32>
    %741 = arith.addf %738, %740 : vector<16x32xf32>
    %742 = arith.addf %741, %638 : vector<16x32xf32>
    %743 = vector.extract_strided_slice %647 {offsets = [0, 0], sizes = [16, 32], strides = [1, 1]} : vector<16x64xf32> to vector<16x32xf32>
    %744 = arith.addf %742, %743 : vector<16x32xf32>
    %745 = vector.extract_strided_slice %647 {offsets = [0, 32], sizes = [16, 32], strides = [1, 1]} : vector<16x64xf32> to vector<16x32xf32>
    %746 = arith.addf %744, %745 : vector<16x32xf32>
    %cst_223 = arith.constant dense<0.000000e+00> : vector<16xf32>
    %747 = vector.multi_reduction <add>, %746, %cst_223 [1] : vector<16x32xf32> to vector<16xf32>
    %748 = vector.shape_cast %747 : vector<16xf32> to vector<16x1xf32>
    %cst_224 = arith.constant 3.200000e+01 : f32
    %749 = vector.broadcast %cst_224 : f32 to vector<16x1xf32>
    %750 = arith.divf %748, %749 : vector<16x1xf32>
    %751 = vector.broadcast %750 : vector<16x1xf32> to vector<16x32xf32>
    %752 = arith.subf %746, %751 : vector<16x32xf32>
    %753 = arith.mulf %752, %752 : vector<16x32xf32>
    %cst_225 = arith.constant dense<0.000000e+00> : vector<16xf32>
    %754 = vector.multi_reduction <add>, %753, %cst_225 [1] : vector<16x32xf32> to vector<16xf32>
    %755 = vector.shape_cast %754 : vector<16xf32> to vector<16x1xf32>
    %cst_226 = arith.constant 3.200000e+01 : f32
    %756 = vector.broadcast %cst_226 : f32 to vector<16x1xf32>
    %757 = arith.divf %755, %756 : vector<16x1xf32>
    %cst_227 = arith.constant 9.99999996E-13 : f32
    %758 = vector.broadcast %cst_227 : f32 to vector<16x1xf32>
    %759 = arith.addf %757, %758 : vector<16x1xf32>
    %760 = math.rsqrt %759 : vector<16x1xf32>
    %761 = vector.broadcast %760 : vector<16x1xf32> to vector<16x32xf32>
    %762 = arith.mulf %752, %761 : vector<16x32xf32>
    %c10 = arith.constant 10 : index
    %c0_228 = arith.constant 0 : index
    %763 = vector.load %arg2[%c10, %c0_228] : memref<48x96xf32, #tpu.memory_space<vmem>>, vector<1x32xf32>
    %764 = vector.broadcast %763 : vector<1x32xf32> to vector<16x32xf32>
    %765 = arith.mulf %762, %764 : vector<16x32xf32>
    %c11 = arith.constant 11 : index
    %c0_229 = arith.constant 0 : index
    %766 = vector.load %arg2[%c11, %c0_229] : memref<48x96xf32, #tpu.memory_space<vmem>>, vector<1x32xf32>
    %767 = vector.broadcast %766 : vector<1x32xf32> to vector<16x32xf32>
    %768 = arith.addf %765, %767 : vector<16x32xf32>
    %c384 = arith.constant 384 : index
    %c0_230 = arith.constant 0 : index
    %769 = vector.load %arg1[%c384, %c0_230] : memref<1440x96xf32, #tpu.memory_space<vmem>>, vector<32x64xf32>
    %cst_231 = arith.constant dense<0.000000e+00> : vector<16x64xf32>
    %770 = tpu.matmul %768, %769, %cst_231 {dimension_numbers = #tpu.dot_dimension_numbers<[1], [0], [0], [1], [0, 0, 1, 1], [], []>} : vector<16x32xf32>, vector<32x64xf32>, vector<16x64xf32> -> vector<16x64xf32>
    %c8 = arith.constant 8 : index
    %c0_232 = arith.constant 0 : index
    %771 = vector.load %arg2[%c8, %c0_232] : memref<48x96xf32, #tpu.memory_space<vmem>>, vector<1x64xf32>
    %772 = vector.broadcast %771 : vector<1x64xf32> to vector<16x64xf32>
    %773 = arith.addf %770, %772 : vector<16x64xf32>
    %cst_233 = arith.constant 0.000000e+00 : f32
    %774 = vector.broadcast %cst_233 : f32 to vector<16x64xf32>
    %775 = arith.maximumf %773, %774 : vector<16x64xf32>
    %c416 = arith.constant 416 : index
    %c0_234 = arith.constant 0 : index
    %776 = vector.load %arg1[%c416, %c0_234] : memref<1440x96xf32, #tpu.memory_space<vmem>>, vector<64x32xf32>
    %cst_235 = arith.constant dense<0.000000e+00> : vector<16x32xf32>
    %777 = tpu.matmul %775, %776, %cst_235 {dimension_numbers = #tpu.dot_dimension_numbers<[1], [0], [0], [1], [0, 0, 1, 1], [], []>} : vector<16x64xf32>, vector<64x32xf32>, vector<16x32xf32> -> vector<16x32xf32>
    %c9 = arith.constant 9 : index
    %c0_236 = arith.constant 0 : index
    %778 = vector.load %arg2[%c9, %c0_236] : memref<48x96xf32, #tpu.memory_space<vmem>>, vector<1x32xf32>
    %779 = vector.broadcast %778 : vector<1x32xf32> to vector<16x32xf32>
    %780 = arith.addf %777, %779 : vector<16x32xf32>
    %781 = arith.addf %780, %768 : vector<16x32xf32>
    %cst_237 = arith.constant dense<0.000000e+00> : vector<16xf32>
    %782 = vector.multi_reduction <add>, %781, %cst_237 [1] : vector<16x32xf32> to vector<16xf32>
    %783 = vector.shape_cast %782 : vector<16xf32> to vector<16x1xf32>
    %cst_238 = arith.constant 3.200000e+01 : f32
    %784 = vector.broadcast %cst_238 : f32 to vector<16x1xf32>
    %785 = arith.divf %783, %784 : vector<16x1xf32>
    %786 = vector.broadcast %785 : vector<16x1xf32> to vector<16x32xf32>
    %787 = arith.subf %781, %786 : vector<16x32xf32>
    %788 = arith.mulf %787, %787 : vector<16x32xf32>
    %cst_239 = arith.constant dense<0.000000e+00> : vector<16xf32>
    %789 = vector.multi_reduction <add>, %788, %cst_239 [1] : vector<16x32xf32> to vector<16xf32>
    %790 = vector.shape_cast %789 : vector<16xf32> to vector<16x1xf32>
    %cst_240 = arith.constant 3.200000e+01 : f32
    %791 = vector.broadcast %cst_240 : f32 to vector<16x1xf32>
    %792 = arith.divf %790, %791 : vector<16x1xf32>
    %cst_241 = arith.constant 9.99999996E-13 : f32
    %793 = vector.broadcast %cst_241 : f32 to vector<16x1xf32>
    %794 = arith.addf %792, %793 : vector<16x1xf32>
    %795 = math.rsqrt %794 : vector<16x1xf32>
    %796 = vector.broadcast %795 : vector<16x1xf32> to vector<16x32xf32>
    %797 = arith.mulf %787, %796 : vector<16x32xf32>
    %c12 = arith.constant 12 : index
    %c0_242 = arith.constant 0 : index
    %798 = vector.load %arg2[%c12, %c0_242] : memref<48x96xf32, #tpu.memory_space<vmem>>, vector<1x32xf32>
    %799 = vector.broadcast %798 : vector<1x32xf32> to vector<16x32xf32>
    %800 = arith.mulf %797, %799 : vector<16x32xf32>
    %c13 = arith.constant 13 : index
    %c0_243 = arith.constant 0 : index
    %801 = vector.load %arg2[%c13, %c0_243] : memref<48x96xf32, #tpu.memory_space<vmem>>, vector<1x32xf32>
    %802 = vector.broadcast %801 : vector<1x32xf32> to vector<16x32xf32>
    %803 = arith.addf %800, %802 : vector<16x32xf32>
    %c0_244 = arith.constant 0 : index
    %c0_245 = arith.constant 0 : index
    %804 = vector.load %arg3[%c0_244, %c0_245] : memref<48x32xf32, #tpu.memory_space<vmem>>, vector<16x32xf32>
    tpu.vector_store %arg3[%c0_244, %c0_245], %803 {strides = array<i32>} : memref<48x32xf32, #tpu.memory_space<vmem>>, vector<16x32xf32>,
    %c16_246 = arith.constant 16 : index
    %c0_247 = arith.constant 0 : index
    %805 = vector.load %arg3[%c16_246, %c0_247] : memref<48x32xf32, #tpu.memory_space<vmem>>, vector<16x32xf32>
    tpu.vector_store %arg3[%c16_246, %c0_247], %279 {strides = array<i32>} : memref<48x32xf32, #tpu.memory_space<vmem>>, vector<16x32xf32>,
    %c32_248 = arith.constant 32 : index
    %c0_249 = arith.constant 0 : index
    %806 = vector.load %arg3[%c32_248, %c0_249] : memref<48x32xf32, #tpu.memory_space<vmem>>, vector<16x32xf32>
    tpu.vector_store %arg3[%c32_248, %c0_249], %541 {strides = array<i32>} : memref<48x32xf32, #tpu.memory_space<vmem>>, vector<16x32xf32>,
    return
  }
}

</mosaic_0001>

<bundles_post_ra>
// kernel: cycle_guided_forward.1
= control target key start
LH: loop header
LB: loop body
LE: loop exit
PB: predicated region body
PF: predicated region fallthrough
CT: control target
= control target key end

     0   :  { %vm29_vm0 = vcmask 261120   ;;  %s13238_s19 = smov 96   ;;  %vm400_vm1 = vcmask 523264   ;;  %v13239_v42 = vmov 0.0   ;;  %vm13240_vm2 = vmmov 0   ;;  %s13241_s26 = smov 120   ;;  %s15210_s1 = inlined_call_operand.vmem [shape: f32[1440,96], index: 1, kind: input, shape index: {}]   ;;  %s15211_s0 = inlined_call_operand.vmem [shape: f32[48,32], index: 0, kind: input, shape index: {}]   ;;  %s15212_s2 = inlined_call_operand.vmem [shape: f32[48,96], index: 2, kind: input, shape index: {}]   ;;  %s15213_s3 = inlined_call_operand.vmem [shape: f32[48,32], index: 3, kind: output, shape index: {}]  }
   0x1   :  { %v23_v0 = vld [vmem:[%s15210_s1 + $0x18] sm:$0xff]  ;;  %v22_v1 = vld [vmem:[%s15210_s1 + $0x10] sm:$0xff]  ;;  %v14_v2 = vld [vmem:[%s15211_s0] sm:$0xff]  ;;  %vm480_vm3 = vcmask 64512   ;;  %s13242_s27 = smov 88   ;;  %s13243_s28 = smov 112  }
   0x2   :  { %12069 = vmatprep.subr.mxu1 %v23_v0  ;;  %v21_v3 = vld [vmem:[%s15210_s1 + $0x8] sm:$0xff]  ;;  %12077 = vmatprep.mubr.msk.f32.mxu1 %vm29_vm0, %v14_v2  ;;  %v20_v4 = vld [vmem:[%s15210_s1] sm:$0xff]  ;;  %v114_v6 = vld [vmem:[%s15210_s1 + $0x1f8] sm:$0xff]  ;;  %s13244_s29 = smov 80   ;;  %s13245_s30 = smov 104   ;;  %vm1826_vm4 = vcmask 195584  }
   0x3   :  { %12070 = vmatpush3.msra.mxu1 %v23_v0  ;;  %v15_v5 = vld [vmem:[%s15211_s0 + $0x8] sm:$0xff]  ;;  %v16_v7 = vld [vmem:[%s15211_s0 + $0x10] sm:$0xff]  ;;  %v111_v10 = vld [vmem:[%s15210_s1 + $0x1e0] sm:$0xff]  ;;  %s13246_s4 = smov 72   ;;  %s13247_s5 = smov 8   ;;  %vm1823_vm5 = vcmask 130048  }
   0x4   :  { %12071 = vmatprep.subr.mxu1 %v22_v1  ;;  %v113_v8 = vld [vmem:[%s15210_s1 + $0x1f0] sm:$0xff]  ;;  %v112_v9 = vld [vmem:[%s15210_s1 + $0x1e8] sm:$0xff]  ;;  %v17_v11 = vld [vmem:[%s15211_s0 + $0x18] sm:$0xff]  ;;  %s13249_s14 = smov 24  }
   0x5   :  { %12072 = vmatpush3.msra.mxu1 %v22_v1  ;;  %v204_v12 = vld [vmem:[%s15210_s1 + $0x3d8] sm:$0xff]  ;;  %v203_v13 = vld [vmem:[%s15210_s1 + $0x3d0] sm:$0xff]  ;;  %v18_v14 = vld [vmem:[%s15211_s0 + $0x20] sm:$0xff] }
   0x6   :  { %12073 = vmatprep.subr.mxu1 %v21_v3  ;;  %12091 = vmatprep.subr.mxu0 %v204_v12  ;;  %v202_v15 = vld [vmem:[%s15210_s1 + $0x3c8] sm:$0xff]  ;;  %v294_v16 = vld [vmem:[%s15210_s1 + $0x218] sm:$0xff]  ;;  %v201_v17 = vld [vmem:[%s15210_s1 + $0x3c0] sm:$0xff] }
   0x7   :  { %12074 = vmatpush3.msra.mxu1 %v21_v3  ;;  %12092 = vmatpush3.msra.mxu0 %v204_v12  ;;  %v293_v18 = vld [vmem:[%s15210_s1 + $0x210] sm:$0xff]  ;;  %v292_v19 = vld [vmem:[%s15210_s1 + $0x208] sm:$0xff]  ;;  %v388_v21 = vld [vmem:[%s15210_s1 + $0x258] sm:$0xff] }
   0x8   :  { %12075 = vmatprep.subr.mxu1 %v20_v4  ;;  %12099 = vmatprep.mubr.msk.f32.mxu0 %vm29_vm0, %v18_v14  ;;  %v19_v20 = vld [vmem:[%s15211_s0 + $0x28] sm:$0xff]  ;;  %v387_v22 = vld [vmem:[%s15210_s1 + $0x250] sm:$0xff]  ;;  %v385_v24 = vld [vmem:[%s15210_s1 + $0x240] sm:$0xff]  ;;  %s13248_s0 = smov 16  }
   0x9   :  { %12076 = vmatpush3.msra.mxu1 %v20_v4  ;;  %12093 = vmatprep.subr.mxu0 %v203_v13  ;;  %v386_v23 = vld [vmem:[%s15210_s1 + $0x248] sm:$0xff]  ;;  %v384_v25 = vld [vmem:[%s15210_s1 + $0x238] sm:$0xff]  ;;  %v383_v26 = vld [vmem:[%s15210_s1 + $0x230] sm:$0xff] }
   0xa   :  { %12078 = vmatmul.mubr.msk.f32.vlgmr.msra.gmra.mxu1 %vm29_vm0, %v15_v5  ;;  %12080 = vmatprep.subr.mxu1 %v114_v6  ;;  %v291_v27 = vld [vmem:[%s15210_s1 + $0x200] sm:$0xff]  ;;  %v382_v28 = vld [vmem:[%s15210_s1 + $0x228] sm:$0xff]  ;;  %v11382_v35 = vld [vmem:[%s15212_s2 + $0x10] ss:$0 sm:$0xff] }
   0xb   :  { %12081 = vmatpush3.msra.mxu1 %v114_v6  ;;  %12088 = vmatprep.mubr.msk.f32.mxu1 %vm29_vm0, %v16_v7  ;;  %v381_v29 = vld [vmem:[%s15210_s1 + $0x220] sm:$0xff]  ;;  %v11391_v47 = vld [vmem:[%s15212_s2 + $0x12] ss:$0 sm:$0xff]  ;;  %v11388_v49 = vld [vmem:[%s15212_s2 + $0x11] ss:$0 sm:$0xff] }
   0xc   :  { %12082 = vmatprep.subr.mxu1 %v113_v8  ;;  %12094 = vmatpush3.msra.mxu0 %v203_v13  ;;  %v11379_v31 = vld [vmem:[%s15212_s2] ss:$0 sm:$0xff] }
   0xd   :  { %12083 = vmatpush3.msra.mxu1 %v113_v8  ;;  %12095 = vmatprep.subr.mxu0 %v202_v15 }
   0xe   :  { %12084 = vmatprep.subr.mxu1 %v112_v9  ;;  %12096 = vmatpush3.msra.mxu0 %v202_v15 }
   0xf   :  { %12085 = vmatpush3.msra.mxu1 %v112_v9  ;;  %12097 = vmatprep.subr.mxu0 %v201_v17 }
  0x10   :  { %12086 = vmatprep.subr.mxu1 %v111_v10  ;;  %12098 = vmatpush3.msra.mxu0 %v201_v17 }
  0x11   :  { %12087 = vmatpush3.msra.mxu1 %v111_v10  ;;  %12100 = vmatmul.mubr.msk.f32.vlgmr.msra.gmra.mxu0 %vm29_vm0, %v19_v20 }
  0x12   :  { %12089 = vmatmul.mubr.msk.f32.vlgmr.msra.gmra.mxu1 %vm29_vm0, %v17_v11  ;;  %12102 = vmatprep.subr.mxu1 %v294_v16 }
  0x13   :  { %12103 = vmatpush3.msra.mxu1 %v294_v16  ;;  %12113 = vmatprep.subr.mxu0 %v388_v21 }
  0x14   :  { %12104 = vmatprep.subr.mxu1 %v293_v18  ;;  %12114 = vmatpush3.msra.mxu0 %v388_v21 }
  0x15   :  { %12105 = vmatpush3.msra.mxu1 %v293_v18  ;;  %12115 = vmatprep.subr.mxu0 %v387_v22 }
  0x16   :  { %12106 = vmatprep.subr.mxu1 %v292_v19  ;;  %12116 = vmatpush3.msra.mxu0 %v387_v22 }
  0x17   :  { %12107 = vmatpush3.msra.mxu1 %v292_v19  ;;  %12117 = vmatprep.subr.mxu0 %v386_v23 }
  0x18   :  { %12118 = vmatpush3.msra.mxu0 %v386_v23  ;;  %12108 = vmatprep.subr.mxu1 %v291_v27 }
  0x19   :  { %12119 = vmatprep.subr.mxu0 %v385_v24  ;;  %12109 = vmatpush3.msra.mxu1 %v291_v27 }
  0x1a   :  { %12120 = vmatpush3.msra.mxu0 %v385_v24  ;;  %12132 = vmatprep.subr.mxu1 %v13239_v42 }
  0x1b   :  { %12121 = vmatprep.subr.mxu0 %v384_v25 }
  0x1c   :  { %12122 = vmatpush3.msra.mxu0 %v384_v25 }
  0x1d   :  { %12123 = vmatprep.subr.mxu0 %v383_v26 }
  0x1e   :  { %12124 = vmatpush3.msra.mxu0 %v383_v26 }
  0x1f   :  { %12125 = vmatprep.subr.mxu0 %v382_v28 }
  0x20   :  { %12126 = vmatpush3.msra.mxu0 %v382_v28 }
  0x21   :  { %12127 = vmatprep.subr.mxu0 %v381_v29 }
  0x22   :  { %12128 = vmatpush3.msra.mxu0 %v381_v29 }
  0x23   :  { %12152 = vmatprep.subr.mxu0 %v13239_v42 }
  0xca   :  { %v12079_v30 = vpop.f32.mrf.mxu1 }
  0xcb   :  { %v13373_v34 = vadd.f32 %v12079_v30, %v11379_v31 }
  0xcc   :  { %v102_v32 = vpop.f32.mrf.mxu1 }
  0xcd   :  { %v13369_v33 = vadd.f32 %v11379_v31, %v102_v32 }
  0xcf   :  { %396 = vrot.lane.b32.xlu0 %v13369_v33, %s13238_s19 }
  0xd1   :  { %v13402_v43 = vpop.f32.mrf.mxu0 }
  0xd2   :  { %v12090_v36 = vpop.f32.mrf.mxu1 }
  0xd3   :  { %398 = vrot.lane.b32.xlu0 %v13373_v34, %s13238_s19  ;;  %v13380_v37 = vadd.f32 %v12090_v36, %v11382_v35  ;;  %v13404_v44 = vpop.f32.mrf.mxu0 }
  0xd4   :  { %v192_v38 = vpop.f32.mrf.mxu1 }
  0xd5   :  { %v13382_v39 = vadd.f32 %v11382_v35, %v192_v38 }
  0xd7   :  { %12110 = vmatprep.mubr.msk.f32.mxu1 %vm29_vm0, %v13382_v39 }
  0xd8   :  { %12111 = vmatmul.mubr.msk.f32.vlgmr.msra.gmra.mxu1 %vm29_vm0, %v13380_v37 }
  0xd9   :  { %12134 = vmatprep.mubr.msk.f32.mxu1 %vm13240_vm2, %v13239_v42 }
 0x141   :  { %v13388_v40 = vpop.permute.xlu0 %396 }
 0x142   :  { %12129 = vmatprep.mubr.msk.f32.mxu0 %vm400_vm1, %v13388_v40 }
 0x145   :  { %v13392_v41 = vpop.permute.xlu0 %398 }
 0x146   :  { %12130 = vmatmul.mubr.msk.f32.vlgmr.msra.gmra.mxu0 %vm400_vm1, %v13392_v41 }
 0x147   :  { %12154 = vmatprep.mubr.msk.f32.mxu0 %vm13240_vm2, %v13239_v42 }
 0x198   :  { %v12112_v45 = vpop.f32.mrf.mxu1 }
 0x199   :  { %v13427_v54 = vadd.f32 %v12112_v45, %v11388_v49 }
 0x19a   :  { %v372_v50 = vpop.f32.mrf.mxu1 }
 0x19b   :  { %v13416_v52 = vadd.f32 %v11388_v49, %v372_v50 }
 0x206   :  { %v12131_v46 = vpop.f32.mrf.mxu0 }
 0x207   :  { %v13419_v53 = vadd.f32 %v12131_v46, %v11391_v47 }
 0x208   :  { %v471_v48 = vpop.f32.mrf.mxu0 }
 0x209   :  { %v13412_v51 = vadd.f32 %v11391_v47, %v471_v48 }
 0x20b   :  { %12133 = vmatpush3.xpose.msk.msra.mxu1 %vm480_vm3, %v13412_v51 }
 0x20c   :  { %12137 = vmatprep.subr.mxu1 %v13239_v42 }
 0x20e   :  { %12135 = vmatmul.mubr.msk.f32.vlgmr.msra.gmra.mxu1 %vm480_vm3, %v13416_v52 }
 0x20f   :  { %12138 = vmatpush3.xpose.msk.msra.mxu1 %vm480_vm3, %v13419_v53  ;;  %12139 = vmatprep.mubr.msk.f32.mxu1 %vm13240_vm2, %v13239_v42 }
 0x210   :  { %12142 = vmatprep.subr.mxu1 %v13239_v42 }
 0x212   :  { %12140 = vmatmul.mubr.msk.f32.vlgmr.msra.gmra.mxu1 %vm480_vm3, %v13427_v54 }
 0x213   :  { %12144 = vmatprep.mubr.msk.f32.mxu1 %vm13240_vm2, %v13239_v42 }
 0x2ce   :  { %v553_v55 = vpop.f32.mrf.mxu1 }
 0x2cf   :  { %v633_v56 = vsel %vm480_vm3, %v553_v55, -inf }
 0x2d0   :  { %634 = vmax.xlane.f32.xlu1 %v633_v56  ;;  %v12136_v57 = vpop.f32.mrf.mxu1 }
 0x2d2   :  { %v629_v58 = vpop.f32.mrf.mxu1 }
 0x2d3   :  { %v636_v59 = vsel %vm480_vm3, %v629_v58, -inf }
 0x2d4   :  { %637 = vmax.xlane.f32.xlu1 %v636_v59  ;;  %v12141_v60 = vpop.f32.mrf.mxu1 }
 0x2e5   :  { %655 = vrot.lane.b32.xlu1 %v13412_v51, %s13238_s19 }
 0x2e9   :  { %731 = vrot.lane.b32.xlu1 %v13419_v53, %s13238_s19 }
 0x2ed   :  { %809 = vrot.lane.b32.xlu1 %v13412_v51, %s13241_s26 }
 0x2f1   :  { %887 = vrot.lane.b32.xlu1 %v13419_v53, %s13241_s26 }
 0x359   :  { %v635_v61 = vpop.xlane.xlu1 %634 }
 0x35a   :  { %v639_v62 = vsub.f32 %v553_v55, %v635_v61 }
 0x35c   :  { %v641_v63 = vmul.f32 1.442695, %v639_v62 }
 0x35d   :  { %v638_v0 = vpop.xlane.xlu1 %637 }
 0x35e   :  { %13020 = vpow2.f32 %v641_v63  ;;  %v640_v1 = vsub.f32 %v629_v58, %v638_v0 }
 0x360   :  { %v643_v2 = vmul.f32 1.442695, %v640_v1 }
 0x361   :  { %v656_v3 = vpop.permute.xlu1 %655 }
 0x362   :  { %13022 = vpow2.f32 %v643_v2  ;;  %12143 = vmatpush3.msra.mxu1 %v656_v3 }
 0x363   :  { %12147 = vmatprep.subr.mxu1 %v13239_v42 }
 0x365   :  { %v732_v4 = vpop.permute.xlu1 %731 }
 0x369   :  { %v810_v5 = vpop.permute.xlu1 %809 }
 0x36a   :  { %12153 = vmatpush3.xpose.msk.msra.mxu0 %vm480_vm3, %v810_v5 }
 0x36b   :  { %v13021_v6 = vpop.eup %13020  ;;  %12162 = vmatprep.subr.mxu0 %v13239_v42 }
 0x36c   :  { %v645_v7 = vsel %vm480_vm3, %v13021_v6, 0.0 }
 0x36d   :  { %646 = vadd.xlane.f32.xlu0 %v645_v7  ;;  %v888_v10 = vpop.permute.xlu1 %887 }
 0x36f   :  { %v13023_v8 = vpop.eup %13022 }
 0x370   :  { %v648_v9 = vsel %vm480_vm3, %v13023_v8, 0.0 }
 0x371   :  { %649 = vadd.xlane.f32.xlu1 %v648_v9 }
 0x382   :  { %885 = vrot.lane.b32.xlu1 %v13427_v54, %s13241_s26 }
 0x383   :  { %807 = vrot.lane.b32.xlu0 %v13416_v52, %s13241_s26 }
 0x3f6   :  { %v647_v11 = vpop.xlane.xlu0 %646 }
 0x3f7   :  { %13024 = vrcp.f32 %v647_v11 }
 0x3fa   :  { %v808_v12 = vpop.permute.xlu0 %807  ;;  %v650_v13 = vpop.xlane.xlu1 %649 }
 0x3fb   :  { %13026 = vrcp.f32 %v650_v13  ;;  %12155 = vmatmul.mubr.msk.f32.vlgmr.msra.gmra.mxu0 %vm480_vm3, %v808_v12 }
 0x3fc   :  { %12164 = vmatprep.mubr.msk.f32.mxu0 %vm13240_vm2, %v13239_v42 }
 0x3fe   :  { %v886_v18 = vpop.permute.xlu1 %885 }
 0x404   :  { %v13025_v14 = vpop.eup %13024 }
 0x405   :  { %v653_v15 = vmul.f32 %v13025_v14, %v13021_v6 }
 0x407   :  { %12145 = vmatmul.mubr.msk.f32.vlgmr.msra.gmra.mxu1 %vm480_vm3, %v653_v15 }
 0x408   :  { %v13027_v16 = vpop.eup %13026  ;;  %12148 = vmatpush3.msra.mxu1 %v732_v4  ;;  %12149 = vmatprep.mubr.msk.f32.mxu1 %vm13240_vm2, %v13239_v42 }
 0x409   :  { %12157 = vmatprep.subr.mxu1 %v13239_v42  ;;  %v654_v17 = vmul.f32 %v13027_v16, %v13023_v8 }
 0x40b   :  { %12150 = vmatmul.mubr.msk.f32.vlgmr.msra.gmra.mxu1 %vm480_vm3, %v654_v17 }
 0x40c   :  { %12158 = vmatpush3.xpose.msk.msra.mxu1 %vm480_vm3, %v888_v10  ;;  %12159 = vmatprep.mubr.msk.f32.mxu1 %vm13240_vm2, %v13239_v42 }
 0x40d   :  { %12167 = vmatprep.subr.mxu1 %v13239_v42 }
 0x40f   :  { %12160 = vmatmul.mubr.msk.f32.vlgmr.msra.gmra.mxu1 %vm480_vm3, %v886_v18 }
 0x410   :  { %12169 = vmatprep.mubr.msk.f32.mxu1 %vm13240_vm2, %v13239_v42 }
 0x4bb   :  { %v881_v19 = vpop.f32.mrf.mxu0 }
 0x4bc   :  { %v963_v20 = vsel %vm480_vm3, %v881_v19, -inf }
 0x4bd   :  { %964 = vmax.xlane.f32.xlu1 %v963_v20  ;;  %v12156_v21 = vpop.f32.mrf.mxu0 }
 0x4c7   :  { %v13469_v22 = vpop.f32.mrf.mxu1 }
 0x4c9   :  { %v12146_v23 = vpop.f32.mrf.mxu1 }
 0x4cb   :  { %v13471_v24 = vpop.f32.mrf.mxu1 }
 0x4cd   :  { %v12151_v25 = vpop.f32.mrf.mxu1 }
 0x4cf   :  { %v959_v26 = vpop.f32.mrf.mxu1 }
 0x4d0   :  { %v966_v27 = vsel %vm480_vm3, %v959_v26, -inf }
 0x4d1   :  { %967 = vmax.xlane.f32.xlu0 %v966_v27  ;;  %v12161_v28 = vpop.f32.mrf.mxu1 }
 0x4e7   :  { %1061 = vrot.lane.b32.xlu0 %v13419_v53, %s13242_s27 }
 0x4eb   :  { %1137 = vrot.lane.b32.xlu0 %v13416_v52, %s13243_s28 }
 0x546   :  { %v965_v29 = vpop.xlane.xlu1 %964 }
 0x547   :  { %v969_v30 = vsub.f32 %v881_v19, %v965_v29 }
 0x549   :  { %v971_v31 = vmul.f32 1.442695, %v969_v30 }
 0x54b   :  { %13028 = vpow2.f32 %v971_v31 }
 0x558   :  { %v13029_v32 = vpop.eup %13028 }
 0x559   :  { %v975_v35 = vsel %vm480_vm3, %v13029_v32, 0.0 }
 0x55a   :  { %976 = vadd.xlane.f32.xlu1 %v975_v35  ;;  %v968_v36 = vpop.xlane.xlu0 %967 }
 0x55b   :  { %v970_v45 = vsub.f32 %v959_v26, %v968_v36 }
 0x55d   :  { %v973_v46 = vmul.f32 1.442695, %v970_v45 }
 0x55e   :  { %v1062_v38 = vpop.permute.xlu0 %1061 }
 0x55f   :  { %12168 = vmatpush3.msra.mxu1 %v1062_v38  ;;  %13030 = vpow2.f32 %v973_v46 }
 0x560   :  { %12177 = vmatprep.subr.mxu1 %v13239_v42 }
 0x562   :  { %v1138_v58 = vpop.permute.xlu0 %1137 }
 0x56b   :  { %985 = vrot.lane.b32.xlu1 %v13412_v51, %s13242_s27 }
 0x56c   :  { %v13031_v47 = vpop.eup %13030 }
 0x56d   :  { %v978_v48 = vsel %vm480_vm3, %v13031_v47, 0.0 }
 0x56f   :  { %1139 = vrot.lane.b32.xlu1 %v13412_v51, %s13243_s28 }
 0x573   :  { %1217 = vrot.lane.b32.xlu1 %v13419_v53, %s13243_s28 }
 0x597   :  { %979 = vadd.xlane.f32.xlu1 %v978_v48 }
 0x5a8   :  { %1215 = vrot.lane.b32.xlu1 %v13427_v54, %s13243_s28 }
 0x5e3   :  { %v977_v49 = vpop.xlane.xlu1 %976 }
 0x5e4   :  { %13032 = vrcp.f32 %v977_v49 }
 0x5e7   :  { %v986_v50 = vpop.permute.xlu1 %985 }
 0x5e8   :  { %12163 = vmatpush3.msra.mxu0 %v986_v50 }
 0x5e9   :  { %12172 = vmatprep.subr.mxu0 %v13239_v42 }
 0x5eb   :  { %v1140_v57 = vpop.permute.xlu1 %1139 }
 0x5ef   :  { %v1218_v59 = vpop.permute.xlu1 %1217 }
 0x5f1   :  { %v13033_v55 = vpop.eup %13032 }
 0x5f2   :  { %v983_v56 = vmul.f32 %v13033_v55, %v13029_v32 }
 0x5f4   :  { %12165 = vmatmul.mubr.msk.f32.vlgmr.msra.gmra.mxu0 %vm480_vm3, %v983_v56 }
 0x5f5   :  { %12173 = vmatpush3.xpose.msk.msra.mxu0 %vm480_vm3, %v1140_v57  ;;  %12174 = vmatprep.mubr.msk.f32.mxu0 %vm13240_vm2, %v13239_v42 }
 0x5f6   :  { %12182 = vmatprep.subr.mxu0 %v13239_v42 }
 0x5f8   :  { %12175 = vmatmul.mubr.msk.f32.vlgmr.msra.gmra.mxu0 %vm480_vm3, %v1138_v58 }
 0x5f9   :  { %12184 = vmatprep.mubr.msk.f32.mxu0 %vm13240_vm2, %v13239_v42 }
 0x620   :  { %v980_v60 = vpop.xlane.xlu1 %979 }
 0x621   :  { %13034 = vrcp.f32 %v980_v60 }
 0x624   :  { %v1216_v63 = vpop.permute.xlu1 %1215 }
 0x62e   :  { %v13035_v61 = vpop.eup %13034 }
 0x62f   :  { %v984_v62 = vmul.f32 %v13035_v61, %v13031_v47 }
 0x631   :  { %12170 = vmatmul.mubr.msk.f32.vlgmr.msra.gmra.mxu1 %vm480_vm3, %v984_v62 }
 0x632   :  { %12178 = vmatpush3.xpose.msk.msra.mxu1 %vm480_vm3, %v1218_v59  ;;  %12179 = vmatprep.mubr.msk.f32.mxu1 %vm13240_vm2, %v13239_v42 }
 0x633   :  { %12187 = vmatprep.subr.mxu1 %v13239_v42 }
 0x635   :  { %12180 = vmatmul.mubr.msk.f32.vlgmr.msra.gmra.mxu1 %vm480_vm3, %v1216_v63 }
 0x636   :  { %12189 = vmatprep.mubr.msk.f32.mxu1 %vm13240_vm2, %v13239_v42 }
 0x6b4   :  { %v13506_v0 = vpop.f32.mrf.mxu0 }
 0x6b6   :  { %v12166_v1 = vpop.f32.mrf.mxu0 }
 0x6b8   :  { %v1211_v2 = vpop.f32.mrf.mxu0 }
 0x6b9   :  { %v1293_v3 = vsel %vm480_vm3, %v1211_v2, -inf }
 0x6ba   :  { %1294 = vmax.xlane.f32.xlu0 %v1293_v3  ;;  %v12176_v4 = vpop.f32.mrf.mxu0 }
 0x6f1   :  { %v13509_v5 = vpop.f32.mrf.mxu1 }
 0x6f3   :  { %v12171_v6 = vpop.f32.mrf.mxu1 }
 0x6f5   :  { %v1289_v7 = vpop.f32.mrf.mxu1 }
 0x6f6   :  { %v1296_v8 = vsel %vm480_vm3, %v1289_v7, -inf }
 0x6f7   :  { %1297 = vmax.xlane.f32.xlu1 %v1296_v8  ;;  %v12181_v9 = vpop.f32.mrf.mxu1  ;;  %v1831_v8 = vld [vmem:[%s15210_s1 + $0x270] sm:$0xff] }
 0x6f8   :  { %v1830_v9 = vld [vmem:[%s15210_s1 + $0x268] sm:$0xff] }
 0x708   :  { %1315 = vrot.lane.b32.xlu1 %v13412_v51, %s13244_s29 }
 0x70c   :  { %1469 = vrot.lane.b32.xlu1 %v13412_v51, %s13245_s30 }
 0x710   :  { %1547 = vrot.lane.b32.xlu1 %v13419_v53, %s13245_s30 }
 0x714   :  { %1545 = vrot.lane.b32.xlu1 %v13427_v54, %s13245_s30 }
 0x743   :  { %v1295_v10 = vpop.xlane.xlu0 %1294 }
 0x744   :  { %v1299_v11 = vsub.f32 %v1211_v2, %v1295_v10  ;;  %v1829_v10 = vld [vmem:[%s15210_s1 + $0x260] sm:$0xff] }
 0x746   :  { %v1301_v12 = vmul.f32 1.442695, %v1299_v11 }
 0x748   :  { %13036 = vpow2.f32 %v1301_v12 }
 0x755   :  { %v13037_v13 = vpop.eup %13036 }
 0x756   :  { %v1305_v14 = vsel %vm480_vm3, %v13037_v13, 0.0 }
 0x757   :  { %1306 = vadd.xlane.f32.xlu0 %v1305_v14 }
 0x76d   :  { %1391 = vrot.lane.b32.xlu0 %v13419_v53, %s13244_s29 }
 0x780   :  { %v1298_v15 = vpop.xlane.xlu1 %1297 }
 0x781   :  { %v1300_v16 = vsub.f32 %v1289_v7, %v1298_v15 }
 0x783   :  { %v1303_v17 = vmul.f32 1.442695, %v1300_v16  ;;  %v1930_v16 = vld [vmem:[%s15210_s1 + $0x2d8] sm:$0xff] }
 0x784   :  { %v1316_v18 = vpop.permute.xlu1 %1315 }
 0x785   :  { %13038 = vpow2.f32 %v1303_v17  ;;  %12183 = vmatpush3.msra.mxu0 %v1316_v18  ;;  %v1929_v17 = vld [vmem:[%s15210_s1 + $0x2d0] sm:$0xff] }
 0x786   :  { %12192 = vmatprep.subr.mxu0 %v13239_v42 }
 0x788   :  { %v1470_v26 = vpop.permute.xlu1 %1469 }
 0x78c   :  { %v1548_v29 = vpop.permute.xlu1 %1547 }
 0x790   :  { %v1546_v31 = vpop.permute.xlu1 %1545 }
 0x792   :  { %v13039_v54 = vpop.eup %13038 }
 0x793   :  { %v1308_v19 = vsel %vm480_vm3, %v13039_v54, 0.0 }
 0x794   :  { %1309 = vadd.xlane.f32.xlu0 %v1308_v19 }
 0x7aa   :  { %1467 = vrot.lane.b32.xlu0 %v13416_v52, %s13245_s30 }
 0x7e0   :  { %v1307_v20 = vpop.xlane.xlu0 %1306 }
 0x7e1   :  { %13040 = vrcp.f32 %v1307_v20 }
 0x7e4   :  { %v1392_v21 = vpop.permute.xlu0 %1391 }
 0x7e5   :  { %12188 = vmatpush3.msra.mxu1 %v1392_v21 }
 0x7e6   :  { %12197 = vmatprep.subr.mxu1 %v13239_v42 }
 0x7ee   :  { %v13041_v23 = vpop.eup %13040 }
 0x7ef   :  { %v1313_v25 = vmul.f32 %v13041_v23, %v13037_v13  ;;  %v1926_v13 = vld [vmem:[%s15210_s1 + $0x2b8] sm:$0xff] }
 0x7f1   :  { %12185 = vmatmul.mubr.msk.f32.vlgmr.msra.gmra.mxu0 %vm480_vm3, %v1313_v25 }
 0x7f2   :  { %12193 = vmatpush3.xpose.msk.msra.mxu0 %vm480_vm3, %v1470_v26  ;;  %12194 = vmatprep.mubr.msk.f32.mxu0 %vm13240_vm2, %v13239_v42 }
 0x7f3   :  { %12202 = vmatprep.subr.mxu0 %v13239_v42 }
 0x81d   :  { %v1310_v27 = vpop.xlane.xlu0 %1309 }
 0x81e   :  { %13042 = vrcp.f32 %v1310_v27 }
 0x821   :  { %v1468_v52 = vpop.permute.xlu0 %1467 }
 0x822   :  { %12195 = vmatmul.mubr.msk.f32.vlgmr.msra.gmra.mxu0 %vm480_vm3, %v1468_v52 }
 0x823   :  { %12204 = vmatprep.mubr.msk.f32.mxu0 %vm13240_vm2, %v13239_v42 }
 0x82b   :  { %v13043_v28 = vpop.eup %13042 }
 0x82c   :  { %v1314_v30 = vmul.f32 %v13043_v28, %v13039_v54 }
 0x82e   :  { %12190 = vmatmul.mubr.msk.f32.vlgmr.msra.gmra.mxu1 %vm480_vm3, %v1314_v30 }
 0x82f   :  { %12198 = vmatpush3.xpose.msk.msra.mxu1 %vm480_vm3, %v1548_v29  ;;  %12199 = vmatprep.mubr.msk.f32.mxu1 %vm13240_vm2, %v13239_v42 }
 0x830   :  { %12207 = vmatprep.subr.mxu1 %v13239_v42 }
 0x832   :  { %12200 = vmatmul.mubr.msk.f32.vlgmr.msra.gmra.mxu1 %vm480_vm3, %v1546_v31  ;;  %v1923_v31 = vld [vmem:[%s15210_s1 + $0x2a0] sm:$0xff] }
 0x833   :  { %12209 = vmatprep.mubr.msk.f32.mxu1 %vm13240_vm2, %v13239_v42 }
 0x8b1   :  { %v1387_v32 = vpop.f32.mrf.mxu0 }
 0x8b3   :  { %v12186_v35 = vpop.f32.mrf.mxu0 }
 0x8b4   :  { %v1921_v35 = vld [vmem:[%s15210_s1 + $0x290] sm:$0xff] }
 0x8e2   :  { %v1541_v36 = vpop.f32.mrf.mxu0 }
 0x8e3   :  { %v1623_v38 = vsel %vm480_vm3, %v1541_v36, -inf }
 0x8e4   :  { %1624 = vmax.xlane.f32.xlu0 %v1623_v38  ;;  %v12196_v45 = vpop.f32.mrf.mxu0  ;;  %v1919_v38 = vld [vmem:[%s15210_s1 + $0x280] sm:$0xff] }
 0x8ee   :  { %v1463_v46 = vpop.f32.mrf.mxu1 }
 0x8f0   :  { %v12191_v47 = vpop.f32.mrf.mxu1 }
 0x8f1   :  { %v1927_v47 = vld [vmem:[%s15210_s1 + $0x2c0] sm:$0xff] }
 0x8f2   :  { %v1619_v48 = vpop.f32.mrf.mxu1 }
 0x8f3   :  { %v1626_v49 = vsel %vm480_vm3, %v1619_v48, -inf }
 0x8f4   :  { %1627 = vmax.xlane.f32.xlu1 %v1626_v49  ;;  %v12201_v50 = vpop.f32.mrf.mxu1 }
 0x8f5   :  { %v11418_v50 = vld [vmem:[%s15212_s2 + $0x13] ss:$0 sm:$0xff] }
 0x905   :  { %1645 = vrot.lane.b32.xlu1 %v13412_v51, %s13246_s4 }
 0x909   :  { %1799 = vrot.lane.b32.xlu1 %v13506_v0, %s13247_s5 }
 0x90d   :  { %1801 = vrot.lane.b32.xlu1 %v13509_v5, %s13247_s5 }
 0x911   :  { %1809 = vrot.lane.b32.xlu1 %v1463_v46, %s13248_s0  ;;  %v1928_v46 = vld [vmem:[%s15210_s1 + $0x2c8] sm:$0xff] }
 0x96d   :  { %v1625_v55 = vpop.xlane.xlu0 %1624 }
 0x96e   :  { %v1629_v56 = vsub.f32 %v1541_v36, %v1625_v55  ;;  %v1920_v36 = vld [vmem:[%s15210_s1 + $0x288] sm:$0xff] }
 0x970   :  { %v1631_v57 = vmul.f32 1.442695, %v1629_v56 }
 0x972   :  { %13044 = vpow2.f32 %v1631_v57 }
 0x97d   :  { %v1628_v58 = vpop.xlane.xlu1 %1627 }
 0x97e   :  { %v1630_v59 = vsub.f32 %v1619_v48, %v1628_v58  ;;  %v2105_v48 = vld [vmem:[%s15210_s1 + $0x2f8] sm:$0xff]  ;;  %v2104_v58 = vld [vmem:[%s15210_s1 + $0x2f0] sm:$0xff] }
 0x97f   :  { %v13045_v60 = vpop.eup %13044 }
 0x980   :  { %v1633_v61 = vmul.f32 1.442695, %v1630_v59  ;;  %v1635_v51 = vsel %vm480_vm3, %v13045_v60, 0.0  ;;  %v2103_v59 = vld [vmem:[%s15210_s1 + $0x2e8] sm:$0xff] }
 0x981   :  { %1636 = vadd.xlane.f32.xlu0 %v1635_v51  ;;  %v1646_v62 = vpop.permute.xlu1 %1645  ;;  %v2192_v51 = vld [vmem:[%s15210_s1 + $0x330] sm:$0xff] }
 0x982   :  { %13046 = vpow2.f32 %v1633_v61  ;;  %12203 = vmatpush3.msra.mxu0 %v1646_v62  ;;  %v2193_v61 = vld [vmem:[%s15210_s1 + $0x338] sm:$0xff]  ;;  %v2191_v62 = vld [vmem:[%s15210_s1 + $0x328] sm:$0xff] }
 0x985   :  { %v1800_v18 = vpop.permute.xlu1 %1799 }
 0x986   :  { %v1821_v19 = vsel %vm480_vm3, %v13469_v22, %v1800_v18  ;;  %v1925_v22 = vld [vmem:[%s15210_s1 + $0x2b0] sm:$0xff] }
 0x987   :  { %v11426_v18 = vld [vmem:[%s15212_s2 + $0x15] ss:$0 sm:$0xff] }
 0x989   :  { %v1802_v25 = vpop.permute.xlu1 %1801 }
 0x98a   :  { %v1822_v27 = vsel %vm480_vm3, %v13471_v24, %v1802_v25  ;;  %v1924_v24 = vld [vmem:[%s15210_s1 + $0x2a8] sm:$0xff] }
 0x98d   :  { %v1810_v26 = vpop.permute.xlu1 %1809 }
 0x98e   :  { %v1825_v52 = vsel %vm1823_vm5, %v1822_v27, %v1810_v26 }
 0x98f   :  { %v13047_v63 = vpop.eup %13046 }
 0x990   :  { %v1638_v0 = vsel %vm480_vm3, %v13047_v63, 0.0 }
 0x991   :  { %1639 = vadd.xlane.f32.xlu0 %v1638_v0  ;;  %v2189_v0 = vld [vmem:[%s15210_s1 + $0x318] sm:$0xff] }
 0x9a7   :  { %1721 = vrot.lane.b32.xlu0 %v13419_v53, %s13246_s4  ;;  %v1832_v53 = vld [vmem:[%s15210_s1 + $0x278] sm:$0xff] }
 0x9a8   :  { %12212 = vmatprep.subr.mxu0 %v1832_v53 }
 0x9ab   :  { %1807 = vrot.lane.b32.xlu0 %v1387_v32, %s13248_s0  ;;  %v1922_v32 = vld [vmem:[%s15210_s1 + $0x298] sm:$0xff] }
 0xa0a   :  { %v1637_v1 = vpop.xlane.xlu0 %1636 }
 0xa0b   :  { %13048 = vrcp.f32 %v1637_v1  ;;  %v2188_v1 = vld [vmem:[%s15210_s1 + $0x310] sm:$0xff] }
 0xa18   :  { %v13049_v2 = vpop.eup %13048 }
 0xa19   :  { %v1643_v3 = vmul.f32 %v13049_v2, %v13045_v60  ;;  %v2102_v60 = vld [vmem:[%s15210_s1 + $0x2e0] sm:$0xff]  ;;  %v2187_v2 = vld [vmem:[%s15210_s1 + $0x308] sm:$0xff] }
 0xa1a   :  { %v1640_v4 = vpop.xlane.xlu0 %1639 }
 0xa1b   :  { %13050 = vrcp.f32 %v1640_v4  ;;  %12205 = vmatmul.mubr.msk.f32.vlgmr.msra.gmra.mxu0 %vm480_vm3, %v1643_v3  ;;  %v2186_v3 = vld [vmem:[%s15210_s1 + $0x300] sm:$0xff] }
 0xa1c   :  { %12213 = vmatpush3.msra.mxu0 %v1832_v53 }
 0xa1d   :  { %12214 = vmatprep.subr.mxu0 %v1831_v8 }
 0xa1e   :  { %v1722_v5 = vpop.permute.xlu0 %1721  ;;  %12215 = vmatpush3.msra.mxu0 %v1831_v8  ;;  %v11425_v8 = vld [vmem:[%s15212_s2 + $0x14] ss:$0 sm:$0xff] }
 0xa1f   :  { %12208 = vmatpush3.msra.mxu1 %v1722_v5  ;;  %12216 = vmatprep.subr.mxu0 %v1830_v9 }
 0xa20   :  { %12217 = vmatpush3.msra.mxu0 %v1830_v9  ;;  %12223 = vmatprep.subr.mxu1 %v1930_v16 }
 0xa21   :  { %12218 = vmatprep.subr.mxu0 %v1829_v10 }
 0xa22   :  { %12219 = vmatpush3.msra.mxu0 %v1829_v10  ;;  %v1808_v54 = vpop.permute.xlu0 %1807 }
 0xa23   :  { %12234 = vmatprep.subr.mxu0 %v1926_v13  ;;  %v1824_v20 = vsel %vm1823_vm5, %v1821_v19, %v1808_v54 }
 0xa28   :  { %v13051_v6 = vpop.eup %13050 }
 0xa29   :  { %v1644_v7 = vmul.f32 %v13051_v6, %v13047_v63  ;;  %v2190_v63 = vld [vmem:[%s15210_s1 + $0x320] sm:$0xff] }
 0xa2b   :  { %12210 = vmatmul.mubr.msk.f32.vlgmr.msra.gmra.mxu1 %vm480_vm3, %v1644_v7 }
 0xa2c   :  { %12224 = vmatpush3.msra.mxu1 %v1930_v16 }
 0xa2d   :  { %12225 = vmatprep.subr.mxu1 %v1929_v17 }
 0xa2e   :  { %12226 = vmatpush3.msra.mxu1 %v1929_v17 }
 0xa2f   :  { %12227 = vmatprep.subr.mxu1 %v1928_v46 }
 0xa30   :  { %12228 = vmatpush3.msra.mxu1 %v1928_v46 }
 0xa31   :  { %12229 = vmatprep.subr.mxu1 %v1927_v47 }
 0xa32   :  { %12230 = vmatpush3.msra.mxu1 %v1927_v47 }
 0xa33   :  { %12253 = vmatprep.subr.mxu1 %v2105_v48 }
 0xadb   :  { %v1717_v11 = vpop.f32.mrf.mxu0 }
 0xadc   :  { %1815 = vrot.lane.b32.xlu0 %v1717_v11, %s13249_s14 }
 0xadd   :  { %v12206_v12 = vpop.f32.mrf.mxu0 }
 0xae0   :  { %2012 = vrot.lane.b32.xlu0 %v13382_v39, %s13238_s19 }
 0xaeb   :  { %v1793_v14 = vpop.f32.mrf.mxu1 }
 0xaec   :  { %1817 = vrot.lane.b32.xlu1 %v1793_v14, %s13249_s14 }
 0xaed   :  { %v12211_v15 = vpop.f32.mrf.mxu1 }
 0xaee   :  { %v11429_v15 = vld [vmem:[%s15212_s2 + $0x16] ss:$0 sm:$0xff] }
 0xaf0   :  { %2014 = vrot.lane.b32.xlu1 %v13380_v37, %s13238_s19 }
 0xb4e   :  { %v1816_v21 = vpop.permute.xlu0 %1815 }
 0xb4f   :  { %v1827_v23 = vsel %vm1826_vm4, %v1824_v20, %v1816_v21 }
 0xb50   :  { %12220 = vmatprep.mubr.msk.f32.mxu0 %vm29_vm0, %v1827_v23 }
 0xb52   :  { %v13599_v30 = vpop.permute.xlu0 %2012 }
 0xb5e   :  { %v1818_v28 = vpop.permute.xlu1 %1817 }
 0xb5f   :  { %v1828_v29 = vsel %vm1826_vm4, %v1825_v52, %v1818_v28 }
 0xb60   :  { %12221 = vmatmul.mubr.msk.f32.vlgmr.msra.gmra.mxu0 %vm29_vm0, %v1828_v29 }
 0xb61   :  { %12235 = vmatpush3.msra.mxu0 %v1926_v13  ;;  %12250 = vmatprep.mubr.msk.f32.mxu0 %vm400_vm1, %v13599_v30 }
 0xb62   :  { %12236 = vmatprep.subr.mxu0 %v1925_v22  ;;  %v13622_v45 = vpop.permute.xlu1 %2014 }
 0xb63   :  { %12237 = vmatpush3.msra.mxu0 %v1925_v22 }
 0xb64   :  { %12238 = vmatprep.subr.mxu0 %v1924_v24 }
 0xb65   :  { %12239 = vmatpush3.msra.mxu0 %v1924_v24 }
 0xb66   :  { %12240 = vmatprep.subr.mxu0 %v1923_v31 }
 0xb67   :  { %12241 = vmatpush3.msra.mxu0 %v1923_v31 }
 0xb68   :  { %12242 = vmatprep.subr.mxu0 %v1922_v32 }
 0xb69   :  { %12243 = vmatpush3.msra.mxu0 %v1922_v32 }
 0xb6a   :  { %12244 = vmatprep.subr.mxu0 %v1921_v35 }
 0xb6b   :  { %12245 = vmatpush3.msra.mxu0 %v1921_v35 }
 0xb6c   :  { %12246 = vmatprep.subr.mxu0 %v1920_v36 }
 0xb6d   :  { %12247 = vmatpush3.msra.mxu0 %v1920_v36 }
 0xb6e   :  { %12248 = vmatprep.subr.mxu0 %v1919_v38 }
 0xb6f   :  { %12249 = vmatpush3.msra.mxu0 %v1919_v38 }
 0xb70   :  { %12251 = vmatmul.mubr.msk.f32.vlgmr.msra.gmra.mxu0 %vm400_vm1, %v13622_v45  ;;  %12283 = vmatprep.subr.mxu0 %v13239_v42 }
 0xb71   :  { %12285 = vmatprep.mubr.msk.f32.mxu0 %vm13240_vm2, %v13239_v42 }
 0xc20   :  { %v12222_v49 = vpop.f32.mrf.mxu0 }
 0xc21   :  { %v1916_v57 = vadd.f32 %v12222_v49, %v11418_v50 }
 0xc22   :  { %v1910_v55 = vpop.f32.mrf.mxu0 }
 0xc23   :  { %v1911_v56 = vadd.f32 %v11418_v50, %v1910_v55 }
 0xc25   :  { %12231 = vmatprep.mubr.msk.f32.mxu1 %vm29_vm0, %v1911_v56 }
 0xc26   :  { %12232 = vmatmul.mubr.msk.f32.vlgmr.msra.gmra.mxu1 %vm29_vm0, %v1916_v57 }
 0xc27   :  { %12254 = vmatpush3.msra.mxu1 %v2105_v48  ;;  %12261 = vmatprep.mubr.msk.f32.mxu1 %vm29_vm0, %v13382_v39 }
 0xc28   :  { %12255 = vmatprep.subr.mxu1 %v2104_v58 }
 0xc29   :  { %12256 = vmatpush3.msra.mxu1 %v2104_v58 }
 0xc2a   :  { %12257 = vmatprep.subr.mxu1 %v2103_v59 }
 0xc2b   :  { %12258 = vmatpush3.msra.mxu1 %v2103_v59 }
 0xc2c   :  { %12259 = vmatprep.subr.mxu1 %v2102_v60 }
 0xc2d   :  { %12260 = vmatpush3.msra.mxu1 %v2102_v60 }
 0xc2e   :  { %12262 = vmatmul.mubr.msk.f32.vlgmr.msra.gmra.mxu1 %vm29_vm0, %v13380_v37  ;;  %12264 = vmatprep.subr.mxu1 %v2193_v61 }
 0xc2f   :  { %12265 = vmatpush3.msra.mxu1 %v2193_v61 }
 0xc30   :  { %12266 = vmatprep.subr.mxu1 %v2192_v51  ;;  %v12252_v4 = vpop.f32.mrf.mxu0 }
 0xc31   :  { %12267 = vmatpush3.msra.mxu1 %v2192_v51 }
 0xc32   :  { %12268 = vmatprep.subr.mxu1 %v2191_v62  ;;  %v2086_v6 = vpop.f32.mrf.mxu0 }
 0xc33   :  { %12269 = vmatpush3.msra.mxu1 %v2191_v62 }
 0xc34   :  { %12270 = vmatprep.subr.mxu1 %v2190_v63 }
 0xc35   :  { %12271 = vmatpush3.msra.mxu1 %v2190_v63 }
 0xc36   :  { %12272 = vmatprep.subr.mxu1 %v2189_v0 }
 0xc37   :  { %12273 = vmatpush3.msra.mxu1 %v2189_v0 }
 0xc38   :  { %12274 = vmatprep.subr.mxu1 %v2188_v1 }
 0xc39   :  { %12275 = vmatpush3.msra.mxu1 %v2188_v1 }
 0xc3a   :  { %12276 = vmatprep.subr.mxu1 %v2187_v2 }
 0xc3b   :  { %12277 = vmatpush3.msra.mxu1 %v2187_v2 }
 0xc3c   :  { %12278 = vmatprep.subr.mxu1 %v2186_v3 }
 0xc3d   :  { %12279 = vmatpush3.msra.mxu1 %v2186_v3 }
 0xc3e   :  { %12298 = vmatprep.subr.mxu1 %v13239_v42 }
 0xce6   :  { %v12233_v5 = vpop.f32.mrf.mxu1 }
 0xce7   :  { %v2092_v7 = vadd.f32 %v12252_v4, %v12233_v5 }
 0xce8   :  { %v2003_v53 = vpop.f32.mrf.mxu1 }
 0xce9   :  { %v2087_v9 = vadd.f32 %v2086_v6, %v2003_v53  ;;  %v13686_v11 = vadd.f32 %v11425_v8, %v2092_v7 }
 0xceb   :  { %v13684_v10 = vadd.f32 %v11425_v8, %v2087_v9 }
 0xced   :  { %12280 = vmatprep.mubr.msk.f32.mxu1 %vm400_vm1, %v13684_v10 }
 0xcee   :  { %12281 = vmatmul.mubr.msk.f32.vlgmr.msra.gmra.mxu1 %vm400_vm1, %v13686_v11  ;;  %v12263_v12 = vpop.f32.mrf.mxu1 }
 0xcef   :  { %12300 = vmatprep.mubr.msk.f32.mxu1 %vm13240_vm2, %v13239_v42  ;;  %v13715_v20 = vadd.f32 %v12263_v12, %v11426_v18 }
 0xcf0   :  { %v2177_v13 = vpop.f32.mrf.mxu1 }
 0xcf1   :  { %v13704_v54 = vadd.f32 %v11426_v18, %v2177_v13 }
 0xdae   :  { %v12282_v14 = vpop.f32.mrf.mxu1 }
 0xdaf   :  { %v13707_v19 = vadd.f32 %v12282_v14, %v11429_v15 }
 0xdb0   :  { %v2271_v16 = vpop.f32.mrf.mxu1 }
 0xdb1   :  { %v13697_v17 = vadd.f32 %v11429_v15, %v2271_v16 }
 0xdb3   :  { %12284 = vmatpush3.xpose.msk.msra.mxu0 %vm480_vm3, %v13697_v17 }
 0xdb4   :  { %12288 = vmatprep.subr.mxu0 %v13239_v42 }
 0xdb6   :  { %12286 = vmatmul.mubr.msk.f32.vlgmr.msra.gmra.mxu0 %vm480_vm3, %v13704_v54 }
 0xdb7   :  { %12289 = vmatpush3.xpose.msk.msra.mxu0 %vm480_vm3, %v13707_v19  ;;  %12290 = vmatprep.mubr.msk.f32.mxu0 %vm13240_vm2, %v13239_v42 }
 0xdb8   :  { %12293 = vmatprep.subr.mxu0 %v13239_v42 }
 0xdba   :  { %12291 = vmatmul.mubr.msk.f32.vlgmr.msra.gmra.mxu0 %vm480_vm3, %v13715_v20 }
 0xdbb   :  { %12295 = vmatprep.mubr.msk.f32.mxu0 %vm13240_vm2, %v13239_v42 }
 0xe76   :  { %v2352_v21 = vpop.f32.mrf.mxu0 }
 0xe77   :  { %v2432_v23 = vsel %vm480_vm3, %v2352_v21, -inf }
 0xe78   :  { %2433 = vmax.xlane.f32.xlu0 %v2432_v23  ;;  %v12287_v25 = vpop.f32.mrf.mxu0 }
 0xe7a   :  { %v2428_v26 = vpop.f32.mrf.mxu0 }
 0xe7b   :  { %v2435_v27 = vsel %vm480_vm3, %v2428_v26, -inf }
 0xe7c   :  { %2436 = vmax.xlane.f32.xlu1 %v2435_v27  ;;  %v12292_v52 = vpop.f32.mrf.mxu0 }
 0xe8d   :  { %2454 = vrot.lane.b32.xlu1 %v13697_v17, %s13238_s19 }
 0xe8e   :  { %2530 = vrot.lane.b32.xlu0 %v13707_v19, %s13238_s19 }
 0xe91   :  { %2608 = vrot.lane.b32.xlu1 %v13697_v17, %s13241_s26 }
 0xe95   :  { %2686 = vrot.lane.b32.xlu1 %v13707_v19, %s13241_s26 }
 0xe99   :  { %2684 = vrot.lane.b32.xlu1 %v13715_v20, %s13241_s26 }
 0xf01   :  { %v2434_v28 = vpop.xlane.xlu0 %2433 }
 0xf02   :  { %v2438_v29 = vsub.f32 %v2352_v21, %v2434_v28 }
 0xf04   :  { %v2440_v22 = vmul.f32 1.442695, %v2438_v29 }
 0xf05   :  { %v2531_v24 = vpop.permute.xlu0 %2530  ;;  %v2437_v31 = vpop.xlane.xlu1 %2436 }
 0xf06   :  { %13052 = vpow2.f32 %v2440_v22  ;;  %v2439_v32 = vsub.f32 %v2428_v26, %v2437_v31  ;;  %12299 = vmatpush3.msra.mxu1 %v2531_v24 }
 0xf07   :  { %12308 = vmatprep.subr.mxu1 %v13239_v42 }
 0xf08   :  { %v2442_v35 = vmul.f32 1.442695, %v2439_v32 }
 0xf09   :  { %v2455_v36 = vpop.permute.xlu1 %2454 }
 0xf0a   :  { %13054 = vpow2.f32 %v2442_v35  ;;  %12294 = vmatpush3.msra.mxu0 %v2455_v36 }
 0xf0b   :  { %12303 = vmatprep.subr.mxu0 %v13239_v42 }
 0xf0d   :  { %v2609_v55 = vpop.permute.xlu1 %2608 }
 0xf11   :  { %v2687_v59 = vpop.permute.xlu1 %2686 }
 0xf13   :  { %v13053_v38 = vpop.eup %13052 }
 0xf14   :  { %v2444_v46 = vsel %vm480_vm3, %v13053_v38, 0.0 }
 0xf15   :  { %2445 = vadd.xlane.f32.xlu0 %v2444_v46  ;;  %v2685_v51 = vpop.permute.xlu1 %2684 }
 0xf17   :  { %v13055_v47 = vpop.eup %13054 }
 0xf18   :  { %v2447_v48 = vsel %vm480_vm3, %v13055_v47, 0.0 }
 0xf19   :  { %2448 = vadd.xlane.f32.xlu0 %v2447_v48 }
 0xf2f   :  { %2606 = vrot.lane.b32.xlu0 %v13704_v54, %s13241_s26 }
 0xf9e   :  { %v2446_v49 = vpop.xlane.xlu0 %2445 }
 0xf9f   :  { %13056 = vrcp.f32 %v2446_v49 }
 0xfa2   :  { %v2449_v50 = vpop.xlane.xlu0 %2448 }
 0xfa3   :  { %13058 = vrcp.f32 %v2449_v50 }
 0xfa6   :  { %v2607_v61 = vpop.permute.xlu0 %2606 }
 0xfac   :  { %v13057_v56 = vpop.eup %13056 }
 0xfad   :  { %v2452_v57 = vmul.f32 %v13057_v56, %v13053_v38 }
 0xfaf   :  { %12296 = vmatmul.mubr.msk.f32.vlgmr.msra.gmra.mxu0 %vm480_vm3, %v2452_v57 }
 0xfb0   :  { %v13059_v58 = vpop.eup %13058  ;;  %12304 = vmatpush3.xpose.msk.msra.mxu0 %vm480_vm3, %v2609_v55  ;;  %12305 = vmatprep.mubr.msk.f32.mxu0 %vm13240_vm2, %v13239_v42 }
 0xfb1   :  { %v2453_v60 = vmul.f32 %v13059_v58, %v13055_v47  ;;  %12313 = vmatprep.subr.mxu0 %v13239_v42 }
 0xfb3   :  { %12301 = vmatmul.mubr.msk.f32.vlgmr.msra.gmra.mxu1 %vm480_vm3, %v2453_v60  ;;  %12306 = vmatmul.mubr.msk.f32.vlgmr.msra.gmra.mxu0 %vm480_vm3, %v2607_v61 }
 0xfb4   :  { %12309 = vmatpush3.xpose.msk.msra.mxu1 %vm480_vm3, %v2687_v59  ;;  %12310 = vmatprep.mubr.msk.f32.mxu1 %vm13240_vm2, %v13239_v42 }
 0xfb5   :  { %12318 = vmatprep.subr.mxu1 %v13239_v42  ;;  %12315 = vmatprep.mubr.msk.f32.mxu0 %vm13240_vm2, %v13239_v42 }
 0xfb7   :  { %12311 = vmatmul.mubr.msk.f32.vlgmr.msra.gmra.mxu1 %vm480_vm3, %v2685_v51 }
 0xfb8   :  { %12320 = vmatprep.mubr.msk.f32.mxu1 %vm13240_vm2, %v13239_v42 }
0x106f   :  { %v13756_v62 = vpop.f32.mrf.mxu0 }
0x1071   :  { %v12297_v63 = vpop.f32.mrf.mxu0 }
0x1073   :  { %v13758_v0 = vpop.f32.mrf.mxu1  ;;  %v2680_v1 = vpop.f32.mrf.mxu0 }
0x1074   :  { %v2762_v2 = vsel %vm480_vm3, %v2680_v1, -inf }
0x1075   :  { %v12302_v3 = vpop.f32.mrf.mxu1  ;;  %2763 = vmax.xlane.f32.xlu0 %v2762_v2  ;;  %v12307_v4 = vpop.f32.mrf.mxu0 }
0x1077   :  { %v2758_v5 = vpop.f32.mrf.mxu1 }
0x1078   :  { %v2765_v6 = vsel %vm480_vm3, %v2758_v5, -inf }
0x1079   :  { %2766 = vmax.xlane.f32.xlu1 %v2765_v6  ;;  %v12312_v7 = vpop.f32.mrf.mxu1 }
0x108a   :  { %2784 = vrot.lane.b32.xlu1 %v13697_v17, %s13242_s27 }
0x108b   :  { %2860 = vrot.lane.b32.xlu0 %v13707_v19, %s13242_s27 }
0x108e   :  { %2938 = vrot.lane.b32.xlu1 %v13697_v17, %s13243_s28 }
0x1092   :  { %3016 = vrot.lane.b32.xlu1 %v13707_v19, %s13243_s28 }
0x1096   :  { %3014 = vrot.lane.b32.xlu1 %v13715_v20, %s13243_s28 }
0x10fe   :  { %v2764_v53 = vpop.xlane.xlu0 %2763 }
0x10ff   :  { %v2768_v8 = vsub.f32 %v2680_v1, %v2764_v53 }
0x1101   :  { %v2770_v9 = vmul.f32 1.442695, %v2768_v8 }
0x1102   :  { %v2767_v12 = vpop.xlane.xlu1 %2766  ;;  %v2861_v13 = vpop.permute.xlu0 %2860 }
0x1103   :  { %13060 = vpow2.f32 %v2770_v9  ;;  %v2769_v14 = vsub.f32 %v2758_v5, %v2767_v12  ;;  %12319 = vmatpush3.msra.mxu1 %v2861_v13 }
0x1104   :  { %12328 = vmatprep.subr.mxu1 %v13239_v42 }
0x1105   :  { %v2772_v15 = vmul.f32 1.442695, %v2769_v14 }
0x1106   :  { %v2785_v16 = vpop.permute.xlu1 %2784 }
0x1107   :  { %13062 = vpow2.f32 %v2772_v15  ;;  %12314 = vmatpush3.msra.mxu0 %v2785_v16 }
0x1108   :  { %12323 = vmatprep.subr.mxu0 %v13239_v42 }
0x110a   :  { %v2939_v52 = vpop.permute.xlu1 %2938 }
0x110e   :  { %v3017_v24 = vpop.permute.xlu1 %3016 }
0x1110   :  { %v13061_v18 = vpop.eup %13060 }
0x1111   :  { %v2774_v21 = vsel %vm480_vm3, %v13061_v18, 0.0 }
0x1112   :  { %2775 = vadd.xlane.f32.xlu0 %v2774_v21  ;;  %v3015_v35 = vpop.permute.xlu1 %3014 }
0x1114   :  { %v13063_v23 = vpop.eup %13062 }
0x1115   :  { %v2777_v25 = vsel %vm480_vm3, %v13063_v23, 0.0 }
0x1116   :  { %2778 = vadd.xlane.f32.xlu0 %v2777_v25 }
0x112c   :  { %2936 = vrot.lane.b32.xlu0 %v13704_v54, %s13243_s28 }
0x119b   :  { %v2776_v26 = vpop.xlane.xlu0 %2775 }
0x119c   :  { %13064 = vrcp.f32 %v2776_v26 }
0x119f   :  { %v2779_v27 = vpop.xlane.xlu0 %2778 }
0x11a0   :  { %13066 = vrcp.f32 %v2779_v27 }
0x11a3   :  { %v2937_v32 = vpop.permute.xlu0 %2936 }
0x11a9   :  { %v13065_v28 = vpop.eup %13064 }
0x11aa   :  { %v2782_v29 = vmul.f32 %v13065_v28, %v13061_v18 }
0x11ac   :  { %12316 = vmatmul.mubr.msk.f32.vlgmr.msra.gmra.mxu0 %vm480_vm3, %v2782_v29 }
0x11ad   :  { %v13067_v22 = vpop.eup %13066  ;;  %12324 = vmatpush3.xpose.msk.msra.mxu0 %vm480_vm3, %v2939_v52  ;;  %12325 = vmatprep.mubr.msk.f32.mxu0 %vm13240_vm2, %v13239_v42 }
0x11ae   :  { %v2783_v31 = vmul.f32 %v13067_v22, %v13063_v23  ;;  %12333 = vmatprep.subr.mxu0 %v13239_v42 }
0x11b0   :  { %12321 = vmatmul.mubr.msk.f32.vlgmr.msra.gmra.mxu1 %vm480_vm3, %v2783_v31  ;;  %12326 = vmatmul.mubr.msk.f32.vlgmr.msra.gmra.mxu0 %vm480_vm3, %v2937_v32 }
0x11b1   :  { %12329 = vmatpush3.xpose.msk.msra.mxu1 %vm480_vm3, %v3017_v24  ;;  %12330 = vmatprep.mubr.msk.f32.mxu1 %vm13240_vm2, %v13239_v42 }
0x11b2   :  { %12338 = vmatprep.subr.mxu1 %v13239_v42  ;;  %12335 = vmatprep.mubr.msk.f32.mxu0 %vm13240_vm2, %v13239_v42 }
0x11b4   :  { %12331 = vmatmul.mubr.msk.f32.vlgmr.msra.gmra.mxu1 %vm480_vm3, %v3015_v35 }
0x11b5   :  { %12340 = vmatprep.mubr.msk.f32.mxu1 %vm13240_vm2, %v13239_v42 }
0x126c   :  { %v13794_v36 = vpop.f32.mrf.mxu0 }
0x126e   :  { %v12317_v38 = vpop.f32.mrf.mxu0 }
0x1270   :  { %v13796_v46 = vpop.f32.mrf.mxu1  ;;  %v3010_v47 = vpop.f32.mrf.mxu0 }
0x1271   :  { %v3092_v48 = vsel %vm480_vm3, %v3010_v47, -inf }
0x1272   :  { %v12322_v49 = vpop.f32.mrf.mxu1  ;;  %3093 = vmax.xlane.f32.xlu0 %v3092_v48  ;;  %v12327_v50 = vpop.f32.mrf.mxu0 }
0x1274   :  { %v3088_v55 = vpop.f32.mrf.mxu1 }
0x1275   :  { %v3095_v56 = vsel %vm480_vm3, %v3088_v55, -inf }
0x1276   :  { %3096 = vmax.xlane.f32.xlu1 %v3095_v56  ;;  %v12332_v57 = vpop.f32.mrf.mxu1 }
0x1287   :  { %3114 = vrot.lane.b32.xlu1 %v13697_v17, %s13244_s29 }
0x1288   :  { %3190 = vrot.lane.b32.xlu0 %v13707_v19, %s13244_s29 }
0x128b   :  { %3268 = vrot.lane.b32.xlu1 %v13697_v17, %s13245_s30 }
0x128f   :  { %3346 = vrot.lane.b32.xlu1 %v13707_v19, %s13245_s30 }
0x1293   :  { %3344 = vrot.lane.b32.xlu1 %v13715_v20, %s13245_s30 }
0x12fb   :  { %v3094_v58 = vpop.xlane.xlu0 %3093 }
0x12fc   :  { %v3098_v59 = vsub.f32 %v3010_v47, %v3094_v58 }
0x12fe   :  { %v3100_v60 = vmul.f32 1.442695, %v3098_v59 }
0x12ff   :  { %v3097_v61 = vpop.xlane.xlu1 %3096  ;;  %v3191_v51 = vpop.permute.xlu0 %3190 }
0x1300   :  { %13068 = vpow2.f32 %v3100_v60  ;;  %v3099_v63 = vsub.f32 %v3088_v55, %v3097_v61  ;;  %12339 = vmatpush3.msra.mxu1 %v3191_v51  ;;  %v3628_v60 = vld [vmem:[%s15210_s1 + $0x350] sm:$0xff]  ;;  %v3627_v61 = vld [vmem:[%s15210_s1 + $0x348] sm:$0xff]  ;;  %v3626_v51 = vld [vmem:[%s15210_s1 + $0x340] sm:$0xff] }
0x1301   :  { %12348 = vmatprep.subr.mxu1 %v13239_v42 }
0x1302   :  { %v3102_v1 = vmul.f32 1.442695, %v3099_v63 }
0x1303   :  { %v3115_v2 = vpop.permute.xlu1 %3114 }
0x1304   :  { %13070 = vpow2.f32 %v3102_v1  ;;  %12334 = vmatpush3.msra.mxu0 %v3115_v2 }
0x1305   :  { %12343 = vmatprep.subr.mxu0 %v13239_v42 }
0x1307   :  { %v3269_v53 = vpop.permute.xlu1 %3268 }
0x130b   :  { %v3347_v13 = vpop.permute.xlu1 %3346 }
0x130d   :  { %v13069_v3 = vpop.eup %13068 }
0x130e   :  { %v3104_v4 = vsel %vm480_vm3, %v13069_v3, 0.0 }
0x130f   :  { %3105 = vadd.xlane.f32.xlu0 %v3104_v4  ;;  %v3345_v15 = vpop.permute.xlu1 %3344 }
0x1311   :  { %v13071_v20 = vpop.eup %13070 }
0x1312   :  { %v3107_v5 = vsel %vm480_vm3, %v13071_v20, 0.0 }
0x1313   :  { %3108 = vadd.xlane.f32.xlu0 %v3107_v5 }
0x1329   :  { %3266 = vrot.lane.b32.xlu0 %v13704_v54, %s13245_s30 }
0x1398   :  { %v3106_v6 = vpop.xlane.xlu0 %3105 }
0x1399   :  { %13072 = vrcp.f32 %v3106_v6 }
0x139c   :  { %v3109_v7 = vpop.xlane.xlu0 %3108 }
0x139d   :  { %13074 = vrcp.f32 %v3109_v7 }
0x13a0   :  { %v3267_v54 = vpop.permute.xlu0 %3266 }
0x13a6   :  { %v13073_v8 = vpop.eup %13072 }
0x13a7   :  { %v3112_v9 = vmul.f32 %v13073_v8, %v13069_v3 }
0x13a9   :  { %12336 = vmatmul.mubr.msk.f32.vlgmr.msra.gmra.mxu0 %vm480_vm3, %v3112_v9 }
0x13aa   :  { %v13075_v12 = vpop.eup %13074  ;;  %12344 = vmatpush3.xpose.msk.msra.mxu0 %vm480_vm3, %v3269_v53  ;;  %12345 = vmatprep.mubr.msk.f32.mxu0 %vm13240_vm2, %v13239_v42 }
0x13ab   :  { %v3113_v14 = vmul.f32 %v13075_v12, %v13071_v20  ;;  %12353 = vmatprep.subr.mxu0 %v13239_v42 }
0x13ad   :  { %12341 = vmatmul.mubr.msk.f32.vlgmr.msra.gmra.mxu1 %vm480_vm3, %v3113_v14  ;;  %12346 = vmatmul.mubr.msk.f32.vlgmr.msra.gmra.mxu0 %vm480_vm3, %v3267_v54 }
0x13ae   :  { %12349 = vmatpush3.xpose.msk.msra.mxu1 %vm480_vm3, %v3347_v13  ;;  %12350 = vmatprep.mubr.msk.f32.mxu1 %vm13240_vm2, %v13239_v42 }
0x13af   :  { %12358 = vmatprep.subr.mxu1 %v13239_v42  ;;  %12355 = vmatprep.mubr.msk.f32.mxu0 %vm13240_vm2, %v13239_v42 }
0x13b1   :  { %12351 = vmatmul.mubr.msk.f32.vlgmr.msra.gmra.mxu1 %vm480_vm3, %v3345_v15 }
0x13b2   :  { %12360 = vmatprep.mubr.msk.f32.mxu1 %vm13240_vm2, %v13239_v42 }
0x1469   :  { %v3186_v16 = vpop.f32.mrf.mxu0 }
0x146b   :  { %v12337_v18 = vpop.f32.mrf.mxu0 }
0x146d   :  { %v3262_v21 = vpop.f32.mrf.mxu1  ;;  %v3340_v23 = vpop.f32.mrf.mxu0 }
0x146e   :  { %v3422_v25 = vsel %vm480_vm3, %v3340_v23, -inf }
0x146f   :  { %v12342_v26 = vpop.f32.mrf.mxu1  ;;  %3423 = vmax.xlane.f32.xlu0 %v3422_v25  ;;  %v12347_v27 = vpop.f32.mrf.mxu0 }
0x1471   :  { %v3418_v52 = vpop.f32.mrf.mxu1 }
0x1472   :  { %v3425_v28 = vsel %vm480_vm3, %v3418_v52, -inf }
0x1473   :  { %3426 = vmax.xlane.f32.xlu1 %v3425_v28  ;;  %v12352_v29 = vpop.f32.mrf.mxu1 }
0x1484   :  { %3444 = vrot.lane.b32.xlu1 %v13697_v17, %s13246_s4 }
0x1488   :  { %3598 = vrot.lane.b32.xlu1 %v13794_v36, %s13247_s5 }
0x148c   :  { %3600 = vrot.lane.b32.xlu1 %v13796_v46, %s13247_s5 }
0x1490   :  { %3608 = vrot.lane.b32.xlu1 %v3262_v21, %s13248_s0 }
0x14f8   :  { %v3424_v22 = vpop.xlane.xlu0 %3423 }
0x14f9   :  { %v3428_v24 = vsub.f32 %v3340_v23, %v3424_v22 }
0x14fb   :  { %v3430_v31 = vmul.f32 1.442695, %v3428_v24 }
0x14fc   :  { %v3427_v32 = vpop.xlane.xlu1 %3426 }
0x14fd   :  { %13076 = vpow2.f32 %v3430_v31  ;;  %v3429_v35 = vsub.f32 %v3418_v52, %v3427_v32 }
0x14ff   :  { %v3432_v38 = vmul.f32 1.442695, %v3429_v35 }
0x1500   :  { %v3445_v47 = vpop.permute.xlu1 %3444 }
0x1501   :  { %13078 = vpow2.f32 %v3432_v38  ;;  %12354 = vmatpush3.msra.mxu0 %v3445_v47 }
0x1504   :  { %v3599_v4 = vpop.permute.xlu1 %3598 }
0x1505   :  { %v3620_v6 = vsel %vm480_vm3, %v13756_v62, %v3599_v4  ;;  %v11456_v62 = vld [vmem:[%s15212_s2 + $0x17] ss:$0 sm:$0xff]  ;;  %v11460_v4 = vld [vmem:[%s15212_s2 + $0x1b] ss:$0 sm:$0xff] }
0x1508   :  { %v3601_v20 = vpop.permute.xlu1 %3600 }
0x1509   :  { %v3621_v12 = vsel %vm480_vm3, %v13758_v0, %v3601_v20 }
0x150a   :  { %v13077_v48 = vpop.eup %13076 }
0x150b   :  { %v3434_v17 = vsel %vm480_vm3, %v13077_v48, 0.0 }
0x150c   :  { %3435 = vadd.xlane.f32.xlu0 %v3434_v17  ;;  %v3609_v7 = vpop.permute.xlu1 %3608  ;;  %v3772_v17 = vld [vmem:[%s15210_s1 + $0x378] sm:$0xff] }
0x150d   :  { %v3623_v13 = vsel %vm1823_vm5, %v3621_v12, %v3609_v7 }
0x150e   :  { %v13079_v36 = vpop.eup %13078 }
0x150f   :  { %v3437_v49 = vsel %vm480_vm3, %v13079_v36, 0.0 }
0x1510   :  { %3438 = vadd.xlane.f32.xlu0 %v3437_v49  ;;  %v3770_v49 = vld [vmem:[%s15210_s1 + $0x368] sm:$0xff] }
0x1526   :  { %3520 = vrot.lane.b32.xlu0 %v13707_v19, %s13246_s4  ;;  %v3629_v19 = vld [vmem:[%s15210_s1 + $0x358] sm:$0xff] }
0x1527   :  { %12363 = vmatprep.subr.mxu0 %v3629_v19 }
0x152a   :  { %3606 = vrot.lane.b32.xlu0 %v3186_v16, %s13248_s0 }
0x1595   :  { %v3436_v46 = vpop.xlane.xlu0 %3435 }
0x1596   :  { %13080 = vrcp.f32 %v3436_v46  ;;  %v3769_v46 = vld [vmem:[%s15210_s1 + $0x360] sm:$0xff] }
0x1599   :  { %v3439_v50 = vpop.xlane.xlu0 %3438 }
0x159a   :  { %13082 = vrcp.f32 %v3439_v50  ;;  %v4000_v50 = vld [vmem:[%s15210_s1 + $0x3f8] sm:$0xff] }
0x159d   :  { %v3521_v55 = vpop.permute.xlu0 %3520 }
0x159e   :  { %12359 = vmatpush3.msra.mxu1 %v3521_v55  ;;  %v3868_v55 = vld [vmem:[%s15210_s1 + $0x3b8] sm:$0xff] }
0x159f   :  { %12374 = vmatprep.subr.mxu1 %v3772_v17 }
0x15a1   :  { %v3607_v5 = vpop.permute.xlu0 %3606 }
0x15a2   :  { %v3622_v53 = vsel %vm1823_vm5, %v3620_v6, %v3607_v5 }
0x15a3   :  { %v13081_v56 = vpop.eup %13080 }
0x15a4   :  { %v3442_v57 = vmul.f32 %v13081_v56, %v13077_v48  ;;  %v3867_v56 = vld [vmem:[%s15210_s1 + $0x3b0] sm:$0xff] }
0x15a6   :  { %12356 = vmatmul.mubr.msk.f32.vlgmr.msra.gmra.mxu0 %vm480_vm3, %v3442_v57  ;;  %v3866_v57 = vld [vmem:[%s15210_s1 + $0x3a8] sm:$0xff] }
0x15a7   :  { %v13083_v58 = vpop.eup %13082  ;;  %12364 = vmatpush3.msra.mxu0 %v3629_v19 }
0x15a8   :  { %v3443_v59 = vmul.f32 %v13083_v58, %v13079_v36  ;;  %12365 = vmatprep.subr.mxu0 %v3628_v60  ;;  %v3771_v36 = vld [vmem:[%s15210_s1 + $0x370] sm:$0xff]  ;;  %v3865_v58 = vld [vmem:[%s15210_s1 + $0x3a0] sm:$0xff] }
0x15a9   :  { %12366 = vmatpush3.msra.mxu0 %v3628_v60 }
0x15aa   :  { %12361 = vmatmul.mubr.msk.f32.vlgmr.msra.gmra.mxu1 %vm480_vm3, %v3443_v59  ;;  %12367 = vmatprep.subr.mxu0 %v3627_v61 }
0x15ab   :  { %12368 = vmatpush3.msra.mxu0 %v3627_v61  ;;  %12375 = vmatpush3.msra.mxu1 %v3772_v17 }
0x15ac   :  { %12369 = vmatprep.subr.mxu0 %v3626_v51  ;;  %12376 = vmatprep.subr.mxu1 %v3771_v36 }
0x15ad   :  { %12370 = vmatpush3.msra.mxu0 %v3626_v51  ;;  %12377 = vmatpush3.msra.mxu1 %v3771_v36  ;;  %v11464_v36 = vld [vmem:[%s15212_s2 + $0x19] ss:$0 sm:$0xff] }
0x15ae   :  { %12378 = vmatprep.subr.mxu1 %v3770_v49  ;;  %12385 = vmatprep.subr.mxu0 %v3868_v55 }
0x15af   :  { %12379 = vmatpush3.msra.mxu1 %v3770_v49 }
0x15b0   :  { %12380 = vmatprep.subr.mxu1 %v3769_v46 }
0x15b1   :  { %12381 = vmatpush3.msra.mxu1 %v3769_v46 }
0x15b2   :  { %12404 = vmatprep.subr.mxu1 %v4000_v50 }
0x1666   :  { %v3516_v63 = vpop.f32.mrf.mxu0 }
0x1667   :  { %3614 = vrot.lane.b32.xlu0 %v3516_v63, %s13249_s14 }
0x1668   :  { %v12357_v1 = vpop.f32.mrf.mxu0 }
0x166a   :  { %v3592_v2 = vpop.f32.mrf.mxu1 }
0x166b   :  { %3616 = vrot.lane.b32.xlu1 %v3592_v2, %s13249_s14  ;;  %3720 = vrot.lane.b32.xlu0 %v13684_v10, %s13238_s19  ;;  %v11459_v2 = vld [vmem:[%s15212_s2 + $0x1a] ss:$0 sm:$0xff] }
0x166c   :  { %v12362_v3 = vpop.f32.mrf.mxu1 }
0x166f   :  { %3722 = vrot.lane.b32.xlu1 %v13686_v11, %s13238_s19 }
0x16d9   :  { %v3615_v8 = vpop.permute.xlu0 %3614 }
0x16da   :  { %v3624_v9 = vsel %vm1826_vm4, %v3622_v53, %v3615_v8  ;;  %v11385_v53 = vld [vmem:[%s15212_s2 + $0x20] ss:$0 sm:$0xff] }
0x16db   :  { %12371 = vmatprep.mubr.msk.f32.mxu0 %vm29_vm0, %v3624_v9  ;;  %v13930_v12 = vadd.f32 %v11385_v53, %v13404_v44  ;;  %v3997_v44 = vld [vmem:[%s15210_s1 + $0x3e0] sm:$0xff] }
0x16dd   :  { %v3617_v14 = vpop.permute.xlu1 %3616  ;;  %v3721_v28 = vpop.permute.xlu0 %3720 }
0x16de   :  { %v3625_v54 = vsel %vm1826_vm4, %v3623_v13, %v3617_v14  ;;  %v3999_v13 = vld [vmem:[%s15210_s1 + $0x3f0] sm:$0xff]  ;;  %v3998_v14 = vld [vmem:[%s15210_s1 + $0x3e8] sm:$0xff] }
0x16df   :  { %12372 = vmatmul.mubr.msk.f32.vlgmr.msra.gmra.mxu0 %vm29_vm0, %v3625_v54  ;;  %v4094_v54 = vld [vmem:[%s15210_s1 + $0x438] sm:$0xff] }
0x16e0   :  { %12386 = vmatpush3.msra.mxu0 %v3868_v55 }
0x16e1   :  { %v3723_v26 = vpop.permute.xlu1 %3722  ;;  %12387 = vmatprep.subr.mxu0 %v3867_v56 }
0x16e2   :  { %12388 = vmatpush3.msra.mxu0 %v3867_v56 }
0x16e3   :  { %12389 = vmatprep.subr.mxu0 %v3866_v57 }
0x16e4   :  { %12390 = vmatpush3.msra.mxu0 %v3866_v57 }
0x16e5   :  { %12391 = vmatprep.subr.mxu0 %v3865_v58 }
0x16e6   :  { %12392 = vmatpush3.msra.mxu0 %v3865_v58 }
0x179f   :  { %v12373_v15 = vpop.f32.mrf.mxu0 }
0x17a0   :  { %v3713_v16 = vadd.f32 %v12373_v15, %v11456_v62  ;;  %v4093_v15 = vld [vmem:[%s15210_s1 + $0x430] sm:$0xff] }
0x17a1   :  { %v3707_v18 = vpop.f32.mrf.mxu0 }
0x17a2   :  { %v3717_v21 = vadd.f32 %v3713_v16, %v13380_v37  ;;  %v3708_v23 = vadd.f32 %v11456_v62, %v3707_v18  ;;  %v13949_v62 = vadd.f32 %v13402_v43, %v11385_v53  ;;  %v4092_v16 = vld [vmem:[%s15210_s1 + $0x428] sm:$0xff]  ;;  %v4091_v43 = vld [vmem:[%s15210_s1 + $0x420] sm:$0xff]  ;;  %v4090_v18 = vld [vmem:[%s15210_s1 + $0x418] sm:$0xff] }
0x17a4   :  { %v3719_v25 = vadd.f32 %v3717_v21, %v13686_v11  ;;  %v3716_v0 = vadd.f32 %v3708_v23, %v13382_v39  ;;  %v4088_v21 = vld [vmem:[%s15210_s1 + $0x408] sm:$0xff]  ;;  %v4087_v23 = vld [vmem:[%s15210_s1 + $0x400] sm:$0xff] }
0x17a6   :  { %v3727_v27 = vadd.f32 %v3723_v26, %v3719_v25  ;;  %v3718_v52 = vadd.f32 %v3716_v0, %v13684_v10  ;;  %v3864_v25 = vld [vmem:[%s15210_s1 + $0x398] sm:$0xff]  ;;  %v3863_v0 = vld [vmem:[%s15210_s1 + $0x390] sm:$0xff]  ;;  %v3861_v26 = vld [vmem:[%s15210_s1 + $0x380] sm:$0xff] }
0x17a7   :  { %12393 = vmatprep.subr.mxu0 %v3864_v25 }
0x17a8   :  { %v3731_v29 = vsel %vm29_vm0, %v3727_v27, 0.0  ;;  %v3726_v22 = vadd.f32 %v3721_v28, %v3718_v52  ;;  %12394 = vmatpush3.msra.mxu0 %v3864_v25 }
0x17a9   :  { %3732 = vadd.xlane.f32.xlu1 %v3731_v29  ;;  %12395 = vmatprep.subr.mxu0 %v3863_v0 }
0x17aa   :  { %v3728_v24 = vsel %vm29_vm0, %v3726_v22, 0.0  ;;  %12396 = vmatpush3.msra.mxu0 %v3863_v0 }
0x17ab   :  { %3729 = vadd.xlane.f32.xlu0 %v3728_v24 }
0x1832   :  { %v3733_v31 = vpop.xlane.xlu1 %3732 }
0x1833   :  { %v3736_v32 = vmul.f32 0.03125, %v3733_v31 }
0x1834   :  { %v3730_v37 = vpop.xlane.xlu0 %3729 }
0x1835   :  { %v3735_v35 = vmul.f32 0.03125, %v3730_v37  ;;  %v3738_v38 = vsub.f32 %v3727_v27, %v3736_v32  ;;  %v11461_v27 = vld [vmem:[%s15212_s2 + $0x18] ss:$0 sm:$0xff] }
0x1837   :  { %v3737_v11 = vsub.f32 %v3726_v22, %v3735_v35  ;;  %v3740_v48 = vmul.f32 %v3738_v38, %v3738_v38 }
0x1839   :  { %v3739_v47 = vmul.f32 %v3737_v11, %v3737_v11  ;;  %v3744_v10 = vsel %vm29_vm0, %v3740_v48, 0.0 }
0x183b   :  { %v3741_v39 = vsel %vm29_vm0, %v3739_v47, 0.0 }
0x183c   :  { %3742 = vadd.xlane.f32.xlu0 %v3741_v39  ;;  %v11469_v39 = vld [vmem:[%s15212_s2 + $0x21] ss:$0 sm:$0xff] }
0x1840   :  { %3745 = vadd.xlane.f32.xlu0 %v3744_v10 }
0x18c5   :  { %v3743_v59 = vpop.xlane.xlu0 %3742 }
0x18c6   :  { %v3747_v19 = vmul.f32 0.03125, %v3743_v59 }
0x18c8   :  { %v3749_v60 = vadd.f32 1e-12, %v3747_v19 }
0x18c9   :  { %v3746_v61 = vpop.xlane.xlu0 %3745 }
0x18ca   :  { %13084 = vrsqrt.f32 %v3749_v60  ;;  %v3748_v51 = vmul.f32 0.03125, %v3746_v61 }
0x18cc   :  { %v3750_v63 = vadd.f32 1e-12, %v3748_v51 }
0x18ce   :  { %13086 = vrsqrt.f32 %v3750_v63 }
0x18d7   :  { %v13085_v1 = vpop.eup %13084 }
0x18d8   :  { %v3753_v3 = vmul.f32 %v13085_v1, %v3737_v11 }
0x18da   :  { %v3760_v20 = vmul.f32 %v11459_v2, %v3753_v3 }
0x18db   :  { %v13087_v5 = vpop.eup %13086 }
0x18dc   :  { %v3754_v6 = vmul.f32 %v13087_v5, %v3738_v38  ;;  %v13920_v7 = vadd.f32 %v11460_v4, %v3760_v20  ;;  %v11472_v38 = vld [vmem:[%s15212_s2 + $0x22] ss:$0 sm:$0xff] }
0x18de   :  { %v3761_v8 = vmul.f32 %v11459_v2, %v3754_v6  ;;  %12382 = vmatprep.mubr.msk.f32.mxu1 %vm29_vm0, %v13920_v7 }
0x18e0   :  { %v13927_v9 = vadd.f32 %v11460_v4, %v3761_v8 }
0x18e2   :  { %12383 = vmatmul.mubr.msk.f32.vlgmr.msra.gmra.mxu1 %vm29_vm0, %v13927_v9 }
0x18e3   :  { %12405 = vmatpush3.msra.mxu1 %v4000_v50  ;;  %12412 = vmatprep.mubr.msk.f32.mxu1 %vm29_vm0, %v13930_v12 }
0x18e4   :  { %12406 = vmatprep.subr.mxu1 %v3999_v13 }
0x18e5   :  { %12407 = vmatpush3.msra.mxu1 %v3999_v13 }
0x18e6   :  { %12408 = vmatprep.subr.mxu1 %v3998_v14 }
0x18e7   :  { %12409 = vmatpush3.msra.mxu1 %v3998_v14 }
0x18e8   :  { %12410 = vmatprep.subr.mxu1 %v3997_v44 }
0x18e9   :  { %12411 = vmatpush3.msra.mxu1 %v3997_v44 }
0x18ea   :  { %12413 = vmatmul.mubr.msk.f32.vlgmr.msra.gmra.mxu1 %vm29_vm0, %v13949_v62  ;;  %12415 = vmatprep.subr.mxu1 %v4094_v54 }
0x18eb   :  { %12416 = vmatpush3.msra.mxu1 %v4094_v54  ;;  %12431 = vmatprep.mubr.msk.f32.mxu1 %vm400_vm1, %v13599_v30  ;;  %v4089_v30 = vld [vmem:[%s15210_s1 + $0x410] sm:$0xff] }
0x18ec   :  { %12417 = vmatprep.subr.mxu1 %v4093_v15 }
0x18ed   :  { %12418 = vmatpush3.msra.mxu1 %v4093_v15 }
0x18ee   :  { %12419 = vmatprep.subr.mxu1 %v4092_v16 }
0x18ef   :  { %12420 = vmatpush3.msra.mxu1 %v4092_v16 }
0x18f0   :  { %12421 = vmatprep.subr.mxu1 %v4091_v43 }
0x18f1   :  { %12422 = vmatpush3.msra.mxu1 %v4091_v43 }
0x18f2   :  { %12423 = vmatprep.subr.mxu1 %v4090_v18 }
0x18f3   :  { %12424 = vmatpush3.msra.mxu1 %v4090_v18 }
0x18f4   :  { %12425 = vmatprep.subr.mxu1 %v4089_v30 }
0x18f5   :  { %12426 = vmatpush3.msra.mxu1 %v4089_v30 }
0x18f6   :  { %12427 = vmatprep.subr.mxu1 %v4088_v21 }
0x18f7   :  { %12428 = vmatpush3.msra.mxu1 %v4088_v21 }
0x18f8   :  { %12429 = vmatprep.subr.mxu1 %v4087_v23 }
0x18f9   :  { %12430 = vmatpush3.msra.mxu1 %v4087_v23 }
0x18fa   :  { %12432 = vmatmul.mubr.msk.f32.vlgmr.msra.gmra.mxu1 %vm400_vm1, %v13622_v45  ;;  %12449 = vmatprep.subr.mxu1 %v13239_v42  ;;  %v3862_v45 = vld [vmem:[%s15210_s1 + $0x388] sm:$0xff] }
0x18fb   :  { %12451 = vmatprep.mubr.msk.f32.mxu1 %vm13240_vm2, %v13239_v42  ;;  %12397 = vmatprep.subr.mxu0 %v3862_v45 }
0x18fc   :  { %12398 = vmatpush3.msra.mxu0 %v3862_v45 }
0x18fd   :  { %12399 = vmatprep.subr.mxu0 %v3861_v26 }
0x18fe   :  { %12400 = vmatpush3.msra.mxu0 %v3861_v26 }
0x18ff   :  { %12434 = vmatprep.subr.mxu0 %v13239_v42 }
0x19a2   :  { %v12384_v52 = vpop.f32.mrf.mxu1 }
0x19a3   :  { %v3856_v28 = vadd.f32 %v12384_v52, %v11461_v27 }
0x19a4   :  { %v3850_v29 = vpop.f32.mrf.mxu1 }
0x19a5   :  { %v3851_v22 = vadd.f32 %v11461_v27, %v3850_v29  ;;  %v3860_v31 = vmax.f32 %v3856_v28, 0.0 }
0x19a7   :  { %v3859_v24 = vmax.f32 %v3851_v22, 0.0 }
0x19a9   :  { %12401 = vmatprep.mubr.msk.f32.mxu0 %vm400_vm1, %v3859_v24 }
0x19aa   :  { %12402 = vmatmul.mubr.msk.f32.vlgmr.msra.gmra.mxu0 %vm400_vm1, %v3860_v31  ;;  %v12414_v32 = vpop.f32.mrf.mxu1 }
0x19ab   :  { %12436 = vmatprep.mubr.msk.f32.mxu0 %vm13240_vm2, %v13239_v42  ;;  %v14022_v17 = vadd.f32 %v12414_v32, %v11469_v39 }
0x19ac   :  { %v4078_v37 = vpop.f32.mrf.mxu1 }
0x19ad   :  { %v14011_v48 = vadd.f32 %v11469_v39, %v4078_v37 }
0x19ba   :  { %v12433_v35 = vpop.f32.mrf.mxu1 }
0x19bb   :  { %v14014_v10 = vadd.f32 %v12433_v35, %v11472_v38 }
0x19bc   :  { %v4166_v11 = vpop.f32.mrf.mxu1 }
0x19bd   :  { %v14004_v47 = vadd.f32 %v11472_v38, %v4166_v11 }
0x19bf   :  { %12435 = vmatpush3.xpose.msk.msra.mxu0 %vm480_vm3, %v14004_v47 }
0x19c0   :  { %12439 = vmatprep.subr.mxu0 %v13239_v42 }
0x19c2   :  { %12437 = vmatmul.mubr.msk.f32.vlgmr.msra.gmra.mxu0 %vm480_vm3, %v14011_v48 }
0x19c3   :  { %12440 = vmatpush3.xpose.msk.msra.mxu0 %vm480_vm3, %v14014_v10  ;;  %12441 = vmatprep.mubr.msk.f32.mxu0 %vm13240_vm2, %v13239_v42 }
0x19c4   :  { %12444 = vmatprep.subr.mxu0 %v13239_v42 }
0x19c6   :  { %12442 = vmatmul.mubr.msk.f32.vlgmr.msra.gmra.mxu0 %vm480_vm3, %v14022_v17 }
0x19c7   :  { %12446 = vmatprep.mubr.msk.f32.mxu0 %vm13240_vm2, %v13239_v42 }
0x1a6a   :  { %v12403_v49 = vpop.f32.mrf.mxu0 }
0x1a6b   :  { %v14032_v46 = vadd.f32 %v12403_v49, %v11464_v36 }
0x1a6c   :  { %v14034_v50 = vpop.f32.mrf.mxu0 }
0x1a82   :  { %v4247_v55 = vpop.f32.mrf.mxu0 }
0x1a83   :  { %v4327_v56 = vsel %vm480_vm3, %v4247_v55, -inf }
0x1a84   :  { %4328 = vmax.xlane.f32.xlu1 %v4327_v56  ;;  %v12438_v57 = vpop.f32.mrf.mxu0 }
0x1a86   :  { %v4323_v58 = vpop.f32.mrf.mxu0 }
0x1a87   :  { %v4330_v59 = vsel %vm480_vm3, %v4323_v58, -inf }
0x1a88   :  { %4331 = vmax.xlane.f32.xlu0 %v4330_v59  ;;  %v12443_v19 = vpop.f32.mrf.mxu0 }
0x1a95   :  { %4349 = vrot.lane.b32.xlu1 %v14004_v47, %s13238_s19 }
0x1a99   :  { %4503 = vrot.lane.b32.xlu1 %v14004_v47, %s13241_s26 }
0x1a9d   :  { %4581 = vrot.lane.b32.xlu1 %v14014_v10, %s13241_s26 }
0x1a9e   :  { %4425 = vrot.lane.b32.xlu0 %v14014_v10, %s13238_s19 }
0x1b0d   :  { %v4329_v60 = vpop.xlane.xlu1 %4328 }
0x1b0e   :  { %v4333_v61 = vsub.f32 %v4247_v55, %v4329_v60 }
0x1b10   :  { %v4335_v51 = vmul.f32 1.442695, %v4333_v61 }
0x1b11   :  { %v4350_v63 = vpop.permute.xlu1 %4349  ;;  %v4332_v1 = vpop.xlane.xlu0 %4331 }
0x1b12   :  { %13088 = vpow2.f32 %v4335_v51  ;;  %v4334_v2 = vsub.f32 %v4323_v58, %v4332_v1  ;;  %12445 = vmatpush3.msra.mxu0 %v4350_v63 }
0x1b13   :  { %12454 = vmatprep.subr.mxu0 %v13239_v42 }
0x1b14   :  { %v4337_v3 = vmul.f32 1.442695, %v4334_v2 }
0x1b15   :  { %v4426_v4 = vpop.permute.xlu0 %4425  ;;  %v4504_v8 = vpop.permute.xlu1 %4503 }
0x1b16   :  { %13090 = vpow2.f32 %v4337_v3  ;;  %12450 = vmatpush3.msra.mxu1 %v4426_v4 }
0x1b17   :  { %12459 = vmatprep.subr.mxu1 %v13239_v42 }
0x1b19   :  { %v4582_v13 = vpop.permute.xlu1 %4581 }
0x1b1f   :  { %v13089_v20 = vpop.eup %13088 }
0x1b20   :  { %v4339_v5 = vsel %vm480_vm3, %v13089_v20, 0.0 }
0x1b21   :  { %4340 = vadd.xlane.f32.xlu1 %v4339_v5 }
0x1b23   :  { %v13091_v6 = vpop.eup %13090 }
0x1b24   :  { %v4342_v53 = vsel %vm480_vm3, %v13091_v6, 0.0 }
0x1b25   :  { %4343 = vadd.xlane.f32.xlu0 %v4342_v53 }
0x1b32   :  { %4579 = vrot.lane.b32.xlu1 %v14022_v17, %s13241_s26 }
0x1b3b   :  { %4501 = vrot.lane.b32.xlu0 %v14011_v48, %s13241_s26 }
0x1baa   :  { %v4341_v14 = vpop.xlane.xlu1 %4340 }
0x1bab   :  { %13092 = vrcp.f32 %v4341_v14 }
0x1bae   :  { %v4344_v44 = vpop.xlane.xlu0 %4343  ;;  %v4580_v30 = vpop.permute.xlu1 %4579 }
0x1baf   :  { %13094 = vrcp.f32 %v4344_v44 }
0x1bb2   :  { %v4502_v18 = vpop.permute.xlu0 %4501 }
0x1bb8   :  { %v13093_v54 = vpop.eup %13092 }
0x1bb9   :  { %v4347_v15 = vmul.f32 %v13093_v54, %v13089_v20 }
0x1bbb   :  { %12447 = vmatmul.mubr.msk.f32.vlgmr.msra.gmra.mxu0 %vm480_vm3, %v4347_v15 }
0x1bbc   :  { %v13095_v16 = vpop.eup %13094  ;;  %12455 = vmatpush3.xpose.msk.msra.mxu0 %vm480_vm3, %v4504_v8  ;;  %12456 = vmatprep.mubr.msk.f32.mxu0 %vm13240_vm2, %v13239_v42 }
0x1bbd   :  { %v4348_v43 = vmul.f32 %v13095_v16, %v13091_v6  ;;  %12464 = vmatprep.subr.mxu0 %v13239_v42 }
0x1bbf   :  { %12452 = vmatmul.mubr.msk.f32.vlgmr.msra.gmra.mxu1 %vm480_vm3, %v4348_v43  ;;  %12457 = vmatmul.mubr.msk.f32.vlgmr.msra.gmra.mxu0 %vm480_vm3, %v4502_v18 }
0x1bc0   :  { %12460 = vmatpush3.xpose.msk.msra.mxu1 %vm480_vm3, %v4582_v13  ;;  %12461 = vmatprep.mubr.msk.f32.mxu1 %vm13240_vm2, %v13239_v42 }
0x1bc1   :  { %12469 = vmatprep.subr.mxu1 %v13239_v42  ;;  %12466 = vmatprep.mubr.msk.f32.mxu0 %vm13240_vm2, %v13239_v42 }
0x1bc3   :  { %12462 = vmatmul.mubr.msk.f32.vlgmr.msra.gmra.mxu1 %vm480_vm3, %v4580_v30 }
0x1bc4   :  { %12471 = vmatprep.mubr.msk.f32.mxu1 %vm13240_vm2, %v13239_v42 }
0x1c7b   :  { %v14070_v21 = vpop.f32.mrf.mxu0 }
0x1c7d   :  { %v12448_v23 = vpop.f32.mrf.mxu0 }
0x1c7f   :  { %v14072_v25 = vpop.f32.mrf.mxu1  ;;  %v4575_v0 = vpop.f32.mrf.mxu0 }
0x1c80   :  { %v4657_v45 = vsel %vm480_vm3, %v4575_v0, -inf }
0x1c81   :  { %v12453_v26 = vpop.f32.mrf.mxu1  ;;  %4658 = vmax.xlane.f32.xlu0 %v4657_v45  ;;  %v12458_v27 = vpop.f32.mrf.mxu0 }
0x1c83   :  { %v4653_v52 = vpop.f32.mrf.mxu1 }
0x1c84   :  { %v4660_v28 = vsel %vm480_vm3, %v4653_v52, -inf }
0x1c85   :  { %4661 = vmax.xlane.f32.xlu1 %v4660_v28  ;;  %v12463_v29 = vpop.f32.mrf.mxu1 }
0x1c96   :  { %4679 = vrot.lane.b32.xlu1 %v14004_v47, %s13242_s27 }
0x1c97   :  { %4755 = vrot.lane.b32.xlu0 %v14014_v10, %s13242_s27 }
0x1c9a   :  { %4833 = vrot.lane.b32.xlu1 %v14004_v47, %s13243_s28 }
0x1c9e   :  { %4911 = vrot.lane.b32.xlu1 %v14014_v10, %s13243_s28 }
0x1ca2   :  { %4909 = vrot.lane.b32.xlu1 %v14022_v17, %s13243_s28 }
0x1d0a   :  { %v4659_v22 = vpop.xlane.xlu0 %4658 }
0x1d0b   :  { %v4663_v24 = vsub.f32 %v4575_v0, %v4659_v22 }
0x1d0d   :  { %v4665_v31 = vmul.f32 1.442695, %v4663_v24 }
0x1d0e   :  { %v4662_v32 = vpop.xlane.xlu1 %4661  ;;  %v4756_v37 = vpop.permute.xlu0 %4755 }
0x1d0f   :  { %13096 = vpow2.f32 %v4665_v31  ;;  %v4664_v35 = vsub.f32 %v4653_v52, %v4662_v32  ;;  %12470 = vmatpush3.msra.mxu1 %v4756_v37 }
0x1d10   :  { %12479 = vmatprep.subr.mxu1 %v13239_v42 }
0x1d11   :  { %v4667_v38 = vmul.f32 1.442695, %v4664_v35 }
0x1d12   :  { %v4680_v11 = vpop.permute.xlu1 %4679 }
0x1d13   :  { %13098 = vpow2.f32 %v4667_v38  ;;  %12465 = vmatpush3.msra.mxu0 %v4680_v11 }
0x1d14   :  { %12474 = vmatprep.subr.mxu0 %v13239_v42 }
0x1d16   :  { %v4834_v58 = vpop.permute.xlu1 %4833 }
0x1d1a   :  { %v4912_v61 = vpop.permute.xlu1 %4911 }
0x1d1c   :  { %v13097_v39 = vpop.eup %13096 }
0x1d1d   :  { %v4669_v36 = vsel %vm480_vm3, %v13097_v39, 0.0 }
0x1d1e   :  { %4670 = vadd.xlane.f32.xlu0 %v4669_v36  ;;  %v4910_v1 = vpop.permute.xlu1 %4909 }
0x1d20   :  { %v13099_v49 = vpop.eup %13098 }
0x1d21   :  { %v4672_v55 = vsel %vm480_vm3, %v13099_v49, 0.0 }
0x1d22   :  { %4673 = vadd.xlane.f32.xlu0 %v4672_v55 }
0x1d38   :  { %4831 = vrot.lane.b32.xlu0 %v14011_v48, %s13243_s28 }
0x1da7   :  { %v4671_v56 = vpop.xlane.xlu0 %4670 }
0x1da8   :  { %13100 = vrcp.f32 %v4671_v56 }
0x1dab   :  { %v4674_v57 = vpop.xlane.xlu0 %4673 }
0x1dac   :  { %13102 = vrcp.f32 %v4674_v57 }
0x1daf   :  { %v4832_v63 = vpop.permute.xlu0 %4831 }
0x1db5   :  { %v13101_v59 = vpop.eup %13100 }
0x1db6   :  { %v4677_v19 = vmul.f32 %v13101_v59, %v13097_v39 }
0x1db8   :  { %12467 = vmatmul.mubr.msk.f32.vlgmr.msra.gmra.mxu0 %vm480_vm3, %v4677_v19 }
0x1db9   :  { %v13103_v60 = vpop.eup %13102  ;;  %12475 = vmatpush3.xpose.msk.msra.mxu0 %vm480_vm3, %v4834_v58  ;;  %12476 = vmatprep.mubr.msk.f32.mxu0 %vm13240_vm2, %v13239_v42 }
0x1dba   :  { %v4678_v51 = vmul.f32 %v13103_v60, %v13099_v49  ;;  %12484 = vmatprep.subr.mxu0 %v13239_v42 }
0x1dbc   :  { %12472 = vmatmul.mubr.msk.f32.vlgmr.msra.gmra.mxu1 %vm480_vm3, %v4678_v51  ;;  %12477 = vmatmul.mubr.msk.f32.vlgmr.msra.gmra.mxu0 %vm480_vm3, %v4832_v63 }
0x1dbd   :  { %12480 = vmatpush3.xpose.msk.msra.mxu1 %vm480_vm3, %v4912_v61  ;;  %12481 = vmatprep.mubr.msk.f32.mxu1 %vm13240_vm2, %v13239_v42 }
0x1dbe   :  { %12489 = vmatprep.subr.mxu1 %v13239_v42  ;;  %12486 = vmatprep.mubr.msk.f32.mxu0 %vm13240_vm2, %v13239_v42 }
0x1dc0   :  { %12482 = vmatmul.mubr.msk.f32.vlgmr.msra.gmra.mxu1 %vm480_vm3, %v4910_v1 }
0x1dc1   :  { %12491 = vmatprep.mubr.msk.f32.mxu1 %vm13240_vm2, %v13239_v42 }
0x1e78   :  { %v14108_v2 = vpop.f32.mrf.mxu0 }
0x1e7a   :  { %v12468_v3 = vpop.f32.mrf.mxu0 }
0x1e7c   :  { %v14110_v4 = vpop.f32.mrf.mxu1  ;;  %v4905_v20 = vpop.f32.mrf.mxu0 }
0x1e7d   :  { %v4987_v5 = vsel %vm480_vm3, %v4905_v20, -inf }
0x1e7e   :  { %v12473_v6 = vpop.f32.mrf.mxu1  ;;  %4988 = vmax.xlane.f32.xlu0 %v4987_v5  ;;  %v12478_v53 = vpop.f32.mrf.mxu0 }
0x1e80   :  { %v4983_v8 = vpop.f32.mrf.mxu1 }
0x1e81   :  { %v4990_v13 = vsel %vm480_vm3, %v4983_v8, -inf }
0x1e82   :  { %4991 = vmax.xlane.f32.xlu1 %v4990_v13  ;;  %v12483_v14 = vpop.f32.mrf.mxu1 }
0x1e93   :  { %5009 = vrot.lane.b32.xlu1 %v14004_v47, %s13244_s29 }
0x1e94   :  { %5085 = vrot.lane.b32.xlu0 %v14014_v10, %s13244_s29 }
0x1e97   :  { %5163 = vrot.lane.b32.xlu1 %v14004_v47, %s13245_s30 }
0x1e9b   :  { %5241 = vrot.lane.b32.xlu1 %v14014_v10, %s13245_s30 }
0x1e9f   :  { %5239 = vrot.lane.b32.xlu1 %v14022_v17, %s13245_s30 }
0x1f07   :  { %v4989_v44 = vpop.xlane.xlu0 %4988 }
0x1f08   :  { %v4993_v54 = vsub.f32 %v4905_v20, %v4989_v44  ;;  %v5523_v44 = vld [vmem:[%s15210_s1 + $0x450] sm:$0xff] }
0x1f0a   :  { %v4995_v15 = vmul.f32 1.442695, %v4993_v54  ;;  %v5522_v54 = vld [vmem:[%s15210_s1 + $0x448] sm:$0xff] }
0x1f0b   :  { %v4992_v16 = vpop.xlane.xlu1 %4991  ;;  %v5086_v43 = vpop.permute.xlu0 %5085 }
0x1f0c   :  { %13104 = vpow2.f32 %v4995_v15  ;;  %v4994_v18 = vsub.f32 %v4983_v8, %v4992_v16  ;;  %12490 = vmatpush3.msra.mxu1 %v5086_v43  ;;  %v5521_v15 = vld [vmem:[%s15210_s1 + $0x440] sm:$0xff]  ;;  %v5618_v16 = vld [vmem:[%s15210_s1 + $0x498] sm:$0xff] }
0x1f0d   :  { %12499 = vmatprep.subr.mxu1 %v13239_v42 }
0x1f0e   :  { %v4997_v30 = vmul.f32 1.442695, %v4994_v18 }
0x1f0f   :  { %v5010_v23 = vpop.permute.xlu1 %5009 }
0x1f10   :  { %13106 = vpow2.f32 %v4997_v30  ;;  %12485 = vmatpush3.msra.mxu0 %v5010_v23 }
0x1f11   :  { %12494 = vmatprep.subr.mxu0 %v13239_v42 }
0x1f13   :  { %v5164_v28 = vpop.permute.xlu1 %5163 }
0x1f17   :  { %v5242_v31 = vpop.permute.xlu1 %5241 }
0x1f19   :  { %v13105_v0 = vpop.eup %13104 }
0x1f1a   :  { %v4999_v45 = vsel %vm480_vm3, %v13105_v0, 0.0 }
0x1f1b   :  { %5000 = vadd.xlane.f32.xlu0 %v4999_v45  ;;  %v5240_v37 = vpop.permute.xlu1 %5239  ;;  %v5621_v45 = vld [vmem:[%s15210_s1 + $0x4b0] sm:$0xff] }
0x1f1d   :  { %v13107_v17 = vpop.eup %13106 }
0x1f1e   :  { %v5002_v26 = vsel %vm480_vm3, %v13107_v17, 0.0 }
0x1f1f   :  { %5003 = vadd.xlane.f32.xlu0 %v5002_v26 }
0x1f35   :  { %5161 = vrot.lane.b32.xlu0 %v14011_v48, %s13245_s30 }
0x1fa4   :  { %v5001_v27 = vpop.xlane.xlu0 %5000 }
0x1fa5   :  { %13108 = vrcp.f32 %v5001_v27 }
0x1fa8   :  { %v5004_v52 = vpop.xlane.xlu0 %5003 }
0x1fa9   :  { %13110 = vrcp.f32 %v5004_v52 }
0x1fac   :  { %v5162_v48 = vpop.permute.xlu0 %5161 }
0x1fb2   :  { %v13109_v29 = vpop.eup %13108 }
0x1fb3   :  { %v5007_v22 = vmul.f32 %v13109_v29, %v13105_v0  ;;  %v5622_v0 = vld [vmem:[%s15210_s1 + $0x4b8] sm:$0xff] }
0x1fb5   :  { %12487 = vmatmul.mubr.msk.f32.vlgmr.msra.gmra.mxu0 %vm480_vm3, %v5007_v22 }
0x1fb6   :  { %v13111_v24 = vpop.eup %13110  ;;  %12495 = vmatpush3.xpose.msk.msra.mxu0 %vm480_vm3, %v5164_v28  ;;  %12496 = vmatprep.mubr.msk.f32.mxu0 %vm13240_vm2, %v13239_v42 }
0x1fb7   :  { %v5008_v32 = vmul.f32 %v13111_v24, %v13107_v17  ;;  %12504 = vmatprep.subr.mxu0 %v13239_v42 }
0x1fb9   :  { %12492 = vmatmul.mubr.msk.f32.vlgmr.msra.gmra.mxu1 %vm480_vm3, %v5008_v32  ;;  %12497 = vmatmul.mubr.msk.f32.vlgmr.msra.gmra.mxu0 %vm480_vm3, %v5162_v48 }
0x1fba   :  { %12500 = vmatpush3.xpose.msk.msra.mxu1 %vm480_vm3, %v5242_v31  ;;  %12501 = vmatprep.mubr.msk.f32.mxu1 %vm13240_vm2, %v13239_v42 }
0x1fbb   :  { %12509 = vmatprep.subr.mxu1 %v13239_v42  ;;  %12506 = vmatprep.mubr.msk.f32.mxu0 %vm13240_vm2, %v13239_v42 }
0x1fbd   :  { %12502 = vmatmul.mubr.msk.f32.vlgmr.msra.gmra.mxu1 %vm480_vm3, %v5240_v37 }
0x1fbe   :  { %12511 = vmatprep.mubr.msk.f32.mxu1 %vm13240_vm2, %v13239_v42 }
0x2075   :  { %v5081_v35 = vpop.f32.mrf.mxu0 }
0x2077   :  { %v12488_v38 = vpop.f32.mrf.mxu0 }
0x2078   :  { %v5615_v38 = vld [vmem:[%s15210_s1 + $0x480] sm:$0xff] }
0x2079   :  { %v5157_v11 = vpop.f32.mrf.mxu1  ;;  %v5235_v39 = vpop.f32.mrf.mxu0 }
0x207a   :  { %v5317_v36 = vsel %vm480_vm3, %v5235_v39, -inf }
0x207b   :  { %v12493_v49 = vpop.f32.mrf.mxu1  ;;  %5318 = vmax.xlane.f32.xlu0 %v5317_v36  ;;  %v12498_v55 = vpop.f32.mrf.mxu0  ;;  %v5612_v36 = vld [vmem:[%s15210_s1 + $0x468] sm:$0xff] }
0x207c   :  { %v5611_v49 = vld [vmem:[%s15210_s1 + $0x460] sm:$0xff] }
0x207d   :  { %v5313_v56 = vpop.f32.mrf.mxu1 }
0x207e   :  { %v5320_v57 = vsel %vm480_vm3, %v5313_v56, -inf }
0x207f   :  { %5321 = vmax.xlane.f32.xlu1 %v5320_v57  ;;  %v12503_v58 = vpop.f32.mrf.mxu1  ;;  %v5619_v57 = vld [vmem:[%s15210_s1 + $0x4a0] sm:$0xff] }
0x2080   :  { %v5797_v58 = vld [vmem:[%s15210_s1 + $0x4d8] sm:$0xff] }
0x2090   :  { %5339 = vrot.lane.b32.xlu1 %v14004_v47, %s13246_s4 }
0x2094   :  { %5493 = vrot.lane.b32.xlu1 %v14108_v2, %s13247_s5 }
0x2098   :  { %5495 = vrot.lane.b32.xlu1 %v14110_v4, %s13247_s5 }
0x209c   :  { %5503 = vrot.lane.b32.xlu1 %v5157_v11, %s13248_s0  ;;  %v5614_v11 = vld [vmem:[%s15210_s1 + $0x478] sm:$0xff] }
0x2104   :  { %v5319_v59 = vpop.xlane.xlu0 %5318 }
0x2105   :  { %v5323_v19 = vsub.f32 %v5235_v39, %v5319_v59  ;;  %v5613_v39 = vld [vmem:[%s15210_s1 + $0x470] sm:$0xff] }
0x2107   :  { %v5325_v60 = vmul.f32 1.442695, %v5323_v19  ;;  %v11499_v19 = vld [vmem:[%s15212_s2 + $0x23] ss:$0 sm:$0xff] }
0x2108   :  { %v5322_v61 = vpop.xlane.xlu1 %5321 }
0x2109   :  { %13112 = vpow2.f32 %v5325_v60  ;;  %v5324_v51 = vsub.f32 %v5313_v56, %v5322_v61  ;;  %v5620_v56 = vld [vmem:[%s15210_s1 + $0x4a8] sm:$0xff] }
0x210b   :  { %v5327_v63 = vmul.f32 1.442695, %v5324_v51 }
0x210c   :  { %v5340_v1 = vpop.permute.xlu1 %5339 }
0x210d   :  { %13114 = vpow2.f32 %v5327_v63  ;;  %12505 = vmatpush3.msra.mxu0 %v5340_v1  ;;  %v5796_v63 = vld [vmem:[%s15210_s1 + $0x4d0] sm:$0xff]  ;;  %v5795_v1 = vld [vmem:[%s15210_s1 + $0x4c8] sm:$0xff] }
0x2110   :  { %v5494_v17 = vpop.permute.xlu1 %5493 }
0x2111   :  { %v5515_v52 = vsel %vm480_vm3, %v14070_v21, %v5494_v17  ;;  %v5617_v21 = vld [vmem:[%s15210_s1 + $0x490] sm:$0xff] }
0x2114   :  { %v5496_v26 = vpop.permute.xlu1 %5495 }
0x2115   :  { %v5516_v31 = vsel %vm480_vm3, %v14072_v25, %v5496_v26  ;;  %v5616_v25 = vld [vmem:[%s15210_s1 + $0x488] sm:$0xff] }
0x2116   :  { %v13113_v3 = vpop.eup %13112 }
0x2117   :  { %v5329_v47 = vsel %vm480_vm3, %v13113_v3, 0.0 }
0x2118   :  { %5330 = vadd.xlane.f32.xlu0 %v5329_v47  ;;  %v5504_v28 = vpop.permute.xlu1 %5503  ;;  %v5885_v47 = vld [vmem:[%s15210_s1 + $0x518] sm:$0xff] }
0x2119   :  { %v5518_v32 = vsel %vm1823_vm5, %v5516_v31, %v5504_v28 }
0x211a   :  { %v13115_v2 = vpop.eup %13114 }
0x211b   :  { %v5332_v20 = vsel %vm480_vm3, %v13115_v2, 0.0 }
0x211c   :  { %5333 = vadd.xlane.f32.xlu0 %v5332_v20  ;;  %v5883_v20 = vld [vmem:[%s15210_s1 + $0x508] sm:$0xff] }
0x2132   :  { %5415 = vrot.lane.b32.xlu0 %v14014_v10, %s13246_s4  ;;  %v5524_v10 = vld [vmem:[%s15210_s1 + $0x458] sm:$0xff] }
0x2133   :  { %12514 = vmatprep.subr.mxu0 %v5524_v10 }
0x2136   :  { %5501 = vrot.lane.b32.xlu0 %v5081_v35, %s13248_s0 }
0x21a1   :  { %v5331_v4 = vpop.xlane.xlu0 %5330 }
0x21a2   :  { %13116 = vrcp.f32 %v5331_v4  ;;  %v5882_v4 = vld [vmem:[%s15210_s1 + $0x500] sm:$0xff] }
0x21a5   :  { %v5334_v5 = vpop.xlane.xlu0 %5333 }
0x21a6   :  { %13118 = vrcp.f32 %v5334_v5  ;;  %v5881_v5 = vld [vmem:[%s15210_s1 + $0x4f8] sm:$0xff] }
0x21a9   :  { %v5416_v6 = vpop.permute.xlu0 %5415 }
0x21aa   :  { %12510 = vmatpush3.msra.mxu1 %v5416_v6  ;;  %v5880_v6 = vld [vmem:[%s15210_s1 + $0x4f0] sm:$0xff] }
0x21ab   :  { %12525 = vmatprep.subr.mxu1 %v5622_v0 }
0x21ad   :  { %v5502_v27 = vpop.permute.xlu0 %5501 }
0x21ae   :  { %v5517_v29 = vsel %vm1823_vm5, %v5515_v52, %v5502_v27  ;;  %v11507_v27 = vld [vmem:[%s15212_s2 + $0x25] ss:$0 sm:$0xff] }
0x21af   :  { %v13117_v53 = vpop.eup %13116 }
0x21b0   :  { %v5337_v8 = vmul.f32 %v13117_v53, %v13113_v3  ;;  %v5794_v3 = vld [vmem:[%s15210_s1 + $0x4c0] sm:$0xff]  ;;  %v5879_v53 = vld [vmem:[%s15210_s1 + $0x4e8] sm:$0xff] }
0x21b2   :  { %12507 = vmatmul.mubr.msk.f32.vlgmr.msra.gmra.mxu0 %vm480_vm3, %v5337_v8  ;;  %v5878_v8 = vld [vmem:[%s15210_s1 + $0x4e0] sm:$0xff] }
0x21b3   :  { %v13119_v13 = vpop.eup %13118  ;;  %12515 = vmatpush3.msra.mxu0 %v5524_v10 }
0x21b4   :  { %v5338_v14 = vmul.f32 %v13119_v13, %v13115_v2  ;;  %12516 = vmatprep.subr.mxu0 %v5523_v44  ;;  %v5884_v2 = vld [vmem:[%s15210_s1 + $0x510] sm:$0xff] }
0x21b5   :  { %12517 = vmatpush3.msra.mxu0 %v5523_v44 }
0x21b6   :  { %12512 = vmatmul.mubr.msk.f32.vlgmr.msra.gmra.mxu1 %vm480_vm3, %v5338_v14  ;;  %12518 = vmatprep.subr.mxu0 %v5522_v54 }
0x21b7   :  { %12519 = vmatpush3.msra.mxu0 %v5522_v54  ;;  %12526 = vmatpush3.msra.mxu1 %v5622_v0 }
0x21b8   :  { %12520 = vmatprep.subr.mxu0 %v5521_v15  ;;  %12527 = vmatprep.subr.mxu1 %v5621_v45 }
0x21b9   :  { %12521 = vmatpush3.msra.mxu0 %v5521_v15  ;;  %12528 = vmatpush3.msra.mxu1 %v5621_v45  ;;  %v11506_v15 = vld [vmem:[%s15212_s2 + $0x24] ss:$0 sm:$0xff]  ;;  %v11510_v45 = vld [vmem:[%s15212_s2 + $0x26] ss:$0 sm:$0xff] }
0x21ba   :  { %12536 = vmatprep.subr.mxu0 %v5618_v16  ;;  %12529 = vmatprep.subr.mxu1 %v5620_v56 }
0x21bb   :  { %12530 = vmatpush3.msra.mxu1 %v5620_v56 }
0x21bc   :  { %12531 = vmatprep.subr.mxu1 %v5619_v57 }
0x21bd   :  { %12532 = vmatpush3.msra.mxu1 %v5619_v57 }
0x21be   :  { %12555 = vmatprep.subr.mxu1 %v5797_v58 }
0x2272   :  { %v5411_v43 = vpop.f32.mrf.mxu0 }
0x2273   :  { %5509 = vrot.lane.b32.xlu0 %v5411_v43, %s13249_s14 }
0x2274   :  { %v12508_v18 = vpop.f32.mrf.mxu0 }
0x2276   :  { %v5487_v30 = vpop.f32.mrf.mxu1 }
0x2277   :  { %5511 = vrot.lane.b32.xlu1 %v5487_v30, %s13249_s14  ;;  %5704 = vrot.lane.b32.xlu0 %v13930_v12, %s13238_s19 }
0x2278   :  { %v12513_v23 = vpop.f32.mrf.mxu1 }
0x227b   :  { %5706 = vrot.lane.b32.xlu1 %v13949_v62, %s13238_s19 }
0x22e5   :  { %v5510_v22 = vpop.permute.xlu0 %5509 }
0x22e6   :  { %v5519_v24 = vsel %vm1826_vm4, %v5517_v29, %v5510_v22 }
0x22e7   :  { %12522 = vmatprep.mubr.msk.f32.mxu0 %vm29_vm0, %v5519_v24 }
0x22e9   :  { %v5512_v48 = vpop.permute.xlu1 %5511  ;;  %v14201_v35 = vpop.permute.xlu0 %5704 }
0x22ea   :  { %v5520_v37 = vsel %vm1826_vm4, %v5518_v32, %v5512_v48 }
0x22eb   :  { %12523 = vmatmul.mubr.msk.f32.vlgmr.msra.gmra.mxu0 %vm29_vm0, %v5520_v37 }
0x22ec   :  { %12537 = vmatpush3.msra.mxu0 %v5618_v16  ;;  %12552 = vmatprep.mubr.msk.f32.mxu0 %vm400_vm1, %v14201_v35 }
0x22ed   :  { %12538 = vmatprep.subr.mxu0 %v5617_v21  ;;  %v14224_v55 = vpop.permute.xlu1 %5706 }
0x22ee   :  { %12539 = vmatpush3.msra.mxu0 %v5617_v21 }
0x22ef   :  { %12540 = vmatprep.subr.mxu0 %v5616_v25 }
0x22f0   :  { %12541 = vmatpush3.msra.mxu0 %v5616_v25 }
0x22f1   :  { %12542 = vmatprep.subr.mxu0 %v5615_v38 }
0x22f2   :  { %12543 = vmatpush3.msra.mxu0 %v5615_v38 }
0x22f3   :  { %12544 = vmatprep.subr.mxu0 %v5614_v11 }
0x22f4   :  { %12545 = vmatpush3.msra.mxu0 %v5614_v11 }
0x22f5   :  { %12546 = vmatprep.subr.mxu0 %v5613_v39 }
0x22f6   :  { %12547 = vmatpush3.msra.mxu0 %v5613_v39 }
0x22f7   :  { %12548 = vmatprep.subr.mxu0 %v5612_v36 }
0x22f8   :  { %12549 = vmatpush3.msra.mxu0 %v5612_v36 }
0x22f9   :  { %12550 = vmatprep.subr.mxu0 %v5611_v49 }
0x22fa   :  { %12551 = vmatpush3.msra.mxu0 %v5611_v49 }
0x22fb   :  { %12553 = vmatmul.mubr.msk.f32.vlgmr.msra.gmra.mxu0 %vm400_vm1, %v14224_v55  ;;  %12585 = vmatprep.subr.mxu0 %v13239_v42 }
0x22fc   :  { %12587 = vmatprep.mubr.msk.f32.mxu0 %vm13240_vm2, %v13239_v42 }
0x23ab   :  { %v12524_v59 = vpop.f32.mrf.mxu0 }
0x23ac   :  { %v5608_v51 = vadd.f32 %v12524_v59, %v11499_v19 }
0x23ad   :  { %v5602_v60 = vpop.f32.mrf.mxu0 }
0x23ae   :  { %v5603_v61 = vadd.f32 %v11499_v19, %v5602_v60 }
0x23b0   :  { %12533 = vmatprep.mubr.msk.f32.mxu1 %vm29_vm0, %v5603_v61 }
0x23b1   :  { %12534 = vmatmul.mubr.msk.f32.vlgmr.msra.gmra.mxu1 %vm29_vm0, %v5608_v51 }
0x23b2   :  { %12556 = vmatpush3.msra.mxu1 %v5797_v58  ;;  %12563 = vmatprep.mubr.msk.f32.mxu1 %vm29_vm0, %v13930_v12 }
0x23b3   :  { %12557 = vmatprep.subr.mxu1 %v5796_v63 }
0x23b4   :  { %12558 = vmatpush3.msra.mxu1 %v5796_v63 }
0x23b5   :  { %12559 = vmatprep.subr.mxu1 %v5795_v1 }
0x23b6   :  { %12560 = vmatpush3.msra.mxu1 %v5795_v1 }
0x23b7   :  { %12561 = vmatprep.subr.mxu1 %v5794_v3 }
0x23b8   :  { %12562 = vmatpush3.msra.mxu1 %v5794_v3 }
0x23b9   :  { %12564 = vmatmul.mubr.msk.f32.vlgmr.msra.gmra.mxu1 %vm29_vm0, %v13949_v62  ;;  %12566 = vmatprep.subr.mxu1 %v5885_v47 }
0x23ba   :  { %12567 = vmatpush3.msra.mxu1 %v5885_v47 }
0x23bb   :  { %12568 = vmatprep.subr.mxu1 %v5884_v2  ;;  %v12554_v13 = vpop.f32.mrf.mxu0 }
0x23bc   :  { %12569 = vmatpush3.msra.mxu1 %v5884_v2 }
0x23bd   :  { %12570 = vmatprep.subr.mxu1 %v5883_v20  ;;  %v5778_v10 = vpop.f32.mrf.mxu0 }
0x23be   :  { %12571 = vmatpush3.msra.mxu1 %v5883_v20 }
0x23bf   :  { %12572 = vmatprep.subr.mxu1 %v5882_v4 }
0x23c0   :  { %12573 = vmatpush3.msra.mxu1 %v5882_v4 }
0x23c1   :  { %12574 = vmatprep.subr.mxu1 %v5881_v5 }
0x23c2   :  { %12575 = vmatpush3.msra.mxu1 %v5881_v5 }
0x23c3   :  { %12576 = vmatprep.subr.mxu1 %v5880_v6 }
0x23c4   :  { %12577 = vmatpush3.msra.mxu1 %v5880_v6 }
0x23c5   :  { %12578 = vmatprep.subr.mxu1 %v5879_v53 }
0x23c6   :  { %12579 = vmatpush3.msra.mxu1 %v5879_v53 }
0x23c7   :  { %12580 = vmatprep.subr.mxu1 %v5878_v8 }
0x23c8   :  { %12581 = vmatpush3.msra.mxu1 %v5878_v8 }
0x23c9   :  { %12600 = vmatprep.subr.mxu1 %v13239_v42 }
0x2471   :  { %v12535_v14 = vpop.f32.mrf.mxu1 }
0x2472   :  { %v5784_v44 = vadd.f32 %v12554_v13, %v12535_v14 }
0x2473   :  { %v5695_v54 = vpop.f32.mrf.mxu1 }
0x2474   :  { %v5779_v16 = vadd.f32 %v5778_v10, %v5695_v54  ;;  %v14288_v18 = vadd.f32 %v11506_v15, %v5784_v44 }
0x2476   :  { %v14286_v43 = vadd.f32 %v11506_v15, %v5779_v16 }
0x2478   :  { %12582 = vmatprep.mubr.msk.f32.mxu1 %vm400_vm1, %v14286_v43 }
0x2479   :  { %12583 = vmatmul.mubr.msk.f32.vlgmr.msra.gmra.mxu1 %vm400_vm1, %v14288_v18  ;;  %v12565_v30 = vpop.f32.mrf.mxu1 }
0x247a   :  { %12602 = vmatprep.mubr.msk.f32.mxu1 %vm13240_vm2, %v13239_v42  ;;  %v14317_v29 = vadd.f32 %v12565_v30, %v11507_v27 }
0x247b   :  { %v5869_v23 = vpop.f32.mrf.mxu1 }
0x247c   :  { %v14306_v52 = vadd.f32 %v11507_v27, %v5869_v23 }
0x2539   :  { %v12584_v0 = vpop.f32.mrf.mxu1 }
0x253a   :  { %v14309_v28 = vadd.f32 %v12584_v0, %v11510_v45 }
0x253b   :  { %v5963_v17 = vpop.f32.mrf.mxu1 }
0x253c   :  { %v14299_v26 = vadd.f32 %v11510_v45, %v5963_v17 }
0x253e   :  { %12586 = vmatpush3.xpose.msk.msra.mxu0 %vm480_vm3, %v14299_v26 }
0x253f   :  { %12590 = vmatprep.subr.mxu0 %v13239_v42 }
0x2541   :  { %12588 = vmatmul.mubr.msk.f32.vlgmr.msra.gmra.mxu0 %vm480_vm3, %v14306_v52 }
0x2542   :  { %12591 = vmatpush3.xpose.msk.msra.mxu0 %vm480_vm3, %v14309_v28  ;;  %12592 = vmatprep.mubr.msk.f32.mxu0 %vm13240_vm2, %v13239_v42 }
0x2543   :  { %12595 = vmatprep.subr.mxu0 %v13239_v42 }
0x2545   :  { %12593 = vmatmul.mubr.msk.f32.vlgmr.msra.gmra.mxu0 %vm480_vm3, %v14317_v29 }
0x2546   :  { %12597 = vmatprep.mubr.msk.f32.mxu0 %vm13240_vm2, %v13239_v42 }
0x2601   :  { %v6044_v22 = vpop.f32.mrf.mxu0 }
0x2602   :  { %v6124_v24 = vsel %vm480_vm3, %v6044_v22, -inf }
0x2603   :  { %6125 = vmax.xlane.f32.xlu0 %v6124_v24  ;;  %v12589_v31 = vpop.f32.mrf.mxu0 }
0x2605   :  { %v6120_v32 = vpop.f32.mrf.mxu0 }
0x2606   :  { %v6127_v48 = vsel %vm480_vm3, %v6120_v32, -inf }
0x2607   :  { %6128 = vmax.xlane.f32.xlu1 %v6127_v48  ;;  %v12594_v37 = vpop.f32.mrf.mxu0 }
0x2618   :  { %6146 = vrot.lane.b32.xlu1 %v14299_v26, %s13238_s19 }
0x2619   :  { %6222 = vrot.lane.b32.xlu0 %v14309_v28, %s13238_s19 }
0x261c   :  { %6300 = vrot.lane.b32.xlu1 %v14299_v26, %s13241_s26 }
0x2620   :  { %6378 = vrot.lane.b32.xlu1 %v14309_v28, %s13241_s26 }
0x2624   :  { %6376 = vrot.lane.b32.xlu1 %v14317_v29, %s13241_s26 }
0x268c   :  { %v6126_v21 = vpop.xlane.xlu0 %6125 }
0x268d   :  { %v6130_v25 = vsub.f32 %v6044_v22, %v6126_v21 }
0x268f   :  { %v6132_v38 = vmul.f32 1.442695, %v6130_v25 }
0x2690   :  { %v6223_v11 = vpop.permute.xlu0 %6222  ;;  %v6129_v39 = vpop.xlane.xlu1 %6128 }
0x2691   :  { %13120 = vpow2.f32 %v6132_v38  ;;  %v6131_v36 = vsub.f32 %v6120_v32, %v6129_v39  ;;  %12601 = vmatpush3.msra.mxu1 %v6223_v11 }
0x2692   :  { %12610 = vmatprep.subr.mxu1 %v13239_v42 }
0x2693   :  { %v6134_v49 = vmul.f32 1.442695, %v6131_v36 }
0x2694   :  { %v6147_v56 = vpop.permute.xlu1 %6146 }
0x2695   :  { %13122 = vpow2.f32 %v6134_v49  ;;  %12596 = vmatpush3.msra.mxu0 %v6147_v56 }
0x2696   :  { %12605 = vmatprep.subr.mxu0 %v13239_v42 }
0x2698   :  { %v6301_v51 = vpop.permute.xlu1 %6300 }
0x269c   :  { %v6379_v47 = vpop.permute.xlu1 %6378 }
0x269e   :  { %v13121_v57 = vpop.eup %13120 }
0x269f   :  { %v6136_v58 = vsel %vm480_vm3, %v13121_v57, 0.0 }
0x26a0   :  { %6137 = vadd.xlane.f32.xlu0 %v6136_v58  ;;  %v6377_v4 = vpop.permute.xlu1 %6376 }
0x26a2   :  { %v13123_v59 = vpop.eup %13122 }
0x26a3   :  { %v6139_v19 = vsel %vm480_vm3, %v13123_v59, 0.0 }
0x26a4   :  { %6140 = vadd.xlane.f32.xlu0 %v6139_v19 }
0x26ba   :  { %6298 = vrot.lane.b32.xlu0 %v14306_v52, %s13241_s26 }
0x2729   :  { %v6138_v60 = vpop.xlane.xlu0 %6137 }
0x272a   :  { %13124 = vrcp.f32 %v6138_v60 }
0x272d   :  { %v6141_v61 = vpop.xlane.xlu0 %6140 }
0x272e   :  { %13126 = vrcp.f32 %v6141_v61 }
0x2731   :  { %v6299_v20 = vpop.permute.xlu0 %6298 }
0x2737   :  { %v13125_v63 = vpop.eup %13124 }
0x2738   :  { %v6144_v1 = vmul.f32 %v13125_v63, %v13121_v57 }
0x273a   :  { %12598 = vmatmul.mubr.msk.f32.vlgmr.msra.gmra.mxu0 %vm480_vm3, %v6144_v1 }
0x273b   :  { %v13127_v3 = vpop.eup %13126  ;;  %12606 = vmatpush3.xpose.msk.msra.mxu0 %vm480_vm3, %v6301_v51  ;;  %12607 = vmatprep.mubr.msk.f32.mxu0 %vm13240_vm2, %v13239_v42 }
0x273c   :  { %v6145_v2 = vmul.f32 %v13127_v3, %v13123_v59  ;;  %12615 = vmatprep.subr.mxu0 %v13239_v42 }
0x273e   :  { %12603 = vmatmul.mubr.msk.f32.vlgmr.msra.gmra.mxu1 %vm480_vm3, %v6145_v2  ;;  %12608 = vmatmul.mubr.msk.f32.vlgmr.msra.gmra.mxu0 %vm480_vm3, %v6299_v20 }
0x273f   :  { %12611 = vmatpush3.xpose.msk.msra.mxu1 %vm480_vm3, %v6379_v47  ;;  %12612 = vmatprep.mubr.msk.f32.mxu1 %vm13240_vm2, %v13239_v42 }
0x2740   :  { %12620 = vmatprep.subr.mxu1 %v13239_v42  ;;  %12617 = vmatprep.mubr.msk.f32.mxu0 %vm13240_vm2, %v13239_v42 }
0x2742   :  { %12613 = vmatmul.mubr.msk.f32.vlgmr.msra.gmra.mxu1 %vm480_vm3, %v6377_v4 }
0x2743   :  { %12622 = vmatprep.mubr.msk.f32.mxu1 %vm13240_vm2, %v13239_v42 }
0x27fa   :  { %v14358_v5 = vpop.f32.mrf.mxu0 }
0x27fc   :  { %v12599_v6 = vpop.f32.mrf.mxu0 }
0x27fe   :  { %v14360_v53 = vpop.f32.mrf.mxu1  ;;  %v6372_v8 = vpop.f32.mrf.mxu0 }
0x27ff   :  { %v6454_v13 = vsel %vm480_vm3, %v6372_v8, -inf }
0x2800   :  { %v12604_v14 = vpop.f32.mrf.mxu1  ;;  %6455 = vmax.xlane.f32.xlu0 %v6454_v13  ;;  %v12609_v10 = vpop.f32.mrf.mxu0 }
0x2802   :  { %v6450_v44 = vpop.f32.mrf.mxu1 }
0x2803   :  { %v6457_v54 = vsel %vm480_vm3, %v6450_v44, -inf }
0x2804   :  { %6458 = vmax.xlane.f32.xlu1 %v6457_v54  ;;  %v12614_v15 = vpop.f32.mrf.mxu1 }
0x2815   :  { %6476 = vrot.lane.b32.xlu1 %v14299_v26, %s13242_s27 }
0x2816   :  { %6552 = vrot.lane.b32.xlu0 %v14309_v28, %s13242_s27 }
0x2819   :  { %6630 = vrot.lane.b32.xlu1 %v14299_v26, %s13243_s28 }
0x281d   :  { %6708 = vrot.lane.b32.xlu1 %v14309_v28, %s13243_s28 }
0x2821   :  { %6706 = vrot.lane.b32.xlu1 %v14317_v29, %s13243_s28 }
0x2889   :  { %v6456_v16 = vpop.xlane.xlu0 %6455 }
0x288a   :  { %v6460_v30 = vsub.f32 %v6372_v8, %v6456_v16 }
0x288c   :  { %v6462_v23 = vmul.f32 1.442695, %v6460_v30 }
0x288d   :  { %v6459_v0 = vpop.xlane.xlu1 %6458  ;;  %v6553_v45 = vpop.permute.xlu0 %6552 }
0x288e   :  { %13128 = vpow2.f32 %v6462_v23  ;;  %v6461_v17 = vsub.f32 %v6450_v44, %v6459_v0  ;;  %12621 = vmatpush3.msra.mxu1 %v6553_v45 }
0x288f   :  { %12630 = vmatprep.subr.mxu1 %v13239_v42 }
0x2890   :  { %v6464_v27 = vmul.f32 1.442695, %v6461_v17 }
0x2891   :  { %v6477_v22 = vpop.permute.xlu1 %6476 }
0x2892   :  { %13130 = vpow2.f32 %v6464_v27  ;;  %12616 = vmatpush3.msra.mxu0 %v6477_v22 }
0x2893   :  { %12625 = vmatprep.subr.mxu0 %v13239_v42 }
0x2895   :  { %v6631_v25 = vpop.permute.xlu1 %6630 }
0x2899   :  { %v6709_v36 = vpop.permute.xlu1 %6708 }
0x289b   :  { %v13129_v24 = vpop.eup %13128 }
0x289c   :  { %v6466_v31 = vsel %vm480_vm3, %v13129_v24, 0.0 }
0x289d   :  { %6467 = vadd.xlane.f32.xlu0 %v6466_v31  ;;  %v6707_v57 = vpop.permute.xlu1 %6706 }
0x289f   :  { %v13131_v32 = vpop.eup %13130 }
0x28a0   :  { %v6469_v48 = vsel %vm480_vm3, %v13131_v32, 0.0 }
0x28a1   :  { %6470 = vadd.xlane.f32.xlu0 %v6469_v48 }
0x28b7   :  { %6628 = vrot.lane.b32.xlu0 %v14306_v52, %s13243_s28 }
0x2926   :  { %v6468_v37 = vpop.xlane.xlu0 %6467 }
0x2927   :  { %13132 = vrcp.f32 %v6468_v37 }
0x292a   :  { %v6471_v21 = vpop.xlane.xlu0 %6470 }
0x292b   :  { %13134 = vrcp.f32 %v6471_v21 }
0x292e   :  { %v6629_v56 = vpop.permute.xlu0 %6628 }
0x2934   :  { %v13133_v38 = vpop.eup %13132 }
0x2935   :  { %v6474_v11 = vmul.f32 %v13133_v38, %v13129_v24 }
0x2937   :  { %12618 = vmatmul.mubr.msk.f32.vlgmr.msra.gmra.mxu0 %vm480_vm3, %v6474_v11 }
0x2938   :  { %v13135_v39 = vpop.eup %13134  ;;  %12626 = vmatpush3.xpose.msk.msra.mxu0 %vm480_vm3, %v6631_v25  ;;  %12627 = vmatprep.mubr.msk.f32.mxu0 %vm13240_vm2, %v13239_v42 }
0x2939   :  { %v6475_v49 = vmul.f32 %v13135_v39, %v13131_v32  ;;  %12635 = vmatprep.subr.mxu0 %v13239_v42 }
0x293b   :  { %12623 = vmatmul.mubr.msk.f32.vlgmr.msra.gmra.mxu1 %vm480_vm3, %v6475_v49  ;;  %12628 = vmatmul.mubr.msk.f32.vlgmr.msra.gmra.mxu0 %vm480_vm3, %v6629_v56 }
0x293c   :  { %12631 = vmatpush3.xpose.msk.msra.mxu1 %vm480_vm3, %v6709_v36  ;;  %12632 = vmatprep.mubr.msk.f32.mxu1 %vm13240_vm2, %v13239_v42 }
0x293d   :  { %12640 = vmatprep.subr.mxu1 %v13239_v42  ;;  %12637 = vmatprep.mubr.msk.f32.mxu0 %vm13240_vm2, %v13239_v42 }
0x293f   :  { %12633 = vmatmul.mubr.msk.f32.vlgmr.msra.gmra.mxu1 %vm480_vm3, %v6707_v57 }
0x2940   :  { %12642 = vmatprep.mubr.msk.f32.mxu1 %vm13240_vm2, %v13239_v42 }
0x29f7   :  { %v14396_v58 = vpop.f32.mrf.mxu0 }
0x29f9   :  { %v12619_v59 = vpop.f32.mrf.mxu0 }
0x29fb   :  { %v14398_v19 = vpop.f32.mrf.mxu1  ;;  %v6702_v60 = vpop.f32.mrf.mxu0 }
0x29fc   :  { %v6784_v61 = vsel %vm480_vm3, %v6702_v60, -inf }
0x29fd   :  { %v12624_v51 = vpop.f32.mrf.mxu1  ;;  %6785 = vmax.xlane.f32.xlu0 %v6784_v61  ;;  %v12629_v63 = vpop.f32.mrf.mxu0 }
0x29ff   :  { %v6780_v1 = vpop.f32.mrf.mxu1 }
0x2a00   :  { %v6787_v3 = vsel %vm480_vm3, %v6780_v1, -inf }
0x2a01   :  { %6788 = vmax.xlane.f32.xlu1 %v6787_v3  ;;  %v12634_v47 = vpop.f32.mrf.mxu1 }
0x2a12   :  { %6806 = vrot.lane.b32.xlu1 %v14299_v26, %s13244_s29 }
0x2a13   :  { %6882 = vrot.lane.b32.xlu0 %v14309_v28, %s13244_s29 }
0x2a16   :  { %6960 = vrot.lane.b32.xlu1 %v14299_v26, %s13245_s30 }
0x2a1a   :  { %7038 = vrot.lane.b32.xlu1 %v14309_v28, %s13245_s30 }
0x2a1e   :  { %7036 = vrot.lane.b32.xlu1 %v14317_v29, %s13245_s30 }
0x2a86   :  { %v6786_v2 = vpop.xlane.xlu0 %6785 }
0x2a87   :  { %v6790_v20 = vsub.f32 %v6702_v60, %v6786_v2 }
0x2a89   :  { %v6792_v4 = vmul.f32 1.442695, %v6790_v20 }
0x2a8a   :  { %v6789_v6 = vpop.xlane.xlu1 %6788  ;;  %v6883_v8 = vpop.permute.xlu0 %6882 }
0x2a8b   :  { %13136 = vpow2.f32 %v6792_v4  ;;  %v6791_v13 = vsub.f32 %v6780_v1, %v6789_v6  ;;  %12641 = vmatpush3.msra.mxu1 %v6883_v8  ;;  %v7320_v8 = vld [vmem:[%s15210_s1 + $0x530] sm:$0xff] }
0x2a8c   :  { %12650 = vmatprep.subr.mxu1 %v13239_v42 }
0x2a8d   :  { %v6794_v14 = vmul.f32 1.442695, %v6791_v13  ;;  %v7319_v13 = vld [vmem:[%s15210_s1 + $0x528] sm:$0xff] }
0x2a8e   :  { %v6807_v10 = vpop.permute.xlu1 %6806 }
0x2a8f   :  { %13138 = vpow2.f32 %v6794_v14  ;;  %12636 = vmatpush3.msra.mxu0 %v6807_v10  ;;  %v7318_v14 = vld [vmem:[%s15210_s1 + $0x520] sm:$0xff] }
0x2a90   :  { %12645 = vmatprep.subr.mxu0 %v13239_v42 }
0x2a92   :  { %v6961_v23 = vpop.permute.xlu1 %6960 }
0x2a96   :  { %v7039_v27 = vpop.permute.xlu1 %7038 }
0x2a98   :  { %v13137_v44 = vpop.eup %13136 }
0x2a99   :  { %v6796_v54 = vsel %vm480_vm3, %v13137_v44, 0.0 }
0x2a9a   :  { %6797 = vadd.xlane.f32.xlu0 %v6796_v54  ;;  %v7037_v24 = vpop.permute.xlu1 %7036 }
0x2a9c   :  { %v13139_v29 = vpop.eup %13138 }
0x2a9d   :  { %v6799_v15 = vsel %vm480_vm3, %v13139_v29, 0.0 }
0x2a9e   :  { %6800 = vadd.xlane.f32.xlu0 %v6799_v15 }
0x2ab4   :  { %6958 = vrot.lane.b32.xlu0 %v14306_v52, %s13245_s30 }
0x2b23   :  { %v6798_v16 = vpop.xlane.xlu0 %6797 }
0x2b24   :  { %13140 = vrcp.f32 %v6798_v16 }
0x2b27   :  { %v6801_v30 = vpop.xlane.xlu0 %6800 }
0x2b28   :  { %13142 = vrcp.f32 %v6801_v30 }
0x2b2b   :  { %v6959_v52 = vpop.permute.xlu0 %6958 }
0x2b31   :  { %v13141_v0 = vpop.eup %13140 }
0x2b32   :  { %v6804_v45 = vmul.f32 %v13141_v0, %v13137_v44 }
0x2b34   :  { %12638 = vmatmul.mubr.msk.f32.vlgmr.msra.gmra.mxu0 %vm480_vm3, %v6804_v45 }
0x2b35   :  { %v13143_v17 = vpop.eup %13142  ;;  %12646 = vmatpush3.xpose.msk.msra.mxu0 %vm480_vm3, %v6961_v23  ;;  %12647 = vmatprep.mubr.msk.f32.mxu0 %vm13240_vm2, %v13239_v42 }
0x2b36   :  { %v6805_v22 = vmul.f32 %v13143_v17, %v13139_v29  ;;  %12655 = vmatprep.subr.mxu0 %v13239_v42 }
0x2b38   :  { %12643 = vmatmul.mubr.msk.f32.vlgmr.msra.gmra.mxu1 %vm480_vm3, %v6805_v22  ;;  %12648 = vmatmul.mubr.msk.f32.vlgmr.msra.gmra.mxu0 %vm480_vm3, %v6959_v52 }
0x2b39   :  { %12651 = vmatpush3.xpose.msk.msra.mxu1 %vm480_vm3, %v7039_v27  ;;  %12652 = vmatprep.mubr.msk.f32.mxu1 %vm13240_vm2, %v13239_v42 }
0x2b3a   :  { %12660 = vmatprep.subr.mxu1 %v13239_v42  ;;  %12657 = vmatprep.mubr.msk.f32.mxu0 %vm13240_vm2, %v13239_v42 }
0x2b3c   :  { %12653 = vmatmul.mubr.msk.f32.vlgmr.msra.gmra.mxu1 %vm480_vm3, %v7037_v24 }
0x2b3d   :  { %12662 = vmatprep.mubr.msk.f32.mxu1 %vm13240_vm2, %v13239_v42 }
0x2bf4   :  { %v6878_v31 = vpop.f32.mrf.mxu0 }
0x2bf6   :  { %v12639_v32 = vpop.f32.mrf.mxu0 }
0x2bf8   :  { %v6954_v48 = vpop.f32.mrf.mxu1  ;;  %v7032_v37 = vpop.f32.mrf.mxu0 }
0x2bf9   :  { %v7114_v21 = vsel %vm480_vm3, %v7032_v37, -inf }
0x2bfa   :  { %v12644_v25 = vpop.f32.mrf.mxu1  ;;  %7115 = vmax.xlane.f32.xlu0 %v7114_v21  ;;  %v12649_v38 = vpop.f32.mrf.mxu0 }
0x2bfc   :  { %v7110_v11 = vpop.f32.mrf.mxu1 }
0x2bfd   :  { %v7117_v39 = vsel %vm480_vm3, %v7110_v11, -inf }
0x2bfe   :  { %7118 = vmax.xlane.f32.xlu1 %v7117_v39  ;;  %v12654_v36 = vpop.f32.mrf.mxu1 }
0x2c0f   :  { %7136 = vrot.lane.b32.xlu1 %v14299_v26, %s13246_s4 }
0x2c13   :  { %7290 = vrot.lane.b32.xlu1 %v14396_v58, %s13247_s5 }
0x2c17   :  { %7292 = vrot.lane.b32.xlu1 %v14398_v19, %s13247_s5 }
0x2c1b   :  { %7300 = vrot.lane.b32.xlu1 %v6954_v48, %s13248_s0 }
0x2c83   :  { %v7116_v49 = vpop.xlane.xlu0 %7115 }
0x2c84   :  { %v7120_v56 = vsub.f32 %v7032_v37, %v7116_v49 }
0x2c86   :  { %v7122_v57 = vmul.f32 1.442695, %v7120_v56 }
0x2c87   :  { %v7119_v59 = vpop.xlane.xlu1 %7118 }
0x2c88   :  { %13144 = vpow2.f32 %v7122_v57  ;;  %v7121_v60 = vsub.f32 %v7110_v11, %v7119_v59 }
0x2c8a   :  { %v7124_v61 = vmul.f32 1.442695, %v7121_v60 }
0x2c8b   :  { %v7137_v51 = vpop.permute.xlu1 %7136 }
0x2c8c   :  { %13146 = vpow2.f32 %v7124_v61  ;;  %12656 = vmatpush3.msra.mxu0 %v7137_v51 }
0x2c8f   :  { %v7291_v15 = vpop.permute.xlu1 %7290 }
0x2c90   :  { %v7312_v23 = vsel %vm480_vm3, %v14358_v5, %v7291_v15  ;;  %v11537_v5 = vld [vmem:[%s15212_s2 + $0x27] ss:$0 sm:$0xff]  ;;  %v11540_v15 = vld [vmem:[%s15212_s2 + $0x2a] ss:$0 sm:$0xff] }
0x2c93   :  { %v7293_v16 = vpop.permute.xlu1 %7292 }
0x2c94   :  { %v7313_v22 = vsel %vm480_vm3, %v14360_v53, %v7293_v16 }
0x2c95   :  { %v13145_v63 = vpop.eup %13144 }
0x2c96   :  { %v7126_v26 = vsel %vm480_vm3, %v13145_v63, 0.0 }
0x2c97   :  { %7127 = vadd.xlane.f32.xlu0 %v7126_v26  ;;  %v7301_v0 = vpop.permute.xlu1 %7300 }
0x2c98   :  { %v7315_v52 = vsel %vm1823_vm5, %v7313_v22, %v7301_v0 }
0x2c99   :  { %v13147_v58 = vpop.eup %13146 }
0x2c9a   :  { %v7129_v1 = vsel %vm480_vm3, %v13147_v58, 0.0 }
0x2c9b   :  { %7130 = vadd.xlane.f32.xlu0 %v7129_v1  ;;  %v7463_v1 = vld [vmem:[%s15210_s1 + $0x558] sm:$0xff] }
0x2cb1   :  { %7212 = vrot.lane.b32.xlu0 %v14309_v28, %s13246_s4  ;;  %v7321_v28 = vld [vmem:[%s15210_s1 + $0x538] sm:$0xff] }
0x2cb2   :  { %12665 = vmatprep.subr.mxu0 %v7321_v28 }
0x2cb5   :  { %7298 = vrot.lane.b32.xlu0 %v6878_v31, %s13248_s0 }
0x2d20   :  { %v7128_v19 = vpop.xlane.xlu0 %7127 }
0x2d21   :  { %13148 = vrcp.f32 %v7128_v19  ;;  %v7462_v19 = vld [vmem:[%s15210_s1 + $0x550] sm:$0xff] }
0x2d24   :  { %v7131_v3 = vpop.xlane.xlu0 %7130 }
0x2d25   :  { %13150 = vrcp.f32 %v7131_v3  ;;  %v7461_v3 = vld [vmem:[%s15210_s1 + $0x548] sm:$0xff] }
0x2d28   :  { %v7213_v47 = vpop.permute.xlu0 %7212 }
0x2d29   :  { %12661 = vmatpush3.msra.mxu1 %v7213_v47  ;;  %v7460_v47 = vld [vmem:[%s15210_s1 + $0x540] sm:$0xff] }
0x2d2a   :  { %12676 = vmatprep.subr.mxu1 %v7463_v1 }
0x2d2c   :  { %v7299_v30 = vpop.permute.xlu0 %7298 }
0x2d2d   :  { %v7314_v45 = vsel %vm1823_vm5, %v7312_v23, %v7299_v30  ;;  %v11541_v30 = vld [vmem:[%s15212_s2 + $0x2b] ss:$0 sm:$0xff] }
0x2d2e   :  { %v13149_v2 = vpop.eup %13148 }
0x2d2f   :  { %v7134_v20 = vmul.f32 %v13149_v2, %v13145_v63  ;;  %v7691_v2 = vld [vmem:[%s15210_s1 + $0x38] sm:$0xff] }
0x2d31   :  { %12658 = vmatmul.mubr.msk.f32.vlgmr.msra.gmra.mxu0 %vm480_vm3, %v7134_v20  ;;  %v7559_v20 = vld [vmem:[%s15210_s1 + $0x598] sm:$0xff] }
0x2d32   :  { %v13151_v4 = vpop.eup %13150  ;;  %12666 = vmatpush3.msra.mxu0 %v7321_v28  ;;  %v7556_v28 = vld [vmem:[%s15210_s1 + $0x580] sm:$0xff] }
0x2d33   :  { %v7135_v6 = vmul.f32 %v13151_v4, %v13147_v58  ;;  %12667 = vmatprep.subr.mxu0 %v7320_v8  ;;  %v7558_v4 = vld [vmem:[%s15210_s1 + $0x590] sm:$0xff] }
0x2d34   :  { %12668 = vmatpush3.msra.mxu0 %v7320_v8 }
0x2d35   :  { %12663 = vmatmul.mubr.msk.f32.vlgmr.msra.gmra.mxu1 %vm480_vm3, %v7135_v6  ;;  %12669 = vmatprep.subr.mxu0 %v7319_v13  ;;  %v7557_v6 = vld [vmem:[%s15210_s1 + $0x588] sm:$0xff] }
0x2d36   :  { %12670 = vmatpush3.msra.mxu0 %v7319_v13  ;;  %12677 = vmatpush3.msra.mxu1 %v7463_v1 }
0x2d37   :  { %12671 = vmatprep.subr.mxu0 %v7318_v14  ;;  %12678 = vmatprep.subr.mxu1 %v7462_v19 }
0x2d38   :  { %12672 = vmatpush3.msra.mxu0 %v7318_v14  ;;  %12679 = vmatpush3.msra.mxu1 %v7462_v19 }
0x2d39   :  { %12680 = vmatprep.subr.mxu1 %v7461_v3  ;;  %12687 = vmatprep.subr.mxu0 %v7559_v20 }
0x2d3a   :  { %12681 = vmatpush3.msra.mxu1 %v7461_v3  ;;  %v11545_v3 = vld [vmem:[%s15212_s2 + $0x29] ss:$0 sm:$0xff] }
0x2d3b   :  { %12682 = vmatprep.subr.mxu1 %v7460_v47 }
0x2d3c   :  { %12683 = vmatpush3.msra.mxu1 %v7460_v47 }
0x2d3d   :  { %12706 = vmatprep.subr.mxu1 %v7691_v2 }
0x2df1   :  { %v7208_v10 = vpop.f32.mrf.mxu0 }
0x2df2   :  { %7306 = vrot.lane.b32.xlu0 %v7208_v10, %s13249_s14 }
0x2df3   :  { %v12659_v44 = vpop.f32.mrf.mxu0 }
0x2df5   :  { %v7284_v54 = vpop.f32.mrf.mxu1 }
0x2df6   :  { %7308 = vrot.lane.b32.xlu1 %v7284_v54, %s13249_s14  ;;  %7412 = vrot.lane.b32.xlu0 %v14286_v43, %s13238_s19 }
0x2df7   :  { %v12664_v29 = vpop.f32.mrf.mxu1 }
0x2dfa   :  { %7414 = vrot.lane.b32.xlu1 %v14288_v18, %s13238_s19 }
0x2e64   :  { %v7307_v17 = vpop.permute.xlu0 %7306 }
0x2e65   :  { %v7316_v27 = vsel %vm1826_vm4, %v7314_v45, %v7307_v17 }
0x2e66   :  { %12673 = vmatprep.mubr.msk.f32.mxu0 %vm29_vm0, %v7316_v27 }
0x2e68   :  { %v7309_v24 = vpop.permute.xlu1 %7308  ;;  %v7413_v49 = vpop.permute.xlu0 %7412 }
0x2e69   :  { %v7317_v31 = vsel %vm1826_vm4, %v7315_v52, %v7309_v24  ;;  %v7690_v52 = vld [vmem:[%s15210_s1 + $0x30] sm:$0xff]  ;;  %v7689_v24 = vld [vmem:[%s15210_s1 + $0x28] sm:$0xff] }
0x2e6a   :  { %12674 = vmatmul.mubr.msk.f32.vlgmr.msra.gmra.mxu0 %vm29_vm0, %v7317_v31  ;;  %v7688_v31 = vld [vmem:[%s15210_s1 + $0x20] sm:$0xff] }
0x2e6b   :  { %12688 = vmatpush3.msra.mxu0 %v7559_v20 }
0x2e6c   :  { %v7415_v11 = vpop.permute.xlu1 %7414  ;;  %12689 = vmatprep.subr.mxu0 %v7558_v4 }
0x2e6d   :  { %12690 = vmatpush3.msra.mxu0 %v7558_v4 }
0x2e6e   :  { %12691 = vmatprep.subr.mxu0 %v7557_v6 }
0x2e6f   :  { %12692 = vmatpush3.msra.mxu0 %v7557_v6 }
0x2e70   :  { %12693 = vmatprep.subr.mxu0 %v7556_v28 }
0x2e71   :  { %12694 = vmatpush3.msra.mxu0 %v7556_v28 }
0x2f2a   :  { %v12675_v32 = vpop.f32.mrf.mxu0 }
0x2f2b   :  { %v7405_v48 = vadd.f32 %v12675_v32, %v11537_v5  ;;  %v7782_v32 = vld [vmem:[%s15210_s1 + $0x70] sm:$0xff] }
0x2f2c   :  { %v7399_v37 = vpop.f32.mrf.mxu0 }
0x2f2d   :  { %v7409_v21 = vadd.f32 %v7405_v48, %v13949_v62  ;;  %v7400_v25 = vadd.f32 %v11537_v5, %v7399_v37  ;;  %v7783_v5 = vld [vmem:[%s15210_s1 + $0x78] sm:$0xff]  ;;  %v7781_v48 = vld [vmem:[%s15210_s1 + $0x68] sm:$0xff]  ;;  %v7780_v37 = vld [vmem:[%s15210_s1 + $0x60] sm:$0xff] }
0x2f2f   :  { %v7411_v38 = vadd.f32 %v7409_v21, %v14288_v18  ;;  %v7408_v53 = vadd.f32 %v7400_v25, %v13930_v12  ;;  %v7779_v21 = vld [vmem:[%s15210_s1 + $0x58] sm:$0xff]  ;;  %v7777_v25 = vld [vmem:[%s15210_s1 + $0x48] sm:$0xff] }
0x2f31   :  { %v7410_v39 = vadd.f32 %v7408_v53, %v14286_v43  ;;  %v7419_v36 = vadd.f32 %v7415_v11, %v7411_v38  ;;  %v7776_v38 = vld [vmem:[%s15210_s1 + $0x40] sm:$0xff]  ;;  %v7555_v53 = vld [vmem:[%s15210_s1 + $0x578] sm:$0xff]  ;;  %v7554_v11 = vld [vmem:[%s15210_s1 + $0x570] sm:$0xff] }
0x2f32   :  { %12695 = vmatprep.subr.mxu0 %v7555_v53 }
0x2f33   :  { %v7423_v56 = vsel %vm29_vm0, %v7419_v36, 0.0  ;;  %v7418_v57 = vadd.f32 %v7413_v49, %v7410_v39  ;;  %12696 = vmatpush3.msra.mxu0 %v7555_v53  ;;  %v7552_v39 = vld [vmem:[%s15210_s1 + $0x560] sm:$0xff] }
0x2f34   :  { %7424 = vadd.xlane.f32.xlu1 %v7423_v56  ;;  %12697 = vmatprep.subr.mxu0 %v7554_v11 }
0x2f35   :  { %v7420_v59 = vsel %vm29_vm0, %v7418_v57, 0.0  ;;  %12698 = vmatpush3.msra.mxu0 %v7554_v11 }
0x2f36   :  { %7421 = vadd.xlane.f32.xlu0 %v7420_v59 }
0x2fbd   :  { %v7425_v60 = vpop.xlane.xlu1 %7424 }
0x2fbe   :  { %v7427_v61 = vmul.f32 0.03125, %v7425_v60 }
0x2fbf   :  { %v7422_v62 = vpop.xlane.xlu0 %7421 }
0x2fc0   :  { %v7426_v51 = vmul.f32 0.03125, %v7422_v62  ;;  %v7429_v63 = vsub.f32 %v7419_v36, %v7427_v61  ;;  %v11542_v36 = vld [vmem:[%s15212_s2 + $0x28] ss:$0 sm:$0xff] }
0x2fc2   :  { %v7428_v18 = vsub.f32 %v7418_v57, %v7426_v51  ;;  %v7431_v58 = vmul.f32 %v7429_v63, %v7429_v63 }
0x2fc4   :  { %v7430_v26 = vmul.f32 %v7428_v18, %v7428_v18  ;;  %v7435_v43 = vsel %vm29_vm0, %v7431_v58, 0.0  ;;  %v11550_v58 = vld [vmem:[%s15212_s2 + $0x1] ss:$0 sm:$0xff] }
0x2fc6   :  { %v7432_v12 = vsel %vm29_vm0, %v7430_v26, 0.0 }
0x2fc7   :  { %7433 = vadd.xlane.f32.xlu0 %v7432_v12 }
0x2fcb   :  { %7436 = vadd.xlane.f32.xlu0 %v7435_v43 }
0x3050   :  { %v7434_v8 = vpop.xlane.xlu0 %7433 }
0x3051   :  { %v7438_v13 = vmul.f32 0.03125, %v7434_v8 }
0x3053   :  { %v7440_v14 = vadd.f32 1e-12, %v7438_v13 }
0x3054   :  { %v7437_v10 = vpop.xlane.xlu0 %7436 }
0x3055   :  { %13152 = vrsqrt.f32 %v7440_v14  ;;  %v7439_v44 = vmul.f32 0.03125, %v7437_v10 }
0x3057   :  { %v7441_v54 = vadd.f32 1e-12, %v7439_v44 }
0x3059   :  { %13154 = vrsqrt.f32 %v7441_v54 }
0x3062   :  { %v13153_v29 = vpop.eup %13152 }
0x3063   :  { %v7444_v16 = vmul.f32 %v13153_v29, %v7428_v18  ;;  %v11553_v18 = vld [vmem:[%s15212_s2 + $0x2] ss:$0 sm:$0xff] }
0x3065   :  { %v7451_v23 = vmul.f32 %v11540_v15, %v7444_v16 }
0x3066   :  { %v13155_v0 = vpop.eup %13154 }
0x3067   :  { %v7445_v45 = vmul.f32 %v13155_v0, %v7429_v63  ;;  %v14522_v17 = vadd.f32 %v11541_v30, %v7451_v23 }
0x3069   :  { %v7452_v27 = vmul.f32 %v11540_v15, %v7445_v45  ;;  %12684 = vmatprep.mubr.msk.f32.mxu1 %vm29_vm0, %v14522_v17 }
0x306b   :  { %v14526_v22 = vadd.f32 %v11541_v30, %v7452_v27 }
0x306d   :  { %12685 = vmatmul.mubr.msk.f32.vlgmr.msra.gmra.mxu1 %vm29_vm0, %v14526_v22 }
0x306e   :  { %12707 = vmatpush3.msra.mxu1 %v7691_v2  ;;  %12714 = vmatprep.mubr.msk.f32.mxu1 %vm29_vm0, %v13369_v33 }
0x306f   :  { %12708 = vmatprep.subr.mxu1 %v7690_v52 }
0x3070   :  { %12709 = vmatpush3.msra.mxu1 %v7690_v52 }
0x3071   :  { %12710 = vmatprep.subr.mxu1 %v7689_v24 }
0x3072   :  { %12711 = vmatpush3.msra.mxu1 %v7689_v24 }
0x3073   :  { %12712 = vmatprep.subr.mxu1 %v7688_v31 }
0x3074   :  { %12713 = vmatpush3.msra.mxu1 %v7688_v31 }
0x3075   :  { %12715 = vmatmul.mubr.msk.f32.vlgmr.msra.gmra.mxu1 %vm29_vm0, %v13373_v34  ;;  %12717 = vmatprep.subr.mxu1 %v7783_v5 }
0x3076   :  { %12718 = vmatpush3.msra.mxu1 %v7783_v5  ;;  %12733 = vmatprep.mubr.msk.f32.mxu1 %vm400_vm1, %v14201_v35  ;;  %v7778_v35 = vld [vmem:[%s15210_s1 + $0x50] sm:$0xff] }
0x3077   :  { %12719 = vmatprep.subr.mxu1 %v7782_v32 }
0x3078   :  { %12720 = vmatpush3.msra.mxu1 %v7782_v32 }
0x3079   :  { %12721 = vmatprep.subr.mxu1 %v7781_v48 }
0x307a   :  { %12722 = vmatpush3.msra.mxu1 %v7781_v48 }
0x307b   :  { %12723 = vmatprep.subr.mxu1 %v7780_v37 }
0x307c   :  { %12724 = vmatpush3.msra.mxu1 %v7780_v37 }
0x307d   :  { %12725 = vmatprep.subr.mxu1 %v7779_v21 }
0x307e   :  { %12726 = vmatpush3.msra.mxu1 %v7779_v21 }
0x307f   :  { %12727 = vmatprep.subr.mxu1 %v7778_v35 }
0x3080   :  { %12728 = vmatpush3.msra.mxu1 %v7778_v35 }
0x3081   :  { %12729 = vmatprep.subr.mxu1 %v7777_v25 }
0x3082   :  { %12730 = vmatpush3.msra.mxu1 %v7777_v25 }
0x3083   :  { %12731 = vmatprep.subr.mxu1 %v7776_v38 }
0x3084   :  { %12732 = vmatpush3.msra.mxu1 %v7776_v38 }
0x3085   :  { %12734 = vmatmul.mubr.msk.f32.vlgmr.msra.gmra.mxu1 %vm400_vm1, %v14224_v55  ;;  %12751 = vmatprep.subr.mxu1 %v13239_v42  ;;  %v7553_v55 = vld [vmem:[%s15210_s1 + $0x568] sm:$0xff] }
0x3086   :  { %12753 = vmatprep.mubr.msk.f32.mxu1 %vm13240_vm2, %v13239_v42  ;;  %12699 = vmatprep.subr.mxu0 %v7553_v55 }
0x3087   :  { %12700 = vmatpush3.msra.mxu0 %v7553_v55 }
0x3088   :  { %12701 = vmatprep.subr.mxu0 %v7552_v39 }
0x3089   :  { %12702 = vmatpush3.msra.mxu0 %v7552_v39 }
0x308a   :  { %12736 = vmatprep.subr.mxu0 %v13239_v42 }
0x312d   :  { %v12686_v49 = vpop.f32.mrf.mxu1 }
0x312e   :  { %v7547_v56 = vadd.f32 %v12686_v49, %v11542_v36 }
0x312f   :  { %v7541_v57 = vpop.f32.mrf.mxu1 }
0x3130   :  { %v7542_v59 = vadd.f32 %v11542_v36, %v7541_v57  ;;  %v7551_v61 = vmax.f32 %v7547_v56, 0.0 }
0x3132   :  { %v7550_v60 = vmax.f32 %v7542_v59, 0.0 }
0x3134   :  { %12703 = vmatprep.mubr.msk.f32.mxu0 %vm400_vm1, %v7550_v60 }
0x3135   :  { %12704 = vmatmul.mubr.msk.f32.vlgmr.msra.gmra.mxu0 %vm400_vm1, %v7551_v61  ;;  %v12716_v62 = vpop.f32.mrf.mxu1 }
0x3136   :  { %12738 = vmatprep.mubr.msk.f32.mxu0 %vm13240_vm2, %v13239_v42  ;;  %v14615_v19 = vadd.f32 %v12716_v62, %v11550_v58 }
0x3137   :  { %v7767_v51 = vpop.f32.mrf.mxu1 }
0x3138   :  { %v14604_v43 = vadd.f32 %v11550_v58, %v7767_v51 }
0x3145   :  { %v12735_v63 = vpop.f32.mrf.mxu1 }
0x3146   :  { %v14607_v1 = vadd.f32 %v12735_v63, %v11553_v18 }
0x3147   :  { %v7855_v26 = vpop.f32.mrf.mxu1 }
0x3148   :  { %v14597_v12 = vadd.f32 %v11553_v18, %v7855_v26 }
0x314a   :  { %12737 = vmatpush3.xpose.msk.msra.mxu0 %vm480_vm3, %v14597_v12 }
0x314b   :  { %12741 = vmatprep.subr.mxu0 %v13239_v42 }
0x314d   :  { %12739 = vmatmul.mubr.msk.f32.vlgmr.msra.gmra.mxu0 %vm480_vm3, %v14604_v43 }
0x314e   :  { %12742 = vmatpush3.xpose.msk.msra.mxu0 %vm480_vm3, %v14607_v1  ;;  %12743 = vmatprep.mubr.msk.f32.mxu0 %vm13240_vm2, %v13239_v42 }
0x314f   :  { %12746 = vmatprep.subr.mxu0 %v13239_v42 }
0x3151   :  { %12744 = vmatmul.mubr.msk.f32.vlgmr.msra.gmra.mxu0 %vm480_vm3, %v14615_v19 }
0x3152   :  { %12748 = vmatprep.mubr.msk.f32.mxu0 %vm13240_vm2, %v13239_v42 }
0x31f5   :  { %v12705_v47 = vpop.f32.mrf.mxu0 }
0x31f6   :  { %v14625_v2 = vadd.f32 %v12705_v47, %v11545_v3 }
0x31f7   :  { %v14627_v20 = vpop.f32.mrf.mxu0 }
0x320d   :  { %v7936_v4 = vpop.f32.mrf.mxu0 }
0x320e   :  { %v8016_v6 = vsel %vm480_vm3, %v7936_v4, -inf }
0x320f   :  { %8017 = vmax.xlane.f32.xlu1 %v8016_v6  ;;  %v12740_v28 = vpop.f32.mrf.mxu0 }
0x3211   :  { %v8012_v8 = vpop.f32.mrf.mxu0 }
0x3212   :  { %v8019_v13 = vsel %vm480_vm3, %v8012_v8, -inf }
0x3213   :  { %8020 = vmax.xlane.f32.xlu0 %v8019_v13  ;;  %v12745_v14 = vpop.f32.mrf.mxu0 }
0x3220   :  { %8038 = vrot.lane.b32.xlu1 %v14597_v12, %s13238_s19 }
0x3224   :  { %8192 = vrot.lane.b32.xlu1 %v14597_v12, %s13241_s26 }
0x3228   :  { %8270 = vrot.lane.b32.xlu1 %v14607_v1, %s13241_s26 }
0x3229   :  { %8114 = vrot.lane.b32.xlu0 %v14607_v1, %s13238_s19 }
0x3298   :  { %v8018_v10 = vpop.xlane.xlu1 %8017 }
0x3299   :  { %v8022_v44 = vsub.f32 %v7936_v4, %v8018_v10 }
0x329b   :  { %v8024_v54 = vmul.f32 1.442695, %v8022_v44 }
0x329c   :  { %v8039_v29 = vpop.permute.xlu1 %8038  ;;  %v8021_v15 = vpop.xlane.xlu0 %8020 }
0x329d   :  { %13156 = vpow2.f32 %v8024_v54  ;;  %v8023_v16 = vsub.f32 %v8012_v8, %v8021_v15  ;;  %12747 = vmatpush3.msra.mxu0 %v8039_v29 }
0x329e   :  { %12756 = vmatprep.subr.mxu0 %v13239_v42 }
0x329f   :  { %v8026_v30 = vmul.f32 1.442695, %v8023_v16 }
0x32a0   :  { %v8115_v23 = vpop.permute.xlu0 %8114  ;;  %v8193_v24 = vpop.permute.xlu1 %8192 }
0x32a1   :  { %13158 = vpow2.f32 %v8026_v30  ;;  %12752 = vmatpush3.msra.mxu1 %v8115_v23 }
0x32a2   :  { %12761 = vmatprep.subr.mxu1 %v13239_v42 }
0x32a4   :  { %v8271_v31 = vpop.permute.xlu1 %8270 }
0x32aa   :  { %v13157_v0 = vpop.eup %13156 }
0x32ab   :  { %v8028_v45 = vsel %vm480_vm3, %v13157_v0, 0.0 }
0x32ac   :  { %8029 = vadd.xlane.f32.xlu1 %v8028_v45 }
0x32ae   :  { %v13159_v27 = vpop.eup %13158 }
0x32af   :  { %v8031_v52 = vsel %vm480_vm3, %v13159_v27, 0.0 }
0x32b0   :  { %8032 = vadd.xlane.f32.xlu0 %v8031_v52 }
0x32bd   :  { %8268 = vrot.lane.b32.xlu1 %v14615_v19, %s13241_s26 }
0x32c6   :  { %8190 = vrot.lane.b32.xlu0 %v14604_v43, %s13241_s26 }
0x3335   :  { %v8030_v5 = vpop.xlane.xlu1 %8029 }
0x3336   :  { %13160 = vrcp.f32 %v8030_v5 }
0x3339   :  { %v8033_v32 = vpop.xlane.xlu0 %8032  ;;  %v8269_v38 = vpop.permute.xlu1 %8268 }
0x333a   :  { %13162 = vrcp.f32 %v8033_v32 }
0x333d   :  { %v8191_v25 = vpop.permute.xlu0 %8190 }
0x3343   :  { %v13161_v48 = vpop.eup %13160 }
0x3344   :  { %v8036_v37 = vmul.f32 %v13161_v48, %v13157_v0 }
0x3346   :  { %12749 = vmatmul.mubr.msk.f32.vlgmr.msra.gmra.mxu0 %vm480_vm3, %v8036_v37 }
0x3347   :  { %v13163_v21 = vpop.eup %13162  ;;  %12757 = vmatpush3.xpose.msk.msra.mxu0 %vm480_vm3, %v8193_v24  ;;  %12758 = vmatprep.mubr.msk.f32.mxu0 %vm13240_vm2, %v13239_v42 }
0x3348   :  { %v8037_v35 = vmul.f32 %v13163_v21, %v13159_v27  ;;  %12766 = vmatprep.subr.mxu0 %v13239_v42 }
0x334a   :  { %12754 = vmatmul.mubr.msk.f32.vlgmr.msra.gmra.mxu1 %vm480_vm3, %v8037_v35  ;;  %12759 = vmatmul.mubr.msk.f32.vlgmr.msra.gmra.mxu0 %vm480_vm3, %v8191_v25 }
0x334b   :  { %12762 = vmatpush3.xpose.msk.msra.mxu1 %vm480_vm3, %v8271_v31  ;;  %12763 = vmatprep.mubr.msk.f32.mxu1 %vm13240_vm2, %v13239_v42 }
0x334c   :  { %12771 = vmatprep.subr.mxu1 %v13239_v42  ;;  %12768 = vmatprep.mubr.msk.f32.mxu0 %vm13240_vm2, %v13239_v42 }
0x334e   :  { %12764 = vmatmul.mubr.msk.f32.vlgmr.msra.gmra.mxu1 %vm480_vm3, %v8269_v38 }
0x334f   :  { %12773 = vmatprep.mubr.msk.f32.mxu1 %vm13240_vm2, %v13239_v42 }
0x3406   :  { %v14663_v53 = vpop.f32.mrf.mxu0 }
0x3408   :  { %v12750_v11 = vpop.f32.mrf.mxu0 }
0x340a   :  { %v14665_v55 = vpop.f32.mrf.mxu1  ;;  %v8264_v39 = vpop.f32.mrf.mxu0 }
0x340b   :  { %v8346_v36 = vsel %vm480_vm3, %v8264_v39, -inf }
0x340c   :  { %v12755_v49 = vpop.f32.mrf.mxu1  ;;  %8347 = vmax.xlane.f32.xlu0 %v8346_v36  ;;  %v12760_v56 = vpop.f32.mrf.mxu0 }
0x340e   :  { %v8342_v57 = vpop.f32.mrf.mxu1 }
0x340f   :  { %v8349_v59 = vsel %vm480_vm3, %v8342_v57, -inf }
0x3410   :  { %8350 = vmax.xlane.f32.xlu1 %v8349_v59  ;;  %v12765_v60 = vpop.f32.mrf.mxu1 }
0x3421   :  { %8368 = vrot.lane.b32.xlu1 %v14597_v12, %s13242_s27 }
0x3422   :  { %8444 = vrot.lane.b32.xlu0 %v14607_v1, %s13242_s27 }
0x3425   :  { %8522 = vrot.lane.b32.xlu1 %v14597_v12, %s13243_s28 }
0x3429   :  { %8600 = vrot.lane.b32.xlu1 %v14607_v1, %s13243_s28 }
0x342d   :  { %8598 = vrot.lane.b32.xlu1 %v14615_v19, %s13243_s28 }
0x3495   :  { %v8348_v61 = vpop.xlane.xlu0 %8347 }
0x3496   :  { %v8352_v62 = vsub.f32 %v8264_v39, %v8348_v61 }
0x3498   :  { %v8354_v51 = vmul.f32 1.442695, %v8352_v62 }
0x3499   :  { %v8351_v63 = vpop.xlane.xlu1 %8350  ;;  %v8445_v18 = vpop.permute.xlu0 %8444 }
0x349a   :  { %13164 = vpow2.f32 %v8354_v51  ;;  %v8353_v26 = vsub.f32 %v8342_v57, %v8351_v63  ;;  %12772 = vmatpush3.msra.mxu1 %v8445_v18 }
0x349b   :  { %12781 = vmatprep.subr.mxu1 %v13239_v42 }
0x349c   :  { %v8356_v58 = vmul.f32 1.442695, %v8353_v26 }
0x349d   :  { %v8369_v3 = vpop.permute.xlu1 %8368 }
0x349e   :  { %13166 = vpow2.f32 %v8356_v58  ;;  %12767 = vmatpush3.msra.mxu0 %v8369_v3 }
0x349f   :  { %12776 = vmatprep.subr.mxu0 %v13239_v42 }
0x34a1   :  { %v8523_v14 = vpop.permute.xlu1 %8522 }
0x34a5   :  { %v8601_v29 = vpop.permute.xlu1 %8600 }
0x34a7   :  { %v13165_v47 = vpop.eup %13164 }
0x34a8   :  { %v8358_v4 = vsel %vm480_vm3, %v13165_v47, 0.0 }
0x34a9   :  { %8359 = vadd.xlane.f32.xlu0 %v8358_v4  ;;  %v8599_v30 = vpop.permute.xlu1 %8598 }
0x34ab   :  { %v13167_v6 = vpop.eup %13166 }
0x34ac   :  { %v8361_v28 = vsel %vm480_vm3, %v13167_v6, 0.0 }
0x34ad   :  { %8362 = vadd.xlane.f32.xlu0 %v8361_v28 }
0x34c3   :  { %8520 = vrot.lane.b32.xlu0 %v14604_v43, %s13243_s28 }
0x3532   :  { %v8360_v8 = vpop.xlane.xlu0 %8359 }
0x3533   :  { %13168 = vrcp.f32 %v8360_v8 }
0x3536   :  { %v8363_v13 = vpop.xlane.xlu0 %8362 }
0x3537   :  { %13170 = vrcp.f32 %v8363_v13 }
0x353a   :  { %v8521_v16 = vpop.permute.xlu0 %8520 }
0x3540   :  { %v13169_v10 = vpop.eup %13168 }
0x3541   :  { %v8366_v44 = vmul.f32 %v13169_v10, %v13165_v47 }
0x3543   :  { %12769 = vmatmul.mubr.msk.f32.vlgmr.msra.gmra.mxu0 %vm480_vm3, %v8366_v44 }
0x3544   :  { %v13171_v54 = vpop.eup %13170  ;;  %12777 = vmatpush3.xpose.msk.msra.mxu0 %vm480_vm3, %v8523_v14  ;;  %12778 = vmatprep.mubr.msk.f32.mxu0 %vm13240_vm2, %v13239_v42 }
0x3545   :  { %v8367_v15 = vmul.f32 %v13171_v54, %v13167_v6  ;;  %12786 = vmatprep.subr.mxu0 %v13239_v42 }
0x3547   :  { %12774 = vmatmul.mubr.msk.f32.vlgmr.msra.gmra.mxu1 %vm480_vm3, %v8367_v15  ;;  %12779 = vmatmul.mubr.msk.f32.vlgmr.msra.gmra.mxu0 %vm480_vm3, %v8521_v16 }
0x3548   :  { %12782 = vmatpush3.xpose.msk.msra.mxu1 %vm480_vm3, %v8601_v29  ;;  %12783 = vmatprep.mubr.msk.f32.mxu1 %vm13240_vm2, %v13239_v42 }
0x3549   :  { %12791 = vmatprep.subr.mxu1 %v13239_v42  ;;  %12788 = vmatprep.mubr.msk.f32.mxu0 %vm13240_vm2, %v13239_v42 }
0x354b   :  { %12784 = vmatmul.mubr.msk.f32.vlgmr.msra.gmra.mxu1 %vm480_vm3, %v8599_v30 }
0x354c   :  { %12793 = vmatprep.mubr.msk.f32.mxu1 %vm13240_vm2, %v13239_v42 }
0x3603   :  { %v14701_v23 = vpop.f32.mrf.mxu0 }
0x3605   :  { %v12770_v0 = vpop.f32.mrf.mxu0 }
0x3607   :  { %v14703_v45 = vpop.f32.mrf.mxu1  ;;  %v8594_v27 = vpop.f32.mrf.mxu0 }
0x3608   :  { %v8676_v52 = vsel %vm480_vm3, %v8594_v27, -inf }
0x3609   :  { %v12775_v24 = vpop.f32.mrf.mxu1  ;;  %8677 = vmax.xlane.f32.xlu0 %v8676_v52  ;;  %v12780_v31 = vpop.f32.mrf.mxu0 }
0x360b   :  { %v8672_v5 = vpop.f32.mrf.mxu1 }
0x360c   :  { %v8679_v32 = vsel %vm480_vm3, %v8672_v5, -inf }
0x360d   :  { %8680 = vmax.xlane.f32.xlu1 %v8679_v32  ;;  %v12785_v48 = vpop.f32.mrf.mxu1 }
0x361e   :  { %8698 = vrot.lane.b32.xlu1 %v14597_v12, %s13244_s29 }
0x361f   :  { %8774 = vrot.lane.b32.xlu0 %v14607_v1, %s13244_s29 }
0x3622   :  { %8852 = vrot.lane.b32.xlu1 %v14597_v12, %s13245_s30 }
0x3626   :  { %8930 = vrot.lane.b32.xlu1 %v14607_v1, %s13245_s30 }
0x362a   :  { %8928 = vrot.lane.b32.xlu1 %v14615_v19, %s13245_s30 }
0x3692   :  { %v8678_v37 = vpop.xlane.xlu0 %8677 }
0x3693   :  { %v8682_v21 = vsub.f32 %v8594_v27, %v8678_v37 }
0x3695   :  { %v8684_v35 = vmul.f32 1.442695, %v8682_v21 }
0x3696   :  { %v8681_v25 = vpop.xlane.xlu1 %8680  ;;  %v8775_v38 = vpop.permute.xlu0 %8774 }
0x3697   :  { %13172 = vpow2.f32 %v8684_v35  ;;  %v8683_v11 = vsub.f32 %v8672_v5, %v8681_v25  ;;  %12792 = vmatpush3.msra.mxu1 %v8775_v38  ;;  %v9212_v35 = vld [vmem:[%s15210_s1 + $0x90] sm:$0xff]  ;;  %v9211_v25 = vld [vmem:[%s15210_s1 + $0x88] sm:$0xff]  ;;  %v9210_v38 = vld [vmem:[%s15210_s1 + $0x80] sm:$0xff] }
0x3698   :  { %12801 = vmatprep.subr.mxu1 %v13239_v42 }
0x3699   :  { %v8686_v39 = vmul.f32 1.442695, %v8683_v11  ;;  %v9307_v11 = vld [vmem:[%s15210_s1 + $0xd8] sm:$0xff] }
0x369a   :  { %v8699_v36 = vpop.permute.xlu1 %8698 }
0x369b   :  { %13174 = vpow2.f32 %v8686_v39  ;;  %12787 = vmatpush3.msra.mxu0 %v8699_v36 }
0x369c   :  { %12796 = vmatprep.subr.mxu0 %v13239_v42 }
0x369e   :  { %v8853_v61 = vpop.permute.xlu1 %8852 }
0x36a2   :  { %v8931_v18 = vpop.permute.xlu1 %8930 }
0x36a4   :  { %v13173_v49 = vpop.eup %13172 }
0x36a5   :  { %v8688_v56 = vsel %vm480_vm3, %v13173_v49, 0.0 }
0x36a6   :  { %8689 = vadd.xlane.f32.xlu0 %v8688_v56  ;;  %v8929_v58 = vpop.permute.xlu1 %8928 }
0x36a8   :  { %v13175_v19 = vpop.eup %13174 }
0x36a9   :  { %v8691_v57 = vsel %vm480_vm3, %v13175_v19, 0.0 }
0x36aa   :  { %8692 = vadd.xlane.f32.xlu0 %v8691_v57  ;;  %v9310_v57 = vld [vmem:[%s15210_s1 + $0xf0] sm:$0xff] }
0x36c0   :  { %8850 = vrot.lane.b32.xlu0 %v14604_v43, %s13245_s30 }
0x372f   :  { %v8690_v59 = vpop.xlane.xlu0 %8689 }
0x3730   :  { %13176 = vrcp.f32 %v8690_v59 }
0x3733   :  { %v8693_v60 = vpop.xlane.xlu0 %8692 }
0x3734   :  { %13178 = vrcp.f32 %v8693_v60 }
0x3737   :  { %v8851_v43 = vpop.permute.xlu0 %8850 }
0x373d   :  { %v13177_v62 = vpop.eup %13176 }
0x373e   :  { %v8696_v51 = vmul.f32 %v13177_v62, %v13173_v49 }
0x3740   :  { %12789 = vmatmul.mubr.msk.f32.vlgmr.msra.gmra.mxu0 %vm480_vm3, %v8696_v51 }
0x3741   :  { %v13179_v63 = vpop.eup %13178  ;;  %12797 = vmatpush3.xpose.msk.msra.mxu0 %vm480_vm3, %v8853_v61  ;;  %12798 = vmatprep.mubr.msk.f32.mxu0 %vm13240_vm2, %v13239_v42 }
0x3742   :  { %v8697_v26 = vmul.f32 %v13179_v63, %v13175_v19  ;;  %12806 = vmatprep.subr.mxu0 %v13239_v42  ;;  %v9311_v19 = vld [vmem:[%s15210_s1 + $0xf8] sm:$0xff] }
0x3744   :  { %12794 = vmatmul.mubr.msk.f32.vlgmr.msra.gmra.mxu1 %vm480_vm3, %v8697_v26  ;;  %12799 = vmatmul.mubr.msk.f32.vlgmr.msra.gmra.mxu0 %vm480_vm3, %v8851_v43 }
0x3745   :  { %12802 = vmatpush3.xpose.msk.msra.mxu1 %vm480_vm3, %v8931_v18  ;;  %12803 = vmatprep.mubr.msk.f32.mxu1 %vm13240_vm2, %v13239_v42 }
0x3746   :  { %12811 = vmatprep.subr.mxu1 %v13239_v42  ;;  %12808 = vmatprep.mubr.msk.f32.mxu0 %vm13240_vm2, %v13239_v42 }
0x3748   :  { %12804 = vmatmul.mubr.msk.f32.vlgmr.msra.gmra.mxu1 %vm480_vm3, %v8929_v58 }
0x3749   :  { %12813 = vmatprep.mubr.msk.f32.mxu1 %vm13240_vm2, %v13239_v42 }
0x3800   :  { %v8770_v3 = vpop.f32.mrf.mxu0 }
0x3802   :  { %v12790_v47 = vpop.f32.mrf.mxu0 }
0x3804   :  { %v8846_v4 = vpop.f32.mrf.mxu1  ;;  %v8924_v6 = vpop.f32.mrf.mxu0 }
0x3805   :  { %v9006_v28 = vsel %vm480_vm3, %v8924_v6, -inf }
0x3806   :  { %v12795_v8 = vpop.f32.mrf.mxu1  ;;  %9007 = vmax.xlane.f32.xlu0 %v9006_v28  ;;  %v12800_v13 = vpop.f32.mrf.mxu0  ;;  %v9301_v28 = vld [vmem:[%s15210_s1 + $0xa8] sm:$0xff] }
0x3807   :  { %v9300_v8 = vld [vmem:[%s15210_s1 + $0xa0] sm:$0xff]  ;;  %v9309_v13 = vld [vmem:[%s15210_s1 + $0xe8] sm:$0xff] }
0x3808   :  { %v9002_v14 = vpop.f32.mrf.mxu1 }
0x3809   :  { %v9009_v10 = vsel %vm480_vm3, %v9002_v14, -inf }
0x380a   :  { %9010 = vmax.xlane.f32.xlu1 %v9009_v10  ;;  %v12805_v44 = vpop.f32.mrf.mxu1 }
0x380b   :  { %v11580_v44 = vld [vmem:[%s15212_s2 + $0x3] ss:$0 sm:$0xff] }
0x381b   :  { %9028 = vrot.lane.b32.xlu1 %v14597_v12, %s13246_s4 }
0x381f   :  { %9182 = vrot.lane.b32.xlu1 %v14701_v23, %s13247_s5 }
0x3823   :  { %9184 = vrot.lane.b32.xlu1 %v14703_v45, %s13247_s5 }
0x3827   :  { %9192 = vrot.lane.b32.xlu1 %v8846_v4, %s13248_s0  ;;  %v9305_v4 = vld [vmem:[%s15210_s1 + $0xc8] sm:$0xff] }
0x388f   :  { %v9008_v54 = vpop.xlane.xlu0 %9007 }
0x3890   :  { %v9012_v29 = vsub.f32 %v8924_v6, %v9008_v54  ;;  %v9303_v6 = vld [vmem:[%s15210_s1 + $0xb8] sm:$0xff] }
0x3892   :  { %v9014_v15 = vmul.f32 1.442695, %v9012_v29 }
0x3893   :  { %v9011_v16 = vpop.xlane.xlu1 %9010 }
0x3894   :  { %13180 = vpow2.f32 %v9014_v15  ;;  %v9013_v30 = vsub.f32 %v9002_v14, %v9011_v16  ;;  %v9308_v14 = vld [vmem:[%s15210_s1 + $0xe0] sm:$0xff]  ;;  %v9477_v16 = vld [vmem:[%s15210_s1 + $0x110] sm:$0xff] }
0x3896   :  { %v9016_v0 = vmul.f32 1.442695, %v9013_v30  ;;  %v9476_v30 = vld [vmem:[%s15210_s1 + $0x108] sm:$0xff] }
0x3897   :  { %v9029_v27 = vpop.permute.xlu1 %9028 }
0x3898   :  { %13182 = vpow2.f32 %v9016_v0  ;;  %12807 = vmatpush3.msra.mxu0 %v9029_v27  ;;  %v9475_v0 = vld [vmem:[%s15210_s1 + $0x100] sm:$0xff]  ;;  %v9566_v27 = vld [vmem:[%s15210_s1 + $0x158] sm:$0xff] }
0x389b   :  { %v9183_v59 = vpop.permute.xlu1 %9182 }
0x389c   :  { %v9204_v62 = vsel %vm480_vm3, %v14663_v53, %v9183_v59  ;;  %v9306_v53 = vld [vmem:[%s15210_s1 + $0xd0] sm:$0xff]  ;;  %v11588_v59 = vld [vmem:[%s15212_s2 + $0x5] ss:$0 sm:$0xff] }
0x389f   :  { %v9185_v60 = vpop.permute.xlu1 %9184 }
0x38a0   :  { %v9205_v43 = vsel %vm480_vm3, %v14665_v55, %v9185_v60  ;;  %v9304_v55 = vld [vmem:[%s15210_s1 + $0xc0] sm:$0xff] }
0x38a1   :  { %v13181_v52 = vpop.eup %13180 }
0x38a2   :  { %v9018_v12 = vsel %vm480_vm3, %v13181_v52, 0.0 }
0x38a3   :  { %9019 = vadd.xlane.f32.xlu0 %v9018_v12  ;;  %v9193_v51 = vpop.permute.xlu1 %9192  ;;  %v9564_v12 = vld [vmem:[%s15210_s1 + $0x148] sm:$0xff] }
0x38a4   :  { %v9207_v58 = vsel %vm1823_vm5, %v9205_v43, %v9193_v51 }
0x38a5   :  { %v13183_v23 = vpop.eup %13182 }
0x38a6   :  { %v9021_v24 = vsel %vm480_vm3, %v13183_v23, 0.0 }
0x38a7   :  { %9022 = vadd.xlane.f32.xlu0 %v9021_v24  ;;  %v9562_v24 = vld [vmem:[%s15210_s1 + $0x138] sm:$0xff] }
0x38bd   :  { %9104 = vrot.lane.b32.xlu0 %v14607_v1, %s13246_s4  ;;  %v9213_v1 = vld [vmem:[%s15210_s1 + $0x98] sm:$0xff] }
0x38be   :  { %12816 = vmatprep.subr.mxu0 %v9213_v1 }
0x38c1   :  { %9190 = vrot.lane.b32.xlu0 %v8770_v3, %s13248_s0 }
0x392c   :  { %v9020_v45 = vpop.xlane.xlu0 %9019 }
0x392d   :  { %13184 = vrcp.f32 %v9020_v45  ;;  %v9561_v45 = vld [vmem:[%s15210_s1 + $0x130] sm:$0xff] }
0x3930   :  { %v9023_v31 = vpop.xlane.xlu0 %9022 }
0x3931   :  { %13186 = vrcp.f32 %v9023_v31  ;;  %v9560_v31 = vld [vmem:[%s15210_s1 + $0x128] sm:$0xff] }
0x3934   :  { %v9105_v5 = vpop.permute.xlu0 %9104 }
0x3935   :  { %12812 = vmatpush3.msra.mxu1 %v9105_v5  ;;  %v9559_v5 = vld [vmem:[%s15210_s1 + $0x120] sm:$0xff] }
0x3936   :  { %12827 = vmatprep.subr.mxu1 %v9311_v19 }
0x3938   :  { %v9191_v61 = vpop.permute.xlu0 %9190 }
0x3939   :  { %v9206_v63 = vsel %vm1823_vm5, %v9204_v62, %v9191_v61 }
0x393a   :  { %v13185_v32 = vpop.eup %13184 }
0x393b   :  { %v9026_v48 = vmul.f32 %v13185_v32, %v13181_v52  ;;  %v9565_v52 = vld [vmem:[%s15210_s1 + $0x150] sm:$0xff] }
0x393d   :  { %12809 = vmatmul.mubr.msk.f32.vlgmr.msra.gmra.mxu0 %vm480_vm3, %v9026_v48 }
0x393e   :  { %v13187_v37 = vpop.eup %13186  ;;  %12817 = vmatpush3.msra.mxu0 %v9213_v1 }
0x393f   :  { %v9027_v21 = vmul.f32 %v13187_v37, %v13183_v23  ;;  %12818 = vmatprep.subr.mxu0 %v9212_v35  ;;  %v9563_v23 = vld [vmem:[%s15210_s1 + $0x140] sm:$0xff] }
0x3940   :  { %12819 = vmatpush3.msra.mxu0 %v9212_v35  ;;  %v11587_v35 = vld [vmem:[%s15212_s2 + $0x4] ss:$0 sm:$0xff] }
0x3941   :  { %12814 = vmatmul.mubr.msk.f32.vlgmr.msra.gmra.mxu1 %vm480_vm3, %v9027_v21  ;;  %12820 = vmatprep.subr.mxu0 %v9211_v25 }
0x3942   :  { %12821 = vmatpush3.msra.mxu0 %v9211_v25  ;;  %12828 = vmatpush3.msra.mxu1 %v9311_v19 }
0x3943   :  { %12822 = vmatprep.subr.mxu0 %v9210_v38  ;;  %12829 = vmatprep.subr.mxu1 %v9310_v57 }
0x3944   :  { %12823 = vmatpush3.msra.mxu0 %v9210_v38  ;;  %12830 = vmatpush3.msra.mxu1 %v9310_v57 }
0x3945   :  { %12838 = vmatprep.subr.mxu0 %v9307_v11  ;;  %12831 = vmatprep.subr.mxu1 %v9309_v13 }
0x3946   :  { %12832 = vmatpush3.msra.mxu1 %v9309_v13 }
0x3947   :  { %12833 = vmatprep.subr.mxu1 %v9308_v14 }
0x3948   :  { %12834 = vmatpush3.msra.mxu1 %v9308_v14 }
0x39fd   :  { %v9100_v39 = vpop.f32.mrf.mxu0 }
0x39fe   :  { %9198 = vrot.lane.b32.xlu0 %v9100_v39, %s13249_s14 }
0x39ff   :  { %v12810_v36 = vpop.f32.mrf.mxu0 }
0x3a01   :  { %v9176_v49 = vpop.f32.mrf.mxu1 }
0x3a02   :  { %9200 = vrot.lane.b32.xlu1 %v9176_v49, %s13249_s14 }
0x3a03   :  { %v12815_v56 = vpop.f32.mrf.mxu1 }
0x3a04   :  { %v11591_v56 = vld [vmem:[%s15212_s2 + $0x6] ss:$0 sm:$0xff] }
0x3a70   :  { %v9199_v18 = vpop.permute.xlu0 %9198 }
0x3a71   :  { %v9208_v26 = vsel %vm1826_vm4, %v9206_v63, %v9199_v18 }
0x3a72   :  { %12824 = vmatprep.mubr.msk.f32.mxu0 %vm29_vm0, %v9208_v26 }
0x3a74   :  { %v9201_v3 = vpop.permute.xlu1 %9200 }
0x3a75   :  { %v9209_v47 = vsel %vm1826_vm4, %v9207_v58, %v9201_v3 }
0x3a76   :  { %12825 = vmatmul.mubr.msk.f32.vlgmr.msra.gmra.mxu0 %vm29_vm0, %v9209_v47 }
0x3a77   :  { %12839 = vmatpush3.msra.mxu0 %v9307_v11  ;;  %12854 = vmatprep.mubr.msk.f32.mxu0 %vm400_vm1, %v13388_v40  ;;  %v9302_v40 = vld [vmem:[%s15210_s1 + $0xb0] sm:$0xff] }
0x3a78   :  { %12840 = vmatprep.subr.mxu0 %v9306_v53 }
0x3a79   :  { %12841 = vmatpush3.msra.mxu0 %v9306_v53 }
0x3a7a   :  { %12842 = vmatprep.subr.mxu0 %v9305_v4 }
0x3a7b   :  { %12843 = vmatpush3.msra.mxu0 %v9305_v4 }
0x3a7c   :  { %12844 = vmatprep.subr.mxu0 %v9304_v55 }
0x3a7d   :  { %12845 = vmatpush3.msra.mxu0 %v9304_v55 }
0x3a7e   :  { %12846 = vmatprep.subr.mxu0 %v9303_v6 }
0x3a7f   :  { %12847 = vmatpush3.msra.mxu0 %v9303_v6 }
0x3a80   :  { %12848 = vmatprep.subr.mxu0 %v9302_v40 }
0x3a81   :  { %12849 = vmatpush3.msra.mxu0 %v9302_v40 }
0x3a82   :  { %12850 = vmatprep.subr.mxu0 %v9301_v28 }
0x3a83   :  { %12851 = vmatpush3.msra.mxu0 %v9301_v28 }
0x3a84   :  { %12852 = vmatprep.subr.mxu0 %v9300_v8 }
0x3a85   :  { %12853 = vmatpush3.msra.mxu0 %v9300_v8 }
0x3a86   :  { %12855 = vmatmul.mubr.msk.f32.vlgmr.msra.gmra.mxu0 %vm400_vm1, %v13392_v41  ;;  %12887 = vmatprep.subr.mxu0 %v13239_v42  ;;  %v9478_v41 = vld [vmem:[%s15210_s1 + $0x118] sm:$0xff] }
0x3a87   :  { %12889 = vmatprep.mubr.msk.f32.mxu0 %vm13240_vm2, %v13239_v42  ;;  %12857 = vmatprep.subr.mxu1 %v9478_v41 }
0x3b36   :  { %v12826_v10 = vpop.f32.mrf.mxu0 }
0x3b37   :  { %v9297_v15 = vadd.f32 %v12826_v10, %v11580_v44 }
0x3b38   :  { %v9291_v54 = vpop.f32.mrf.mxu0 }
0x3b39   :  { %v9292_v29 = vadd.f32 %v11580_v44, %v9291_v54 }
0x3b3b   :  { %12835 = vmatprep.mubr.msk.f32.mxu1 %vm29_vm0, %v9292_v29 }
0x3b3c   :  { %12836 = vmatmul.mubr.msk.f32.vlgmr.msra.gmra.mxu1 %vm29_vm0, %v9297_v15 }
0x3b3d   :  { %12858 = vmatpush3.msra.mxu1 %v9478_v41  ;;  %12865 = vmatprep.mubr.msk.f32.mxu1 %vm29_vm0, %v13369_v33 }
0x3b3e   :  { %12859 = vmatprep.subr.mxu1 %v9477_v16 }
0x3b3f   :  { %12860 = vmatpush3.msra.mxu1 %v9477_v16 }
0x3b40   :  { %12861 = vmatprep.subr.mxu1 %v9476_v30 }
0x3b41   :  { %12862 = vmatpush3.msra.mxu1 %v9476_v30 }
0x3b42   :  { %12863 = vmatprep.subr.mxu1 %v9475_v0 }
0x3b43   :  { %12864 = vmatpush3.msra.mxu1 %v9475_v0 }
0x3b44   :  { %12866 = vmatmul.mubr.msk.f32.vlgmr.msra.gmra.mxu1 %vm29_vm0, %v13373_v34  ;;  %12868 = vmatprep.subr.mxu1 %v9566_v27 }
0x3b45   :  { %12869 = vmatpush3.msra.mxu1 %v9566_v27 }
0x3b46   :  { %12870 = vmatprep.subr.mxu1 %v9565_v52  ;;  %v12856_v32 = vpop.f32.mrf.mxu0 }
0x3b47   :  { %12871 = vmatpush3.msra.mxu1 %v9565_v52 }
0x3b48   :  { %12872 = vmatprep.subr.mxu1 %v9564_v12  ;;  %v9459_v37 = vpop.f32.mrf.mxu0 }
0x3b49   :  { %12873 = vmatpush3.msra.mxu1 %v9564_v12 }
0x3b4a   :  { %12874 = vmatprep.subr.mxu1 %v9563_v23 }
0x3b4b   :  { %12875 = vmatpush3.msra.mxu1 %v9563_v23 }
0x3b4c   :  { %12876 = vmatprep.subr.mxu1 %v9562_v24 }
0x3b4d   :  { %12877 = vmatpush3.msra.mxu1 %v9562_v24 }
0x3b4e   :  { %12878 = vmatprep.subr.mxu1 %v9561_v45 }
0x3b4f   :  { %12879 = vmatpush3.msra.mxu1 %v9561_v45 }
0x3b50   :  { %12880 = vmatprep.subr.mxu1 %v9560_v31 }
0x3b51   :  { %12881 = vmatpush3.msra.mxu1 %v9560_v31 }
0x3b52   :  { %12882 = vmatprep.subr.mxu1 %v9559_v5 }
0x3b53   :  { %12883 = vmatpush3.msra.mxu1 %v9559_v5 }
0x3b54   :  { %12902 = vmatprep.subr.mxu1 %v13239_v42 }
0x3bfc   :  { %v12837_v48 = vpop.f32.mrf.mxu1 }
0x3bfd   :  { %v9465_v21 = vadd.f32 %v12856_v32, %v12837_v48 }
0x3bfe   :  { %v9384_v1 = vpop.f32.mrf.mxu1 }
0x3bff   :  { %v9460_v25 = vadd.f32 %v9459_v37, %v9384_v1  ;;  %v14873_v11 = vadd.f32 %v11587_v35, %v9465_v21 }
0x3c01   :  { %v14871_v38 = vadd.f32 %v11587_v35, %v9460_v25 }
0x3c03   :  { %12884 = vmatprep.mubr.msk.f32.mxu1 %vm400_vm1, %v14871_v38 }
0x3c04   :  { %12885 = vmatmul.mubr.msk.f32.vlgmr.msra.gmra.mxu1 %vm400_vm1, %v14873_v11  ;;  %v12867_v39 = vpop.f32.mrf.mxu1 }
0x3c05   :  { %12904 = vmatprep.mubr.msk.f32.mxu1 %vm13240_vm2, %v13239_v42  ;;  %v14902_v62 = vadd.f32 %v12867_v39, %v11588_v59 }
0x3c06   :  { %v9550_v36 = vpop.f32.mrf.mxu1 }
0x3c07   :  { %v14891_v60 = vadd.f32 %v11588_v59, %v9550_v36 }
0x3cc4   :  { %v12886_v49 = vpop.f32.mrf.mxu1 }
0x3cc5   :  { %v14894_v61 = vadd.f32 %v12886_v49, %v11591_v56 }
0x3cc6   :  { %v9644_v19 = vpop.f32.mrf.mxu1 }
0x3cc7   :  { %v14884_v57 = vadd.f32 %v11591_v56, %v9644_v19 }
0x3cc9   :  { %12888 = vmatpush3.xpose.msk.msra.mxu0 %vm480_vm3, %v14884_v57 }
0x3cca   :  { %12892 = vmatprep.subr.mxu0 %v13239_v42 }
0x3ccc   :  { %12890 = vmatmul.mubr.msk.f32.vlgmr.msra.gmra.mxu0 %vm480_vm3, %v14891_v60 }
0x3ccd   :  { %12893 = vmatpush3.xpose.msk.msra.mxu0 %vm480_vm3, %v14894_v61  ;;  %12894 = vmatprep.mubr.msk.f32.mxu0 %vm13240_vm2, %v13239_v42 }
0x3cce   :  { %12897 = vmatprep.subr.mxu0 %v13239_v42 }
0x3cd0   :  { %12895 = vmatmul.mubr.msk.f32.vlgmr.msra.gmra.mxu0 %vm480_vm3, %v14902_v62 }
0x3cd1   :  { %12899 = vmatprep.mubr.msk.f32.mxu0 %vm13240_vm2, %v13239_v42 }
0x3d8c   :  { %v9725_v51 = vpop.f32.mrf.mxu0 }
0x3d8d   :  { %v9805_v63 = vsel %vm480_vm3, %v9725_v51, -inf }
0x3d8e   :  { %9806 = vmax.xlane.f32.xlu0 %v9805_v63  ;;  %v12891_v18 = vpop.f32.mrf.mxu0 }
0x3d90   :  { %v9801_v26 = vpop.f32.mrf.mxu0 }
0x3d91   :  { %v9808_v43 = vsel %vm480_vm3, %v9801_v26, -inf }
0x3d92   :  { %9809 = vmax.xlane.f32.xlu1 %v9808_v43  ;;  %v12896_v58 = vpop.f32.mrf.mxu0 }
0x3da3   :  { %9827 = vrot.lane.b32.xlu1 %v14884_v57, %s13238_s19 }
0x3da4   :  { %9903 = vrot.lane.b32.xlu0 %v14894_v61, %s13238_s19 }
0x3da7   :  { %9981 = vrot.lane.b32.xlu1 %v14884_v57, %s13241_s26 }
0x3dab   :  { %10059 = vrot.lane.b32.xlu1 %v14894_v61, %s13241_s26 }
0x3daf   :  { %10057 = vrot.lane.b32.xlu1 %v14902_v62, %s13241_s26 }
0x3e17   :  { %v9807_v3 = vpop.xlane.xlu0 %9806 }
0x3e18   :  { %v9811_v47 = vsub.f32 %v9725_v51, %v9807_v3 }
0x3e1a   :  { %v9813_v53 = vmul.f32 1.442695, %v9811_v47 }
0x3e1b   :  { %v9904_v4 = vpop.permute.xlu0 %9903  ;;  %v9810_v55 = vpop.xlane.xlu1 %9809 }
0x3e1c   :  { %13188 = vpow2.f32 %v9813_v53  ;;  %v9812_v6 = vsub.f32 %v9801_v26, %v9810_v55  ;;  %12903 = vmatpush3.msra.mxu1 %v9904_v4 }
0x3e1d   :  { %12912 = vmatprep.subr.mxu1 %v13239_v42 }
0x3e1e   :  { %v9815_v40 = vmul.f32 1.442695, %v9812_v6 }
0x3e1f   :  { %v9828_v28 = vpop.permute.xlu1 %9827 }
0x3e20   :  { %13190 = vpow2.f32 %v9815_v40  ;;  %12898 = vmatpush3.msra.mxu0 %v9828_v28 }
0x3e21   :  { %12907 = vmatprep.subr.mxu0 %v13239_v42 }
0x3e23   :  { %v9982_v54 = vpop.permute.xlu1 %9981 }
0x3e27   :  { %v10060_v30 = vpop.permute.xlu1 %10059 }
0x3e29   :  { %v13189_v8 = vpop.eup %13188 }
0x3e2a   :  { %v9817_v13 = vsel %vm480_vm3, %v13189_v8, 0.0 }
0x3e2b   :  { %9818 = vadd.xlane.f32.xlu0 %v9817_v13  ;;  %v10058_v52 = vpop.permute.xlu1 %10057 }
0x3e2d   :  { %v13191_v14 = vpop.eup %13190 }
0x3e2e   :  { %v9820_v41 = vsel %vm480_vm3, %v13191_v14, 0.0 }
0x3e2f   :  { %9821 = vadd.xlane.f32.xlu0 %v9820_v41 }
0x3e45   :  { %9979 = vrot.lane.b32.xlu0 %v14891_v60, %s13241_s26 }
0x3eb4   :  { %v9819_v10 = vpop.xlane.xlu0 %9818 }
0x3eb5   :  { %13192 = vrcp.f32 %v9819_v10 }
0x3eb8   :  { %v9822_v44 = vpop.xlane.xlu0 %9821 }
0x3eb9   :  { %13194 = vrcp.f32 %v9822_v44 }
0x3ebc   :  { %v9980_v27 = vpop.permute.xlu0 %9979 }
0x3ec2   :  { %v13193_v29 = vpop.eup %13192 }
0x3ec3   :  { %v9825_v15 = vmul.f32 %v13193_v29, %v13189_v8 }
0x3ec5   :  { %12900 = vmatmul.mubr.msk.f32.vlgmr.msra.gmra.mxu0 %vm480_vm3, %v9825_v15 }
0x3ec6   :  { %v13195_v16 = vpop.eup %13194  ;;  %12908 = vmatpush3.xpose.msk.msra.mxu0 %vm480_vm3, %v9982_v54  ;;  %12909 = vmatprep.mubr.msk.f32.mxu0 %vm13240_vm2, %v13239_v42 }
0x3ec7   :  { %v9826_v0 = vmul.f32 %v13195_v16, %v13191_v14  ;;  %12917 = vmatprep.subr.mxu0 %v13239_v42 }
0x3ec9   :  { %12905 = vmatmul.mubr.msk.f32.vlgmr.msra.gmra.mxu1 %vm480_vm3, %v9826_v0  ;;  %12910 = vmatmul.mubr.msk.f32.vlgmr.msra.gmra.mxu0 %vm480_vm3, %v9980_v27 }
0x3eca   :  { %12913 = vmatpush3.xpose.msk.msra.mxu1 %vm480_vm3, %v10060_v30  ;;  %12914 = vmatprep.mubr.msk.f32.mxu1 %vm13240_vm2, %v13239_v42 }
0x3ecb   :  { %12922 = vmatprep.subr.mxu1 %v13239_v42  ;;  %12919 = vmatprep.mubr.msk.f32.mxu0 %vm13240_vm2, %v13239_v42 }
0x3ecd   :  { %12915 = vmatmul.mubr.msk.f32.vlgmr.msra.gmra.mxu1 %vm480_vm3, %v10058_v52 }
0x3ece   :  { %12924 = vmatprep.mubr.msk.f32.mxu1 %vm13240_vm2, %v13239_v42 }
0x3f85   :  { %v14943_v12 = vpop.f32.mrf.mxu0 }
0x3f87   :  { %v12901_v23 = vpop.f32.mrf.mxu0 }
0x3f89   :  { %v14945_v24 = vpop.f32.mrf.mxu1  ;;  %v10053_v45 = vpop.f32.mrf.mxu0 }
0x3f8a   :  { %v10135_v31 = vsel %vm480_vm3, %v10053_v45, -inf }
0x3f8b   :  { %v12906_v5 = vpop.f32.mrf.mxu1  ;;  %10136 = vmax.xlane.f32.xlu0 %v10135_v31  ;;  %v12911_v32 = vpop.f32.mrf.mxu0 }
0x3f8d   :  { %v10131_v48 = vpop.f32.mrf.mxu1 }
0x3f8e   :  { %v10138_v37 = vsel %vm480_vm3, %v10131_v48, -inf }
0x3f8f   :  { %10139 = vmax.xlane.f32.xlu1 %v10138_v37  ;;  %v12916_v21 = vpop.f32.mrf.mxu1 }
0x3fa0   :  { %10157 = vrot.lane.b32.xlu1 %v14884_v57, %s13242_s27 }
0x3fa1   :  { %10233 = vrot.lane.b32.xlu0 %v14894_v61, %s13242_s27 }
0x3fa4   :  { %10311 = vrot.lane.b32.xlu1 %v14884_v57, %s13243_s28 }
0x3fa8   :  { %10389 = vrot.lane.b32.xlu1 %v14894_v61, %s13243_s28 }
0x3fac   :  { %10387 = vrot.lane.b32.xlu1 %v14902_v62, %s13243_s28 }
0x4014   :  { %v10137_v1 = vpop.xlane.xlu0 %10136 }
0x4015   :  { %v10141_v35 = vsub.f32 %v10053_v45, %v10137_v1 }
0x4017   :  { %v10143_v25 = vmul.f32 1.442695, %v10141_v35 }
0x4018   :  { %v10140_v39 = vpop.xlane.xlu1 %10139  ;;  %v10234_v36 = vpop.permute.xlu0 %10233 }
0x4019   :  { %13196 = vpow2.f32 %v10143_v25  ;;  %v10142_v49 = vsub.f32 %v10131_v48, %v10140_v39  ;;  %12923 = vmatpush3.msra.mxu1 %v10234_v36 }
0x401a   :  { %12932 = vmatprep.subr.mxu1 %v13239_v42 }
0x401b   :  { %v10145_v56 = vmul.f32 1.442695, %v10142_v49 }
0x401c   :  { %v10158_v19 = vpop.permute.xlu1 %10157 }
0x401d   :  { %13198 = vpow2.f32 %v10145_v56  ;;  %12918 = vmatpush3.msra.mxu0 %v10158_v19 }
0x401e   :  { %12927 = vmatprep.subr.mxu0 %v13239_v42 }
0x4020   :  { %v10312_v58 = vpop.permute.xlu1 %10311 }
0x4024   :  { %v10390_v4 = vpop.permute.xlu1 %10389 }
0x4026   :  { %v13197_v59 = vpop.eup %13196 }
0x4027   :  { %v10147_v51 = vsel %vm480_vm3, %v13197_v59, 0.0 }
0x4028   :  { %10148 = vadd.xlane.f32.xlu0 %v10147_v51  ;;  %v10388_v40 = vpop.permute.xlu1 %10387 }
0x402a   :  { %v13199_v63 = vpop.eup %13198 }
0x402b   :  { %v10150_v18 = vsel %vm480_vm3, %v13199_v63, 0.0 }
0x402c   :  { %10151 = vadd.xlane.f32.xlu0 %v10150_v18 }
0x4042   :  { %10309 = vrot.lane.b32.xlu0 %v14891_v60, %s13243_s28 }
0x40b1   :  { %v10149_v26 = vpop.xlane.xlu0 %10148 }
0x40b2   :  { %13200 = vrcp.f32 %v10149_v26 }
0x40b5   :  { %v10152_v43 = vpop.xlane.xlu0 %10151 }
0x40b6   :  { %13202 = vrcp.f32 %v10152_v43 }
0x40b9   :  { %v10310_v6 = vpop.permute.xlu0 %10309 }
0x40bf   :  { %v13201_v3 = vpop.eup %13200 }
0x40c0   :  { %v10155_v47 = vmul.f32 %v13201_v3, %v13197_v59 }
0x40c2   :  { %12920 = vmatmul.mubr.msk.f32.vlgmr.msra.gmra.mxu0 %vm480_vm3, %v10155_v47 }
0x40c3   :  { %v13203_v53 = vpop.eup %13202  ;;  %12928 = vmatpush3.xpose.msk.msra.mxu0 %vm480_vm3, %v10312_v58  ;;  %12929 = vmatprep.mubr.msk.f32.mxu0 %vm13240_vm2, %v13239_v42 }
0x40c4   :  { %v10156_v55 = vmul.f32 %v13203_v53, %v13199_v63  ;;  %12937 = vmatprep.subr.mxu0 %v13239_v42 }
0x40c6   :  { %12925 = vmatmul.mubr.msk.f32.vlgmr.msra.gmra.mxu1 %vm480_vm3, %v10156_v55  ;;  %12930 = vmatmul.mubr.msk.f32.vlgmr.msra.gmra.mxu0 %vm480_vm3, %v10310_v6 }
0x40c7   :  { %12933 = vmatpush3.xpose.msk.msra.mxu1 %vm480_vm3, %v10390_v4  ;;  %12934 = vmatprep.mubr.msk.f32.mxu1 %vm13240_vm2, %v13239_v42 }
0x40c8   :  { %12942 = vmatprep.subr.mxu1 %v13239_v42  ;;  %12939 = vmatprep.mubr.msk.f32.mxu0 %vm13240_vm2, %v13239_v42 }
0x40ca   :  { %12935 = vmatmul.mubr.msk.f32.vlgmr.msra.gmra.mxu1 %vm480_vm3, %v10388_v40 }
0x40cb   :  { %12944 = vmatprep.mubr.msk.f32.mxu1 %vm13240_vm2, %v13239_v42 }
0x4182   :  { %v14981_v28 = vpop.f32.mrf.mxu0 }
0x4184   :  { %v12921_v8 = vpop.f32.mrf.mxu0 }
0x4186   :  { %v14983_v13 = vpop.f32.mrf.mxu1  ;;  %v10383_v14 = vpop.f32.mrf.mxu0 }
0x4187   :  { %v10465_v41 = vsel %vm480_vm3, %v10383_v14, -inf }
0x4188   :  { %v12926_v10 = vpop.f32.mrf.mxu1  ;;  %10466 = vmax.xlane.f32.xlu0 %v10465_v41  ;;  %v12931_v44 = vpop.f32.mrf.mxu0 }
0x418a   :  { %v10461_v54 = vpop.f32.mrf.mxu1 }
0x418b   :  { %v10468_v29 = vsel %vm480_vm3, %v10461_v54, -inf }
0x418c   :  { %10469 = vmax.xlane.f32.xlu1 %v10468_v29  ;;  %v12936_v15 = vpop.f32.mrf.mxu1 }
0x419d   :  { %10487 = vrot.lane.b32.xlu1 %v14884_v57, %s13244_s29 }
0x419e   :  { %10563 = vrot.lane.b32.xlu0 %v14894_v61, %s13244_s29 }
0x41a1   :  { %10641 = vrot.lane.b32.xlu1 %v14884_v57, %s13245_s30 }
0x41a5   :  { %10719 = vrot.lane.b32.xlu1 %v14894_v61, %s13245_s30 }
0x41a9   :  { %10717 = vrot.lane.b32.xlu1 %v14902_v62, %s13245_s30 }
0x4211   :  { %v10467_v16 = vpop.xlane.xlu0 %10466 }
0x4212   :  { %v10471_v30 = vsub.f32 %v10383_v14, %v10467_v16 }
0x4214   :  { %v10473_v0 = vmul.f32 1.442695, %v10471_v30  ;;  %v11001_v30 = vld [vmem:[%s15210_s1 + $0x170] sm:$0xff] }
0x4215   :  { %v10470_v27 = vpop.xlane.xlu1 %10469  ;;  %v10564_v52 = vpop.permute.xlu0 %10563 }
0x4216   :  { %13204 = vpow2.f32 %v10473_v0  ;;  %v10472_v23 = vsub.f32 %v10461_v54, %v10470_v27  ;;  %12943 = vmatpush3.msra.mxu1 %v10564_v52  ;;  %v11000_v0 = vld [vmem:[%s15210_s1 + $0x168] sm:$0xff]  ;;  %v10999_v27 = vld [vmem:[%s15210_s1 + $0x160] sm:$0xff] }
0x4217   :  { %12952 = vmatprep.subr.mxu1 %v13239_v42 }
0x4218   :  { %v10475_v45 = vmul.f32 1.442695, %v10472_v23 }
0x4219   :  { %v10488_v31 = vpop.permute.xlu1 %10487 }
0x421a   :  { %13206 = vpow2.f32 %v10475_v45  ;;  %12938 = vmatpush3.msra.mxu0 %v10488_v31 }
0x421b   :  { %12947 = vmatprep.subr.mxu0 %v13239_v42 }
0x421d   :  { %v10642_v1 = vpop.permute.xlu1 %10641 }
0x4221   :  { %v10720_v36 = vpop.permute.xlu1 %10719 }
0x4223   :  { %v13205_v5 = vpop.eup %13204 }
0x4224   :  { %v10477_v32 = vsel %vm480_vm3, %v13205_v5, 0.0 }
0x4225   :  { %10478 = vadd.xlane.f32.xlu0 %v10477_v32  ;;  %v10718_v56 = vpop.permute.xlu1 %10717 }
0x4227   :  { %v13207_v62 = vpop.eup %13206 }
0x4228   :  { %v10480_v48 = vsel %vm480_vm3, %v13207_v62, 0.0 }
0x4229   :  { %10481 = vadd.xlane.f32.xlu0 %v10480_v48 }
0x423f   :  { %10639 = vrot.lane.b32.xlu0 %v14891_v60, %s13245_s30 }
0x42ae   :  { %v10479_v37 = vpop.xlane.xlu0 %10478 }
0x42af   :  { %13208 = vrcp.f32 %v10479_v37 }
0x42b2   :  { %v10482_v21 = vpop.xlane.xlu0 %10481 }
0x42b3   :  { %13210 = vrcp.f32 %v10482_v21 }
0x42b6   :  { %v10640_v60 = vpop.permute.xlu0 %10639 }
0x42bc   :  { %v13209_v35 = vpop.eup %13208 }
0x42bd   :  { %v10485_v25 = vmul.f32 %v13209_v35, %v13205_v5 }
0x42bf   :  { %12940 = vmatmul.mubr.msk.f32.vlgmr.msra.gmra.mxu0 %vm480_vm3, %v10485_v25 }
0x42c0   :  { %v13211_v39 = vpop.eup %13210  ;;  %12948 = vmatpush3.xpose.msk.msra.mxu0 %vm480_vm3, %v10642_v1  ;;  %12949 = vmatprep.mubr.msk.f32.mxu0 %vm13240_vm2, %v13239_v42 }
0x42c1   :  { %v10486_v49 = vmul.f32 %v13211_v39, %v13207_v62  ;;  %12957 = vmatprep.subr.mxu0 %v13239_v42 }
0x42c3   :  { %12945 = vmatmul.mubr.msk.f32.vlgmr.msra.gmra.mxu1 %vm480_vm3, %v10486_v49  ;;  %12950 = vmatmul.mubr.msk.f32.vlgmr.msra.gmra.mxu0 %vm480_vm3, %v10640_v60 }
0x42c4   :  { %12953 = vmatpush3.xpose.msk.msra.mxu1 %vm480_vm3, %v10720_v36  ;;  %12954 = vmatprep.mubr.msk.f32.mxu1 %vm13240_vm2, %v13239_v42 }
0x42c5   :  { %12962 = vmatprep.subr.mxu1 %v13239_v42  ;;  %12959 = vmatprep.mubr.msk.f32.mxu0 %vm13240_vm2, %v13239_v42 }
0x42c7   :  { %12955 = vmatmul.mubr.msk.f32.vlgmr.msra.gmra.mxu1 %vm480_vm3, %v10718_v56 }
0x42c8   :  { %12964 = vmatprep.mubr.msk.f32.mxu1 %vm13240_vm2, %v13239_v42 }
0x437f   :  { %v10559_v19 = vpop.f32.mrf.mxu0 }
0x4381   :  { %v12941_v59 = vpop.f32.mrf.mxu0 }
0x4383   :  { %v10635_v51 = vpop.f32.mrf.mxu1  ;;  %v10713_v63 = vpop.f32.mrf.mxu0 }
0x4384   :  { %v10795_v18 = vsel %vm480_vm3, %v10713_v63, -inf }
0x4385   :  { %v12946_v26 = vpop.f32.mrf.mxu1  ;;  %10796 = vmax.xlane.f32.xlu0 %v10795_v18  ;;  %v12951_v43 = vpop.f32.mrf.mxu0 }
0x4387   :  { %v10791_v58 = vpop.f32.mrf.mxu1 }
0x4388   :  { %v10798_v3 = vsel %vm480_vm3, %v10791_v58, -inf }
0x4389   :  { %10799 = vmax.xlane.f32.xlu1 %v10798_v3  ;;  %v12956_v47 = vpop.f32.mrf.mxu1 }
0x439a   :  { %10817 = vrot.lane.b32.xlu1 %v14884_v57, %s13246_s4 }
0x439e   :  { %10971 = vrot.lane.b32.xlu1 %v14981_v28, %s13247_s5 }
0x43a2   :  { %10973 = vrot.lane.b32.xlu1 %v14983_v13, %s13247_s5 }
0x43a6   :  { %10981 = vrot.lane.b32.xlu1 %v10635_v51, %s13248_s0 }
0x440e   :  { %v10797_v42 = vpop.xlane.xlu0 %10796 }
0x440f   :  { %v10801_v53 = vsub.f32 %v10713_v63, %v10797_v42 }
0x4411   :  { %v10803_v4 = vmul.f32 1.442695, %v10801_v53 }
0x4412   :  { %v10800_v55 = vpop.xlane.xlu1 %10799 }
0x4413   :  { %13212 = vpow2.f32 %v10803_v4  ;;  %v10802_v6 = vsub.f32 %v10791_v58, %v10800_v55 }
0x4415   :  { %v10805_v40 = vmul.f32 1.442695, %v10802_v6 }
0x4416   :  { %v10818_v8 = vpop.permute.xlu1 %10817 }
0x4417   :  { %13214 = vpow2.f32 %v10805_v40  ;;  %12958 = vmatpush3.msra.mxu0 %v10818_v8 }
0x441a   :  { %v10972_v5 = vpop.permute.xlu1 %10971 }
0x441b   :  { %v10993_v48 = vsel %vm480_vm3, %v14943_v12, %v10972_v5  ;;  %v11618_v12 = vld [vmem:[%s15212_s2 + $0x7] ss:$0 sm:$0xff]  ;;  %v11621_v5 = vld [vmem:[%s15212_s2 + $0xa] ss:$0 sm:$0xff] }
0x441e   :  { %v10974_v32 = vpop.permute.xlu1 %10973 }
0x441f   :  { %v10994_v25 = vsel %vm480_vm3, %v14945_v24, %v10974_v32  ;;  %v13236_v24 = vld [vmem:[%s15212_s2 + $0x19] ss:$0 sm:$0xff] }
0x4420   :  { %v13213_v14 = vpop.eup %13212  ;;  %v3947_v63 = vadd.f32 %v13236_v24, %v14034_v50 }
0x4421   :  { %v10807_v57 = vsel %vm480_vm3, %v13213_v14, 0.0 }
0x4422   :  { %10808 = vadd.xlane.f32.xlu0 %v10807_v57  ;;  %v10982_v37 = vpop.permute.xlu1 %10981  ;;  %v15075_v42 = vadd.f32 %v3947_v63, %v13920_v7 }
0x4423   :  { %v10996_v39 = vsel %vm1823_vm5, %v10994_v25, %v10982_v37 }
0x4424   :  { %v13215_v28 = vpop.eup %13214  ;;  %v3957_v7 = vsel %vm29_vm0, %v15075_v42, 0.0 }
0x4425   :  { %v10810_v41 = vsel %vm480_vm3, %v13215_v28, 0.0 }
0x4426   :  { %10811 = vadd.xlane.f32.xlu0 %v10810_v41 }
0x443c   :  { %10893 = vrot.lane.b32.xlu0 %v14894_v61, %s13246_s4  ;;  %v11002_v61 = vld [vmem:[%s15210_s1 + $0x178] sm:$0xff] }
0x443d   :  { %12967 = vmatprep.subr.mxu0 %v11002_v61 }
0x4440   :  { %10979 = vrot.lane.b32.xlu0 %v10559_v19, %s13248_s0 }
0x44ab   :  { %v10809_v13 = vpop.xlane.xlu0 %10808 }
0x44ac   :  { %13216 = vrcp.f32 %v10809_v13 }
0x44af   :  { %v10812_v10 = vpop.xlane.xlu0 %10811 }
0x44b0   :  { %13218 = vrcp.f32 %v10812_v10  ;;  %v15098_v10 = vadd.f32 %v14625_v2, %v14526_v22  ;;  %v11142_v22 = vld [vmem:[%s15210_s1 + $0x188] sm:$0xff]  ;;  %v11141_v2 = vld [vmem:[%s15210_s1 + $0x180] sm:$0xff] }
0x44b3   :  { %v10894_v44 = vpop.permute.xlu0 %10893 }
0x44b4   :  { %12963 = vmatpush3.msra.mxu1 %v10894_v44 }
0x44b7   :  { %v10980_v62 = vpop.permute.xlu0 %10979 }
0x44b8   :  { %v10995_v21 = vsel %vm1823_vm5, %v10993_v48, %v10980_v62  ;;  %v11622_v62 = vld [vmem:[%s15212_s2 + $0xb] ss:$0 sm:$0xff] }
0x44b9   :  { %v13217_v54 = vpop.eup %13216 }
0x44ba   :  { %v10815_v29 = vmul.f32 %v13217_v54, %v13213_v14  ;;  %v7651_v54 = vsel %vm29_vm0, %v15098_v10, 0.0 }
0x44bc   :  { %12960 = vmatmul.mubr.msk.f32.vlgmr.msra.gmra.mxu0 %vm480_vm3, %v10815_v29  ;;  %v11240_v29 = vld [vmem:[%s15210_s1 + $0x1d8] sm:$0xff] }
0x44bd   :  { %v13219_v15 = vpop.eup %13218  ;;  %12968 = vmatpush3.msra.mxu0 %v11002_v61  ;;  %v11237_v61 = vld [vmem:[%s15210_s1 + $0x1c0] sm:$0xff] }
0x44be   :  { %v10816_v16 = vmul.f32 %v13219_v15, %v13215_v28  ;;  %12969 = vmatprep.subr.mxu0 %v11001_v30  ;;  %v11239_v15 = vld [vmem:[%s15210_s1 + $0x1d0] sm:$0xff] }
0x44bf   :  { %12970 = vmatpush3.msra.mxu0 %v11001_v30 }
0x44c0   :  { %12965 = vmatmul.mubr.msk.f32.vlgmr.msra.gmra.mxu1 %vm480_vm3, %v10816_v16  ;;  %12971 = vmatprep.subr.mxu0 %v11000_v0  ;;  %v11238_v16 = vld [vmem:[%s15210_s1 + $0x1c8] sm:$0xff] }
0x44c1   :  { %12972 = vmatpush3.msra.mxu0 %v11000_v0 }
0x44c2   :  { %12973 = vmatprep.subr.mxu0 %v10999_v27 }
0x44c3   :  { %12974 = vmatpush3.msra.mxu0 %v10999_v27 }
0x44c4   :  { %12989 = vmatprep.subr.mxu0 %v11240_v29 }
0x457c   :  { %v10889_v52 = vpop.f32.mrf.mxu0 }
0x457d   :  { %10987 = vrot.lane.b32.xlu0 %v10889_v52, %s13249_s14 }
0x457e   :  { %v12961_v23 = vpop.f32.mrf.mxu0 }
0x4580   :  { %v10965_v45 = vpop.f32.mrf.mxu1 }
0x4581   :  { %10989 = vrot.lane.b32.xlu1 %v10965_v45, %s13249_s14  ;;  %11093 = vrot.lane.b32.xlu0 %v14871_v38, %s13238_s19 }
0x4582   :  { %v12966_v31 = vpop.f32.mrf.mxu1 }
0x4585   :  { %11095 = vrot.lane.b32.xlu1 %v14873_v11, %s13238_s19 }
0x45ef   :  { %v10988_v1 = vpop.permute.xlu0 %10987 }
0x45f0   :  { %v10997_v35 = vsel %vm1826_vm4, %v10995_v21, %v10988_v1 }
0x45f1   :  { %12975 = vmatprep.mubr.msk.f32.mxu0 %vm29_vm0, %v10997_v35 }
0x45f3   :  { %v10990_v36 = vpop.permute.xlu1 %10989  ;;  %v11094_v47 = vpop.permute.xlu0 %11093 }
0x45f4   :  { %v10998_v49 = vsel %vm1826_vm4, %v10996_v39, %v10990_v36  ;;  %v11236_v39 = vld [vmem:[%s15210_s1 + $0x1b8] sm:$0xff]  ;;  %v11235_v36 = vld [vmem:[%s15210_s1 + $0x1b0] sm:$0xff] }
0x45f5   :  { %12976 = vmatmul.mubr.msk.f32.vlgmr.msra.gmra.mxu0 %vm29_vm0, %v10998_v49  ;;  %v11234_v49 = vld [vmem:[%s15210_s1 + $0x1a8] sm:$0xff] }
0x45f6   :  { %12990 = vmatpush3.msra.mxu0 %v11240_v29 }
0x45f7   :  { %v11096_v43 = vpop.permute.xlu1 %11095  ;;  %12991 = vmatprep.subr.mxu0 %v11239_v15 }
0x45f8   :  { %12992 = vmatpush3.msra.mxu0 %v11239_v15 }
0x45f9   :  { %12993 = vmatprep.subr.mxu0 %v11238_v16 }
0x45fa   :  { %12994 = vmatpush3.msra.mxu0 %v11238_v16 }
0x45fb   :  { %12995 = vmatprep.subr.mxu0 %v11237_v61 }
0x45fc   :  { %12996 = vmatpush3.msra.mxu0 %v11237_v61 }
0x45fd   :  { %12997 = vmatprep.subr.mxu0 %v11236_v39 }
0x45fe   :  { %12998 = vmatpush3.msra.mxu0 %v11236_v39 }
0x45ff   :  { %12999 = vmatprep.subr.mxu0 %v11235_v36 }
0x4600   :  { %13000 = vmatpush3.msra.mxu0 %v11235_v36 }
0x4601   :  { %13001 = vmatprep.subr.mxu0 %v11234_v49 }
0x4602   :  { %13002 = vmatpush3.msra.mxu0 %v11234_v49  ;;  %v11468_v49 = vld [vmem:[%s15212_s2 + $0x1d] ss:$0 sm:$0xff] }
0x46b5   :  { %v12977_v60 = vpop.f32.mrf.mxu0 }
0x46b6   :  { %v11086_v56 = vadd.f32 %v12977_v60, %v11618_v12  ;;  %v11623_v60 = vld [vmem:[%s15212_s2 + $0x8] ss:$0 sm:$0xff] }
0x46b7   :  { %v11080_v19 = vpop.f32.mrf.mxu0 }
0x46b8   :  { %v11090_v59 = vadd.f32 %v11086_v56, %v13373_v34  ;;  %v11081_v51 = vadd.f32 %v11618_v12, %v11080_v19  ;;  %v13237_v34 = vld [vmem:[%s15212_s2 + $0x29] ss:$0 sm:$0xff]  ;;  %v11233_v12 = vld [vmem:[%s15210_s1 + $0x1a0] sm:$0xff] }
0x46b9   :  { %v7638_v53 = vadd.f32 %v13237_v34, %v14627_v20  ;;  %13003 = vmatprep.subr.mxu0 %v11233_v12 }
0x46ba   :  { %v11092_v18 = vadd.f32 %v11090_v59, %v14873_v11  ;;  %v11089_v26 = vadd.f32 %v11081_v51, %v13369_v33  ;;  %13004 = vmatpush3.msra.mxu0 %v11233_v12 }
0x46bc   :  { %v11091_v58 = vadd.f32 %v11089_v26, %v14871_v38  ;;  %v11100_v3 = vadd.f32 %v11096_v43, %v11092_v18  ;;  %v15084_v38 = vadd.f32 %v7638_v53, %v14522_v17  ;;  %v15093_v17 = vadd.f32 %v14032_v46, %v13927_v9  ;;  %v11144_v9 = vld [vmem:[%s15210_s1 + $0x198] sm:$0xff]  ;;  %v11143_v46 = vld [vmem:[%s15210_s1 + $0x190] sm:$0xff] }
0x46bd   :  { %12978 = vmatprep.subr.mxu1 %v11144_v9 }
0x46be   :  { %v11104_v50 = vsel %vm29_vm0, %v11100_v3, 0.0  ;;  %v11099_v4 = vadd.f32 %v11094_v47, %v11091_v58  ;;  %v7648_v11 = vsel %vm29_vm0, %v15084_v38, 0.0  ;;  %v3960_v44 = vsel %vm29_vm0, %v15093_v17, 0.0  ;;  %12979 = vmatpush3.msra.mxu1 %v11144_v9 }
0x46bf   :  { %11105 = vadd.xlane.f32.xlu1 %v11104_v50  ;;  %12980 = vmatprep.subr.mxu1 %v11143_v46 }
0x46c0   :  { %v11101_v33 = vsel %vm29_vm0, %v11099_v4, 0.0  ;;  %12981 = vmatpush3.msra.mxu1 %v11143_v46 }
0x46c1   :  { %11102 = vadd.xlane.f32.xlu0 %v11101_v33  ;;  %12982 = vmatprep.subr.mxu1 %v11142_v22 }
0x46c2   :  { %12983 = vmatpush3.msra.mxu1 %v11142_v22 }
0x46c3   :  { %3958 = vadd.xlane.f32.xlu1 %v3957_v7  ;;  %12984 = vmatprep.subr.mxu1 %v11141_v2 }
0x46c4   :  { %12985 = vmatpush3.msra.mxu1 %v11141_v2 }
0x46c7   :  { %7649 = vadd.xlane.f32.xlu1 %v7648_v11 }
0x4748   :  { %v11106_v55 = vpop.xlane.xlu1 %11105 }
0x4749   :  { %v11108_v20 = vmul.f32 0.03125, %v11106_v55 }
0x474a   :  { %v11103_v6 = vpop.xlane.xlu0 %11102 }
0x474b   :  { %v11107_v40 = vmul.f32 0.03125, %v11103_v6  ;;  %v11110_v8 = vsub.f32 %v11100_v3, %v11108_v20  ;;  %v11626_v3 = vld [vmem:[%s15212_s2 + $0x9] ss:$0 sm:$0xff] }
0x474c   :  { %v3959_v26 = vpop.xlane.xlu1 %3958 }
0x474d   :  { %v11109_v14 = vsub.f32 %v11099_v4, %v11107_v40  ;;  %v11112_v41 = vmul.f32 %v11110_v8, %v11110_v8  ;;  %v3963_v47 = vmul.f32 0.03125, %v3959_v26 }
0x474f   :  { %v11111_v57 = vmul.f32 %v11109_v14, %v11109_v14  ;;  %v11116_v13 = vsel %vm29_vm0, %v11112_v41, 0.0  ;;  %v3965_v11 = vsub.f32 %v15075_v42, %v3963_v47 }
0x4750   :  { %v7650_v34 = vpop.xlane.xlu1 %7649 }
0x4751   :  { %v11113_v28 = vsel %vm29_vm0, %v11111_v57, 0.0  ;;  %v7654_v55 = vmul.f32 0.03125, %v7650_v34 }
0x4752   :  { %11114 = vadd.xlane.f32.xlu0 %v11113_v28 }
0x4753   :  { %v7656_v28 = vsub.f32 %v15084_v38, %v7654_v55 }
0x4756   :  { %11117 = vadd.xlane.f32.xlu0 %v11116_v13 }
0x475a   :  { %3961 = vadd.xlane.f32.xlu0 %v3960_v44 }
0x475e   :  { %7652 = vadd.xlane.f32.xlu0 %v7651_v54  ;;  %v7658_v54 = vmul.f32 %v7656_v28, %v7656_v28 }
0x4760   :  { %v7660_v9 = vsel %vm29_vm0, %v7658_v54, 0.0 }
0x47db   :  { %v11115_v30 = vpop.xlane.xlu0 %11114 }
0x47dc   :  { %v11119_v0 = vmul.f32 0.03125, %v11115_v30 }
0x47de   :  { %v11121_v27 = vadd.f32 1e-12, %v11119_v0 }
0x47df   :  { %v11118_v52 = vpop.xlane.xlu0 %11117 }
0x47e0   :  { %13220 = vrsqrt.f32 %v11121_v27  ;;  %v11120_v23 = vmul.f32 0.03125, %v11118_v52 }
0x47e2   :  { %v11122_v45 = vadd.f32 1e-12, %v11120_v23 }
0x47e3   :  { %v3962_v18 = vpop.xlane.xlu0 %3961 }
0x47e4   :  { %13222 = vrsqrt.f32 %v11122_v45  ;;  %v3964_v43 = vmul.f32 0.03125, %v3962_v18  ;;  %v11549_v18 = vld [vmem:[%s15212_s2 + $0x2d] ss:$0 sm:$0xff] }
0x47e6   :  { %v3966_v50 = vsub.f32 %v15093_v17, %v3964_v43  ;;  %v3967_v17 = vmul.f32 %v3965_v11, %v3965_v11 }
0x47e7   :  { %v7653_v58 = vpop.xlane.xlu0 %7652 }
0x47e8   :  { %v7655_v4 = vmul.f32 0.03125, %v7653_v58  ;;  %v3968_v57 = vmul.f32 %v3966_v50, %v3966_v50  ;;  %v3969_v42 = vsel %vm29_vm0, %v3967_v17, 0.0 }
0x47ea   :  { %v7657_v40 = vsub.f32 %v15098_v10, %v7655_v4  ;;  %v3972_v13 = vsel %vm29_vm0, %v3968_v57, 0.0 }
0x47ec   :  { %v7659_v44 = vmul.f32 %v7657_v40, %v7657_v40 }
0x47ed   :  { %v13221_v31 = vpop.eup %13220 }
0x47ee   :  { %v11125_v32 = vmul.f32 %v13221_v31, %v11109_v14  ;;  %v7663_v10 = vsel %vm29_vm0, %v7659_v44, 0.0 }
0x47f0   :  { %v11132_v48 = vmul.f32 %v11621_v5, %v11125_v32 }
0x47f1   :  { %v13223_v37 = vpop.eup %13222 }
0x47f2   :  { %v11126_v21 = vmul.f32 %v13223_v37, %v11110_v8  ;;  %v11139_v1 = vadd.f32 %v11622_v62, %v11132_v48 }
0x47f4   :  { %v11133_v35 = vmul.f32 %v11621_v5, %v11126_v21  ;;  %12986 = vmatprep.mubr.msk.f32.mxu1 %vm29_vm0, %v11139_v1 }
0x47f6   :  { %v11140_v25 = vadd.f32 %v11622_v62, %v11133_v35 }
0x47f8   :  { %12987 = vmatmul.mubr.msk.f32.vlgmr.msra.gmra.mxu1 %vm29_vm0, %v11140_v25 }
0x48b8   :  { %v12988_v56 = vpop.f32.mrf.mxu1 }
0x48b9   :  { %v11228_v19 = vadd.f32 %v12988_v56, %v11623_v60 }
0x48ba   :  { %v11222_v59 = vpop.f32.mrf.mxu1 }
0x48bb   :  { %v11223_v51 = vadd.f32 %v11623_v60, %v11222_v59  ;;  %v11232_v63 = vmax.f32 %v11228_v19, 0.0  ;;  %v11548_v19 = vld [vmem:[%s15212_s2 + $0x2c] ss:$0 sm:$0xff] }
0x48bd   :  { %v11231_v24 = vmax.f32 %v11223_v51, 0.0 }
0x48bf   :  { %13005 = vmatprep.mubr.msk.f32.mxu0 %vm400_vm1, %v11231_v24 }
0x48c0   :  { %13006 = vmatmul.mubr.msk.f32.vlgmr.msra.gmra.mxu0 %vm400_vm1, %v11232_v63 }
0x4980   :  { %v13007_v53 = vpop.f32.mrf.mxu0 }
0x4981   :  { %v11324_v33 = vadd.f32 %v13007_v53, %v11626_v3 }
0x4982   :  { %v11318_v7 = vpop.f32.mrf.mxu0 }
0x4983   :  { %v11328_v20 = vadd.f32 %v11324_v33, %v11140_v25  ;;  %v11319_v6 = vadd.f32 %v11626_v3, %v11318_v7  ;;  %v11467_v25 = vld [vmem:[%s15212_s2 + $0x1c] ss:$0 sm:$0xff] }
0x4985   :  { %v11327_v8 = vadd.f32 %v11319_v6, %v11139_v1  ;;  %v11332_v14 = vsel %vm29_vm0, %v11328_v20, 0.0 }
0x4986   :  { %11333 = vadd.xlane.f32.xlu0 %v11332_v14 }
0x4987   :  { %v11329_v41 = vsel %vm29_vm0, %v11327_v8, 0.0 }
0x4988   :  { %11330 = vadd.xlane.f32.xlu1 %v11329_v41 }
0x498a   :  { %3973 = vadd.xlane.f32.xlu0 %v3972_v13 }
0x498c   :  { %3970 = vadd.xlane.f32.xlu1 %v3969_v42 }
0x498e   :  { %7664 = vadd.xlane.f32.xlu0 %v7663_v10 }
0x4990   :  { %7661 = vadd.xlane.f32.xlu1 %v7660_v9 }
0x4a0f   :  { %v11334_v46 = vpop.xlane.xlu0 %11333 }
0x4a10   :  { %v11336_v38 = vmul.f32 0.03125, %v11334_v46 }
0x4a11   :  { %v11331_v22 = vpop.xlane.xlu1 %11330 }
0x4a12   :  { %v11338_v2 = vsub.f32 %v11328_v20, %v11336_v38  ;;  %v11335_v29 = vmul.f32 0.03125, %v11331_v22  ;;  %v11629_v20 = vld [vmem:[%s15212_s2 + $0xc] ss:$0 sm:$0xff] }
0x4a13   :  { %v3974_v15 = vpop.xlane.xlu0 %3973 }
0x4a14   :  { %v11337_v16 = vsub.f32 %v11327_v8, %v11335_v29  ;;  %v3976_v61 = vmul.f32 0.03125, %v3974_v15  ;;  %v11340_v30 = vmul.f32 %v11338_v2, %v11338_v2  ;;  %v11630_v8 = vld [vmem:[%s15212_s2 + $0xd] ss:$0 sm:$0xff] }
0x4a15   :  { %v3971_v0 = vpop.xlane.xlu1 %3970 }
0x4a16   :  { %v3978_v27 = vadd.f32 1e-12, %v3976_v61  ;;  %v3975_v52 = vmul.f32 0.03125, %v3971_v0  ;;  %v11344_v23 = vsel %vm29_vm0, %v11340_v30, 0.0  ;;  %v11339_v45 = vmul.f32 %v11337_v16, %v11337_v16 }
0x4a17   :  { %11345 = vadd.xlane.f32.xlu0 %v11344_v23  ;;  %v7665_v31 = vpop.xlane.xlu0 %7664 }
0x4a18   :  { %13224 = vrsqrt.f32 %v3978_v27  ;;  %v3977_v5 = vadd.f32 1e-12, %v3975_v52  ;;  %v7667_v32 = vmul.f32 0.03125, %v7665_v31  ;;  %v11341_v62 = vsel %vm29_vm0, %v11339_v45, 0.0 }
0x4a19   :  { %11342 = vadd.xlane.f32.xlu1 %v11341_v62  ;;  %v7662_v48 = vpop.xlane.xlu1 %7661 }
0x4a1a   :  { %13226 = vrsqrt.f32 %v3977_v5  ;;  %v7669_v37 = vadd.f32 1e-12, %v7667_v32  ;;  %v7666_v21 = vmul.f32 0.03125, %v7662_v48 }
0x4a1c   :  { %13228 = vrsqrt.f32 %v7669_v37  ;;  %v7668_v1 = vadd.f32 1e-12, %v7666_v21 }
0x4a1e   :  { %13230 = vrsqrt.f32 %v7668_v1 }
0x4a25   :  { %v13225_v35 = vpop.eup %13224 }
0x4a26   :  { %v3982_v39 = vmul.f32 %v13225_v35, %v3966_v50 }
0x4a27   :  { %v13227_v36 = vpop.eup %13226 }
0x4a28   :  { %v3989_v12 = vmul.f32 %v11467_v25, %v3982_v39  ;;  %v3981_v60 = vmul.f32 %v13227_v36, %v3965_v11 }
0x4a29   :  { %v13229_v56 = vpop.eup %13228 }
0x4a2a   :  { %v3996_v59 = vadd.f32 %v11468_v49, %v3989_v12  ;;  %v3988_v51 = vmul.f32 %v11467_v25, %v3981_v60  ;;  %v7673_v24 = vmul.f32 %v13229_v56, %v7657_v40 }
0x4a2b   :  { %v13231_v63 = vpop.eup %13230 }
0x4a2c   :  { %11372 = vst.msk [vmem:[%s15213_s3 + $0x18] sm:$0xff] %vm29_vm0, %v3996_v59  ;;  %v3995_v26 = vadd.f32 %v11468_v49, %v3988_v51  ;;  %v7680_v43 = vmul.f32 %v11548_v19, %v7673_v24  ;;  %v7672_v58 = vmul.f32 %v13231_v63, %v7656_v28 }
0x4a2e   :  { %11371 = vst.msk [vmem:[%s15213_s3 + $0x10] sm:$0xff] %vm29_vm0, %v3995_v26  ;;  %v7687_v3 = vadd.f32 %v11549_v18, %v7680_v43  ;;  %v7679_v47 = vmul.f32 %v11548_v19, %v7672_v58 }
0x4a30   :  { %11374 = vst.msk [vmem:[%s15213_s3 + $0x28] sm:$0xff] %vm29_vm0, %v7687_v3  ;;  %v7686_v34 = vadd.f32 %v11549_v18, %v7679_v47 }
0x4a32   :  { %11373 = vst.msk [vmem:[%s15213_s3 + $0x20] sm:$0xff] %vm29_vm0, %v7686_v34 }
0x4aa0   :  { %v11346_v53 = vpop.xlane.xlu0 %11345 }
0x4aa1   :  { %v11348_v50 = vmul.f32 0.03125, %v11346_v53 }
0x4aa2   :  { %v11343_v4 = vpop.xlane.xlu1 %11342 }
0x4aa3   :  { %v11350_v33 = vadd.f32 1e-12, %v11348_v50  ;;  %v11347_v7 = vmul.f32 0.03125, %v11343_v4 }
0x4aa5   :  { %13232 = vrsqrt.f32 %v11350_v33  ;;  %v11349_v11 = vadd.f32 1e-12, %v11347_v7 }
0x4aa7   :  { %13234 = vrsqrt.f32 %v11349_v11 }
0x4ab2   :  { %v13233_v55 = vpop.eup %13232 }
0x4ab3   :  { %v11354_v6 = vmul.f32 %v13233_v55, %v11338_v2 }
0x4ab4   :  { %v13235_v40 = vpop.eup %13234 }
0x4ab5   :  { %v11361_v14 = vmul.f32 %v11629_v20, %v11354_v6  ;;  %v11353_v57 = vmul.f32 %v13235_v40, %v11337_v16 }
0x4ab7   :  { %v11368_v28 = vadd.f32 %v11630_v8, %v11361_v14  ;;  %v11360_v41 = vmul.f32 %v11629_v20, %v11353_v57 }
0x4ab9   :  { %11370 = vst.msk [vmem:[%s15213_s3 + $0x8] sm:$0xff] %vm29_vm0, %v11368_v28  ;;  %v11367_v17 = vadd.f32 %v11630_v8, %v11360_v41 }
0x4abb   :  { %11369 = vst.msk [vmem:[%s15213_s3] sm:$0xff] %vm29_vm0, %v11367_v17 }

</bundles_post_ra>
